<compile_context>
chip_gen: v7x
topology: tpu7x:2x2x1
jax: 0.10.0
libtpu: 0.0.40
codegen_flags: <defaults>
</compile_context>

<pallas_src>
import functools

import jax
import jax.numpy as jnp
import numpy as np
from jax.experimental import pallas as pl
from jax.experimental.pallas import tpu as pltpu

LANE = 128


def _round_up(x, m):
    return (x + m - 1) // m * m


def _hgblock_kernel(top_ref, xin_ref, bot_ref, w1_ref, w2_ref, b1_ref, b2_ref,
                    o_ref, y1_ref, *, n_zero_rows):
    # top_ref : (1, 2,   Wc, Cp) bf16  rows [t*H_t-2, t*H_t)   (clamped/zeroed for t==0)
    # xin_ref : (1, H_t, Wc, Cp) bf16  rows [t*H_t, (t+1)*H_t) (conv input AND residual)
    # bot_ref : (1, 2,   Wc, Cp) bf16  rows [(t+1)*H_t, (t+1)*H_t+2)
    # w1/w2   : (9, Cp, Cp)      bf16  BN-scale-folded 3x3 taps, k = dh*3 + dw
    # b1/b2   : (1, Cp)          f32   folded BN biases
    # o_ref   : (1, H_t, W, Cp)  f32
    # y1_ref  : (H_t+2, Wc, Cp)  bf16  conv1 output incl. conv2's zero padding
    t = pl.program_id(1)
    _, h_t, w_img, cp = o_ref.shape
    wc = xin_ref.shape[2]
    he = h_t + 2

    xmain = xin_ref[0]                                              # (h_t, wc, cp) bf16
    # conv1's zero padding in H for the first tile (top halo block was clamped to row 0)
    top = jnp.where(t == 0, jnp.zeros_like(top_ref[0]), top_ref[0])
    xt = jnp.concatenate([top, xmain, bot_ref[0]], axis=0)          # (h_t+4, wc, cp)

    # ---- conv1 (+bias+ReLU): 9 accumulating MXU dots on h_t+2 rows (conv2's row halo) ----
    acc1 = jnp.zeros((he * w_img, cp), jnp.float32)
    for k in range(9):
        dh, dw = divmod(k, 3)
        patch = xt[dh:dh + he, dw:dw + w_img, :].reshape(he * w_img, cp)
        acc1 = acc1 + jnp.dot(patch, w1_ref[k], preferred_element_type=jnp.float32)
    y1 = jnp.maximum(acc1 + b1_ref[...], 0.0).astype(jnp.bfloat16)
    y1_ref[:, 1:1 + w_img, :] = y1.reshape(he, w_img, cp)

    # conv2's zero padding in W: edge columns must be exact zeros, not conv1 values
    y1_ref[:, 0:1, :] = jnp.zeros((he, 1, cp), jnp.bfloat16)
    y1_ref[:, 1 + w_img:wc, :] = jnp.zeros((he, wc - w_img - 1, cp), jnp.bfloat16)

    # conv2's zero padding in H: only the first / last row tile has out-of-image rows
    @pl.when(t == 0)
    def _():
        y1_ref[0:1, :, :] = jnp.zeros((1, wc, cp), jnp.bfloat16)

    @pl.when(t == pl.num_programs(1) - 1)
    def _():
        y1_ref[he - n_zero_rows:he, :, :] = jnp.zeros((n_zero_rows, wc, cp), jnp.bfloat16)

    # ---- conv2 + bias + residual + ReLU ----
    acc2 = jnp.zeros((h_t * w_img, cp), jnp.float32)
    for k in range(9):
        dh, dw = divmod(k, 3)
        patch = y1_ref[dh:dh + h_t, dw:dw + w_img, :].reshape(h_t * w_img, cp)
        acc2 = acc2 + jnp.dot(patch, w2_ref[k], preferred_element_type=jnp.float32)

    res = xmain[:, 1:1 + w_img, :].astype(jnp.float32).reshape(h_t * w_img, cp)
    out = jnp.maximum(acc2 + b2_ref[...] + res, 0.0)
    o_ref[0] = out.reshape(h_t, w_img, cp).astype(o_ref.dtype)


@functools.partial(jax.jit, static_argnames=("row_tile",))
def hgblock_pallas(x_nchw, w1_hwio, w2_hwio, s1, b1, s2, b2, *, row_tile=32):
    B, C, H, W = x_nchw.shape
    Cp = _round_up(max(C, LANE), LANE)                 # lane-dense channel dim
    H_t = min(_round_up(H, 8), _round_up(row_tile, 8))  # rows per tile (multiple of 8)
    T = -(-H // H_t)                                   # number of row tiles
    Hp = T * H_t
    Wc = _round_up(W + 2, 8)                           # width incl. conv pad, sublane-aligned

    # Single padded NHWC bf16 activation stream (provides conv input, halos and residual).
    # (NCHW<->NHWC transposes are only here to match the PyTorch interface; keep
    #  activations in padded NHWC across the surrounding graph if possible.)
    x = jnp.transpose(x_nchw, (0, 2, 3, 1))
    xm = jnp.pad(x, ((0, 0), (0, Hp + 2 - H), (1, Wc - W - 1), (0, Cp - C)))
    xm = xm.astype(jnp.bfloat16)                       # (B, Hp+2, Wc, Cp)

    # fold BN scale into conv output channels, pad, lay out as (9, Cp, Cp) bf16
    def prep_w(w, s):
        w = w * s.reshape(1, 1, 1, C)
        w = jnp.pad(w, ((0, 0), (0, 0), (0, Cp - C), (0, Cp - C)))
        return w.reshape(9, Cp, Cp).astype(jnp.bfloat16)

    w1m, w2m = prep_w(w1_hwio, s1), prep_w(w2_hwio, s2)
    b1p = jnp.pad(b1, (0, Cp - C)).reshape(1, Cp).astype(jnp.float32)
    b2p = jnp.pad(b2, (0, Cp - C)).reshape(1, Cp).astype(jnp.float32)

    kernel = functools.partial(_hgblock_kernel, n_zero_rows=Hp - H + 1)
    hh = H_t // 2  # halo blocks are 2 rows tall; index_maps return size-2 block indices

    out = pl.pallas_call(
        kernel,
        out_shape=jax.ShapeDtypeStruct((B, Hp, W, Cp), jnp.float32),
        grid_spec=pltpu.PrefetchScalarGridSpec(
            num_scalar_prefetch=0,
            grid=(B, T),
            in_specs=[
                # top halo: rows [t*H_t-2, t*H_t), clamped to 0 for t==0 (zeroed in-kernel)
                pl.BlockSpec((1, 2, Wc, Cp),
                             lambda b, t: (b, jnp.maximum(t * hh - 1, 0), 0, 0)),
                # main tile: rows [t*H_t, (t+1)*H_t)
                pl.BlockSpec((1, H_t, Wc, Cp), lambda b, t: (b, t, 0, 0)),
                # bottom halo: rows [(t+1)*H_t, (t+1)*H_t + 2) -- always in bounds (Hp+2 rows)
                pl.BlockSpec((1, 2, Wc, Cp), lambda b, t: (b, (t + 1) * hh, 0, 0)),
                pl.BlockSpec((9, Cp, Cp), lambda b, t: (0, 0, 0)),
                pl.BlockSpec((9, Cp, Cp), lambda b, t: (0, 0, 0)),
                pl.BlockSpec((1, Cp), lambda b, t: (0, 0)),
                pl.BlockSpec((1, Cp), lambda b, t: (0, 0)),
            ],
            out_specs=pl.BlockSpec((1, H_t, W, Cp), lambda b, t: (b, t, 0, 0)),
            scratch_shapes=[pltpu.VMEM((H_t + 2, Wc, Cp), jnp.bfloat16)],
        ),
        compiler_params=pltpu.CompilerParams(
            dimension_semantics=("parallel", "parallel"),
            vmem_limit_bytes=32 * 1024 * 1024),
    )(xm, xm, xm, w1m, w2m, b1p, b2p)

    # strip row/channel padding, back to NCHW
    out = out[:, :H, :, :C]
    return jnp.transpose(out, (0, 3, 1, 2))


def _reference(x_nchw, w1_hwio, w2_hwio, s1, b1, s2, b2):
    # pure-JAX f32 reference (NHWC conv via lax) for correctness check
    x = jnp.transpose(x_nchw, (0, 2, 3, 1))
    dn = jax.lax.conv_dimension_numbers(x.shape, w1_hwio.shape,
                                        ("NHWC", "HWIO", "NHWC"))
    y = jax.lax.conv_general_dilated(x, w1_hwio, (1, 1), "SAME",
                                     dimension_numbers=dn)
    y = jnp.maximum(y * s1 + b1, 0.0)
    y = jax.lax.conv_general_dilated(y, w2_hwio, (1, 1), "SAME",
                                     dimension_numbers=dn)
    y = y * s2 + b2
    y = jnp.maximum(y + x, 0.0)
    return jnp.transpose(y, (0, 3, 1, 2))


if __name__ == "__main__":
    B, C, H, W = 2, 4, 16, 16
    key = jax.random.PRNGKey(0)
    kx, kw1, kw2, kg1, kb1, kg2, kb2, km1, kv1, km2, kv2 = jax.random.split(key, 11)

    x = jax.random.normal(kx, (B, C, H, W), dtype=jnp.float32)

    # conv weights: PyTorch shape (Cout, Cin, 3, 3) -> HWIO (3, 3, Cin, Cout)
    w1_oihw = jax.random.normal(kw1, (C, C, 3, 3), dtype=jnp.float32) * 0.1
    w2_oihw = jax.random.normal(kw2, (C, C, 3, 3), dtype=jnp.float32) * 0.1
    w1_hwio = jnp.transpose(w1_oihw, (2, 3, 1, 0))
    w2_hwio = jnp.transpose(w2_oihw, (2, 3, 1, 0))

    # BatchNorm parameters (eval mode): scale = gamma / sqrt(var + eps),
    # bias = beta - mean * scale
    eps = 1e-5
    gamma1 = 1.0 + 0.1 * jax.random.normal(kg1, (C,), dtype=jnp.float32)
    beta1 = 0.1 * jax.random.normal(kb1, (C,), dtype=jnp.float32)
    mean1 = 0.1 * jax.random.normal(km1, (C,), dtype=jnp.float32)
    var1 = jnp.abs(jax.random.normal(kv1, (C,), dtype=jnp.float32)) + 0.5
    gamma2 = 1.0 + 0.1 * jax.random.normal(kg2, (C,), dtype=jnp.float32)
    beta2 = 0.1 * jax.random.normal(kb2, (C,), dtype=jnp.float32)
    mean2 = 0.1 * jax.random.normal(km2, (C,), dtype=jnp.float32)
    var2 = jnp.abs(jax.random.normal(kv2, (C,), dtype=jnp.float32)) + 0.5

    s1 = gamma1 / jnp.sqrt(var1 + eps)
    b1 = beta1 - mean1 * s1
    s2 = gamma2 / jnp.sqrt(var2 + eps)
    b2 = beta2 - mean2 * s2

    ref = jax.block_until_ready(_reference(x, w1_hwio, w2_hwio, s1, b1, s2, b2))

    # default row_tile -> single row tile per batch (grid (2, 1))
    out = jax.block_until_ready(hgblock_pallas(x, w1_hwio, w2_hwio, s1, b1, s2, b2))
    # bf16 activations / residual on the MXU path -> loosened tolerance (f32 accumulation)
    np.testing.assert_allclose(np.asarray(out), np.asarray(ref), rtol=2e-2, atol=3e-2)

    # row_tile=8 -> 2 row tiles for H=16, exercising the halo / edge-row zeroing path
    out2 = jax.block_until_ready(
        hgblock_pallas(x, w1_hwio, w2_hwio, s1, b1, s2, b2, row_tile=8))
    np.testing.assert_allclose(np.asarray(out2), np.asarray(ref), rtol=2e-2, atol=3e-2)

    print("KERNEL_OK")
</pallas_src>

<mosaic_0001>
module attributes {stable_mosaic.version = 11 : i64} {
  func.func @_hgblock_kernel(%arg0: i32, %arg1: i32, %arg2: memref<1x2x24x128xbf16, #tpu.memory_space<vmem>>, %arg3: memref<1x16x24x128xbf16, #tpu.memory_space<vmem>>, %arg4: memref<1x2x24x128xbf16, #tpu.memory_space<vmem>>, %arg5: memref<9x128x128xbf16, #tpu.memory_space<vmem>>, %arg6: memref<9x128x128xbf16, #tpu.memory_space<vmem>>, %arg7: memref<1x128xf32, #tpu.memory_space<vmem>>, %arg8: memref<1x128xf32, #tpu.memory_space<vmem>>, %arg9: memref<1x16x16x128xf32, #tpu.memory_space<vmem>>, %arg10: memref<18x24x128xbf16, #tpu.memory_space<vmem>>) attributes {dimension_semantics = [#tpu.dimension_semantics<parallel>, #tpu.dimension_semantics<parallel>], iteration_bounds = array<i64: 2, 1>, scalar_prefetch = 0 : i64, scratch_operands = 1 : i64, tpu.core_type = #tpu.core_type<tc>, window_params = [{transform_indices = @transform_0, window_bounds = array<i64: 1, 2, 24, 128>}, {transform_indices = @transform_1, window_bounds = array<i64: 1, 16, 24, 128>}, {transform_indices = @transform_2, window_bounds = array<i64: 1, 2, 24, 128>}, {pipeline_mode = #tpu.pipeline_mode<synchronous>, transform_indices = @transform_3, window_bounds = array<i64: 9, 128, 128>}, {pipeline_mode = #tpu.pipeline_mode<synchronous>, transform_indices = @transform_4, window_bounds = array<i64: 9, 128, 128>}, {pipeline_mode = #tpu.pipeline_mode<synchronous>, transform_indices = @transform_5, window_bounds = array<i64: 1, 128>}, {pipeline_mode = #tpu.pipeline_mode<synchronous>, transform_indices = @transform_6, window_bounds = array<i64: 1, 128>}, {transform_indices = @transform_7, window_bounds = array<i64: 1, 16, 16, 128>}]} {
    %c0 = arith.constant 0 : index
    %c0_0 = arith.constant 0 : index
    %c0_1 = arith.constant 0 : index
    %c0_2 = arith.constant 0 : index
    %0 = vector.load %arg3[%c0, %c0_0, %c0_1, %c0_2] : memref<1x16x24x128xbf16, #tpu.memory_space<vmem>>, vector<1x16x24x128xbf16>
    %1 = vector.shape_cast %0 : vector<1x16x24x128xbf16> to vector<16x24x128xbf16>
    %c0_i32 = arith.constant 0 : i32
    %2 = arith.cmpi eq, %arg1, %c0_i32 : i32
    %cst = arith.constant 0.000000e+00 : bf16
    %3 = vector.broadcast %cst : bf16 to vector<2x24x128xbf16>
    %c0_3 = arith.constant 0 : index
    %c0_4 = arith.constant 0 : index
    %c0_5 = arith.constant 0 : index
    %c0_6 = arith.constant 0 : index
    %4 = vector.load %arg2[%c0_3, %c0_4, %c0_5, %c0_6] : memref<1x2x24x128xbf16, #tpu.memory_space<vmem>>, vector<1x2x24x128xbf16>
    %5 = vector.shape_cast %4 : vector<1x2x24x128xbf16> to vector<2x24x128xbf16>
    %6 = arith.select %2, %3, %5 : vector<2x24x128xbf16>
    %c0_7 = arith.constant 0 : index
    %c0_8 = arith.constant 0 : index
    %c0_9 = arith.constant 0 : index
    %c0_10 = arith.constant 0 : index
    %7 = vector.load %arg4[%c0_7, %c0_8, %c0_9, %c0_10] : memref<1x2x24x128xbf16, #tpu.memory_space<vmem>>, vector<1x2x24x128xbf16>
    %8 = vector.shape_cast %7 : vector<1x2x24x128xbf16> to vector<2x24x128xbf16>
    %9 = tpu.concatenate %6, %1, %8 in 0 : vector<2x24x128xbf16>, vector<16x24x128xbf16>, vector<2x24x128xbf16> -> vector<20x24x128xbf16>
    %cst_11 = arith.constant 0.000000e+00 : f32
    %10 = vector.broadcast %cst_11 : f32 to vector<288x128xf32>
    %11 = vector.extract_strided_slice %9 {offsets = [0, 0, 0], sizes = [18, 16, 128], strides = [1, 1, 1]} : vector<20x24x128xbf16> to vector<18x16x128xbf16>
    %12 = vector.shape_cast %11 : vector<18x16x128xbf16> to vector<288x128xbf16>
    %c0_12 = arith.constant 0 : index
    %c0_13 = arith.constant 0 : index
    %c0_14 = arith.constant 0 : index
    %13 = vector.load %arg5[%c0_12, %c0_13, %c0_14] : memref<9x128x128xbf16, #tpu.memory_space<vmem>>, vector<1x128x128xbf16>
    %14 = vector.shape_cast %13 : vector<1x128x128xbf16> to vector<128x128xbf16>
    %cst_15 = arith.constant dense<0.000000e+00> : vector<288x128xf32>
    %15 = tpu.matmul %12, %14, %cst_15 {dimension_numbers = #tpu.dot_dimension_numbers<[1], [0], [0], [1], [0, 0, 1, 1], [], []>} : vector<288x128xbf16>, vector<128x128xbf16>, vector<288x128xf32> -> vector<288x128xf32>
    %16 = arith.addf %10, %15 : vector<288x128xf32>
    %17 = vector.extract_strided_slice %9 {offsets = [0, 1, 0], sizes = [18, 16, 128], strides = [1, 1, 1]} : vector<20x24x128xbf16> to vector<18x16x128xbf16>
    %18 = vector.shape_cast %17 : vector<18x16x128xbf16> to vector<288x128xbf16>
    %c1 = arith.constant 1 : index
    %c0_16 = arith.constant 0 : index
    %c0_17 = arith.constant 0 : index
    %19 = vector.load %arg5[%c1, %c0_16, %c0_17] : memref<9x128x128xbf16, #tpu.memory_space<vmem>>, vector<1x128x128xbf16>
    %20 = vector.shape_cast %19 : vector<1x128x128xbf16> to vector<128x128xbf16>
    %cst_18 = arith.constant dense<0.000000e+00> : vector<288x128xf32>
    %21 = tpu.matmul %18, %20, %cst_18 {dimension_numbers = #tpu.dot_dimension_numbers<[1], [0], [0], [1], [0, 0, 1, 1], [], []>} : vector<288x128xbf16>, vector<128x128xbf16>, vector<288x128xf32> -> vector<288x128xf32>
    %22 = arith.addf %16, %21 : vector<288x128xf32>
    %23 = vector.extract_strided_slice %9 {offsets = [0, 2, 0], sizes = [18, 16, 128], strides = [1, 1, 1]} : vector<20x24x128xbf16> to vector<18x16x128xbf16>
    %24 = vector.shape_cast %23 : vector<18x16x128xbf16> to vector<288x128xbf16>
    %c2 = arith.constant 2 : index
    %c0_19 = arith.constant 0 : index
    %c0_20 = arith.constant 0 : index
    %25 = vector.load %arg5[%c2, %c0_19, %c0_20] : memref<9x128x128xbf16, #tpu.memory_space<vmem>>, vector<1x128x128xbf16>
    %26 = vector.shape_cast %25 : vector<1x128x128xbf16> to vector<128x128xbf16>
    %cst_21 = arith.constant dense<0.000000e+00> : vector<288x128xf32>
    %27 = tpu.matmul %24, %26, %cst_21 {dimension_numbers = #tpu.dot_dimension_numbers<[1], [0], [0], [1], [0, 0, 1, 1], [], []>} : vector<288x128xbf16>, vector<128x128xbf16>, vector<288x128xf32> -> vector<288x128xf32>
    %28 = arith.addf %22, %27 : vector<288x128xf32>
    %29 = vector.extract_strided_slice %9 {offsets = [1, 0, 0], sizes = [18, 16, 128], strides = [1, 1, 1]} : vector<20x24x128xbf16> to vector<18x16x128xbf16>
    %30 = vector.shape_cast %29 : vector<18x16x128xbf16> to vector<288x128xbf16>
    %c3 = arith.constant 3 : index
    %c0_22 = arith.constant 0 : index
    %c0_23 = arith.constant 0 : index
    %31 = vector.load %arg5[%c3, %c0_22, %c0_23] : memref<9x128x128xbf16, #tpu.memory_space<vmem>>, vector<1x128x128xbf16>
    %32 = vector.shape_cast %31 : vector<1x128x128xbf16> to vector<128x128xbf16>
    %cst_24 = arith.constant dense<0.000000e+00> : vector<288x128xf32>
    %33 = tpu.matmul %30, %32, %cst_24 {dimension_numbers = #tpu.dot_dimension_numbers<[1], [0], [0], [1], [0, 0, 1, 1], [], []>} : vector<288x128xbf16>, vector<128x128xbf16>, vector<288x128xf32> -> vector<288x128xf32>
    %34 = arith.addf %28, %33 : vector<288x128xf32>
    %35 = vector.extract_strided_slice %9 {offsets = [1, 1, 0], sizes = [18, 16, 128], strides = [1, 1, 1]} : vector<20x24x128xbf16> to vector<18x16x128xbf16>
    %36 = vector.shape_cast %35 : vector<18x16x128xbf16> to vector<288x128xbf16>
    %c4 = arith.constant 4 : index
    %c0_25 = arith.constant 0 : index
    %c0_26 = arith.constant 0 : index
    %37 = vector.load %arg5[%c4, %c0_25, %c0_26] : memref<9x128x128xbf16, #tpu.memory_space<vmem>>, vector<1x128x128xbf16>
    %38 = vector.shape_cast %37 : vector<1x128x128xbf16> to vector<128x128xbf16>
    %cst_27 = arith.constant dense<0.000000e+00> : vector<288x128xf32>
    %39 = tpu.matmul %36, %38, %cst_27 {dimension_numbers = #tpu.dot_dimension_numbers<[1], [0], [0], [1], [0, 0, 1, 1], [], []>} : vector<288x128xbf16>, vector<128x128xbf16>, vector<288x128xf32> -> vector<288x128xf32>
    %40 = arith.addf %34, %39 : vector<288x128xf32>
    %41 = vector.extract_strided_slice %9 {offsets = [1, 2, 0], sizes = [18, 16, 128], strides = [1, 1, 1]} : vector<20x24x128xbf16> to vector<18x16x128xbf16>
    %42 = vector.shape_cast %41 : vector<18x16x128xbf16> to vector<288x128xbf16>
    %c5 = arith.constant 5 : index
    %c0_28 = arith.constant 0 : index
    %c0_29 = arith.constant 0 : index
    %43 = vector.load %arg5[%c5, %c0_28, %c0_29] : memref<9x128x128xbf16, #tpu.memory_space<vmem>>, vector<1x128x128xbf16>
    %44 = vector.shape_cast %43 : vector<1x128x128xbf16> to vector<128x128xbf16>
    %cst_30 = arith.constant dense<0.000000e+00> : vector<288x128xf32>
    %45 = tpu.matmul %42, %44, %cst_30 {dimension_numbers = #tpu.dot_dimension_numbers<[1], [0], [0], [1], [0, 0, 1, 1], [], []>} : vector<288x128xbf16>, vector<128x128xbf16>, vector<288x128xf32> -> vector<288x128xf32>
    %46 = arith.addf %40, %45 : vector<288x128xf32>
    %47 = vector.extract_strided_slice %9 {offsets = [2, 0, 0], sizes = [18, 16, 128], strides = [1, 1, 1]} : vector<20x24x128xbf16> to vector<18x16x128xbf16>
    %48 = vector.shape_cast %47 : vector<18x16x128xbf16> to vector<288x128xbf16>
    %c6 = arith.constant 6 : index
    %c0_31 = arith.constant 0 : index
    %c0_32 = arith.constant 0 : index
    %49 = vector.load %arg5[%c6, %c0_31, %c0_32] : memref<9x128x128xbf16, #tpu.memory_space<vmem>>, vector<1x128x128xbf16>
    %50 = vector.shape_cast %49 : vector<1x128x128xbf16> to vector<128x128xbf16>
    %cst_33 = arith.constant dense<0.000000e+00> : vector<288x128xf32>
    %51 = tpu.matmul %48, %50, %cst_33 {dimension_numbers = #tpu.dot_dimension_numbers<[1], [0], [0], [1], [0, 0, 1, 1], [], []>} : vector<288x128xbf16>, vector<128x128xbf16>, vector<288x128xf32> -> vector<288x128xf32>
    %52 = arith.addf %46, %51 : vector<288x128xf32>
    %53 = vector.extract_strided_slice %9 {offsets = [2, 1, 0], sizes = [18, 16, 128], strides = [1, 1, 1]} : vector<20x24x128xbf16> to vector<18x16x128xbf16>
    %54 = vector.shape_cast %53 : vector<18x16x128xbf16> to vector<288x128xbf16>
    %c7 = arith.constant 7 : index
    %c0_34 = arith.constant 0 : index
    %c0_35 = arith.constant 0 : index
    %55 = vector.load %arg5[%c7, %c0_34, %c0_35] : memref<9x128x128xbf16, #tpu.memory_space<vmem>>, vector<1x128x128xbf16>
    %56 = vector.shape_cast %55 : vector<1x128x128xbf16> to vector<128x128xbf16>
    %cst_36 = arith.constant dense<0.000000e+00> : vector<288x128xf32>
    %57 = tpu.matmul %54, %56, %cst_36 {dimension_numbers = #tpu.dot_dimension_numbers<[1], [0], [0], [1], [0, 0, 1, 1], [], []>} : vector<288x128xbf16>, vector<128x128xbf16>, vector<288x128xf32> -> vector<288x128xf32>
    %58 = arith.addf %52, %57 : vector<288x128xf32>
    %59 = vector.extract_strided_slice %9 {offsets = [2, 2, 0], sizes = [18, 16, 128], strides = [1, 1, 1]} : vector<20x24x128xbf16> to vector<18x16x128xbf16>
    %60 = vector.shape_cast %59 : vector<18x16x128xbf16> to vector<288x128xbf16>
    %c8 = arith.constant 8 : index
    %c0_37 = arith.constant 0 : index
    %c0_38 = arith.constant 0 : index
    %61 = vector.load %arg5[%c8, %c0_37, %c0_38] : memref<9x128x128xbf16, #tpu.memory_space<vmem>>, vector<1x128x128xbf16>
    %62 = vector.shape_cast %61 : vector<1x128x128xbf16> to vector<128x128xbf16>
    %cst_39 = arith.constant dense<0.000000e+00> : vector<288x128xf32>
    %63 = tpu.matmul %60, %62, %cst_39 {dimension_numbers = #tpu.dot_dimension_numbers<[1], [0], [0], [1], [0, 0, 1, 1], [], []>} : vector<288x128xbf16>, vector<128x128xbf16>, vector<288x128xf32> -> vector<288x128xf32>
    %64 = arith.addf %58, %63 : vector<288x128xf32>
    %c0_40 = arith.constant 0 : index
    %c0_41 = arith.constant 0 : index
    %65 = vector.load %arg7[%c0_40, %c0_41] : memref<1x128xf32, #tpu.memory_space<vmem>>, vector<1x128xf32>
    %66 = vector.broadcast %65 : vector<1x128xf32> to vector<288x128xf32>
    %67 = arith.addf %64, %66 : vector<288x128xf32>
    %cst_42 = arith.constant 0.000000e+00 : f32
    %68 = vector.broadcast %cst_42 : f32 to vector<288x128xf32>
    %69 = arith.maximumf %67, %68 : vector<288x128xf32>
    %70 = arith.truncf %69 : vector<288x128xf32> to vector<288x128xbf16>
    %71 = vector.shape_cast %70 : vector<288x128xbf16> to vector<18x16x128xbf16>
    %c0_43 = arith.constant 0 : index
    %c1_44 = arith.constant 1 : index
    %c0_45 = arith.constant 0 : index
    %72 = vector.load %arg10[%c0_43, %c1_44, %c0_45] : memref<18x24x128xbf16, #tpu.memory_space<vmem>>, vector<18x16x128xbf16>
    tpu.vector_store %arg10[%c0_43, %c1_44, %c0_45], %71 {strides = array<i32>} : memref<18x24x128xbf16, #tpu.memory_space<vmem>>, vector<18x16x128xbf16>,
    %cst_46 = arith.constant 0.000000e+00 : bf16
    %73 = vector.broadcast %cst_46 : bf16 to vector<18x1x128xbf16>
    %c0_47 = arith.constant 0 : index
    %c0_48 = arith.constant 0 : index
    %c0_49 = arith.constant 0 : index
    %74 = vector.load %arg10[%c0_47, %c0_48, %c0_49] : memref<18x24x128xbf16, #tpu.memory_space<vmem>>, vector<18x1x128xbf16>
    tpu.vector_store %arg10[%c0_47, %c0_48, %c0_49], %73 {strides = array<i32>} : memref<18x24x128xbf16, #tpu.memory_space<vmem>>, vector<18x1x128xbf16>,
    %cst_50 = arith.constant 0.000000e+00 : bf16
    %75 = vector.broadcast %cst_50 : bf16 to vector<18x7x128xbf16>
    %c0_51 = arith.constant 0 : index
    %c17 = arith.constant 17 : index
    %c0_52 = arith.constant 0 : index
    %76 = vector.load %arg10[%c0_51, %c17, %c0_52] : memref<18x24x128xbf16, #tpu.memory_space<vmem>>, vector<18x7x128xbf16>
    tpu.vector_store %arg10[%c0_51, %c17, %c0_52], %75 {strides = array<i32>} : memref<18x24x128xbf16, #tpu.memory_space<vmem>>, vector<18x7x128xbf16>,
    %c0_i32_53 = arith.constant 0 : i32
    %77 = arith.cmpi eq, %arg1, %c0_i32_53 : i32
    %78 = arith.extui %77 : i1 to i32
    %c0_i32_54 = arith.constant 0 : i32
    %79 = arith.cmpi ne, %78, %c0_i32_54 : i32
    scf.if %79 {
      %cst_128 = arith.constant 0.000000e+00 : bf16
      %151 = vector.broadcast %cst_128 : bf16 to vector<1x24x128xbf16>
      %c0_129 = arith.constant 0 : index
      %c0_130 = arith.constant 0 : index
      %c0_131 = arith.constant 0 : index
      %152 = vector.load %arg10[%c0_129, %c0_130, %c0_131] : memref<18x24x128xbf16, #tpu.memory_space<vmem>>, vector<1x24x128xbf16>
      tpu.vector_store %arg10[%c0_129, %c0_130, %c0_131], %151 {strides = array<i32>} : memref<18x24x128xbf16, #tpu.memory_space<vmem>>, vector<1x24x128xbf16>,
    } else {
    }
    %c0_i32_55 = arith.constant 0 : i32
    %80 = arith.cmpi eq, %arg1, %c0_i32_55 : i32
    %81 = arith.extui %80 : i1 to i32
    %c0_i32_56 = arith.constant 0 : i32
    %82 = arith.cmpi ne, %81, %c0_i32_56 : i32
    scf.if %82 {
      %cst_128 = arith.constant 0.000000e+00 : bf16
      %151 = vector.broadcast %cst_128 : bf16 to vector<1x24x128xbf16>
      %c17_129 = arith.constant 17 : index
      %c0_130 = arith.constant 0 : index
      %c0_131 = arith.constant 0 : index
      %152 = vector.load %arg10[%c17_129, %c0_130, %c0_131] : memref<18x24x128xbf16, #tpu.memory_space<vmem>>, vector<1x24x128xbf16>
      tpu.vector_store %arg10[%c17_129, %c0_130, %c0_131], %151 {strides = array<i32>} : memref<18x24x128xbf16, #tpu.memory_space<vmem>>, vector<1x24x128xbf16>,
    } else {
    }
    %cst_57 = arith.constant 0.000000e+00 : f32
    %83 = vector.broadcast %cst_57 : f32 to vector<256x128xf32>
    %c0_58 = arith.constant 0 : index
    %c0_59 = arith.constant 0 : index
    %c0_60 = arith.constant 0 : index
    %84 = vector.load %arg10[%c0_58, %c0_59, %c0_60] : memref<18x24x128xbf16, #tpu.memory_space<vmem>>, vector<16x16x128xbf16>
    %85 = vector.shape_cast %84 : vector<16x16x128xbf16> to vector<256x128xbf16>
    %c0_61 = arith.constant 0 : index
    %c0_62 = arith.constant 0 : index
    %c0_63 = arith.constant 0 : index
    %86 = vector.load %arg6[%c0_61, %c0_62, %c0_63] : memref<9x128x128xbf16, #tpu.memory_space<vmem>>, vector<1x128x128xbf16>
    %87 = vector.shape_cast %86 : vector<1x128x128xbf16> to vector<128x128xbf16>
    %cst_64 = arith.constant dense<0.000000e+00> : vector<256x128xf32>
    %88 = tpu.matmul %85, %87, %cst_64 {dimension_numbers = #tpu.dot_dimension_numbers<[1], [0], [0], [1], [0, 0, 1, 1], [], []>} : vector<256x128xbf16>, vector<128x128xbf16>, vector<256x128xf32> -> vector<256x128xf32>
    %89 = arith.addf %83, %88 : vector<256x128xf32>
    %c0_65 = arith.constant 0 : index
    %c1_66 = arith.constant 1 : index
    %c0_67 = arith.constant 0 : index
    %90 = vector.load %arg10[%c0_65, %c1_66, %c0_67] : memref<18x24x128xbf16, #tpu.memory_space<vmem>>, vector<16x16x128xbf16>
    %91 = vector.shape_cast %90 : vector<16x16x128xbf16> to vector<256x128xbf16>
    %c1_68 = arith.constant 1 : index
    %c0_69 = arith.constant 0 : index
    %c0_70 = arith.constant 0 : index
    %92 = vector.load %arg6[%c1_68, %c0_69, %c0_70] : memref<9x128x128xbf16, #tpu.memory_space<vmem>>, vector<1x128x128xbf16>
    %93 = vector.shape_cast %92 : vector<1x128x128xbf16> to vector<128x128xbf16>
    %cst_71 = arith.constant dense<0.000000e+00> : vector<256x128xf32>
    %94 = tpu.matmul %91, %93, %cst_71 {dimension_numbers = #tpu.dot_dimension_numbers<[1], [0], [0], [1], [0, 0, 1, 1], [], []>} : vector<256x128xbf16>, vector<128x128xbf16>, vector<256x128xf32> -> vector<256x128xf32>
    %95 = arith.addf %89, %94 : vector<256x128xf32>
    %c0_72 = arith.constant 0 : index
    %c2_73 = arith.constant 2 : index
    %c0_74 = arith.constant 0 : index
    %96 = vector.load %arg10[%c0_72, %c2_73, %c0_74] : memref<18x24x128xbf16, #tpu.memory_space<vmem>>, vector<16x16x128xbf16>
    %97 = vector.shape_cast %96 : vector<16x16x128xbf16> to vector<256x128xbf16>
    %c2_75 = arith.constant 2 : index
    %c0_76 = arith.constant 0 : index
    %c0_77 = arith.constant 0 : index
    %98 = vector.load %arg6[%c2_75, %c0_76, %c0_77] : memref<9x128x128xbf16, #tpu.memory_space<vmem>>, vector<1x128x128xbf16>
    %99 = vector.shape_cast %98 : vector<1x128x128xbf16> to vector<128x128xbf16>
    %cst_78 = arith.constant dense<0.000000e+00> : vector<256x128xf32>
    %100 = tpu.matmul %97, %99, %cst_78 {dimension_numbers = #tpu.dot_dimension_numbers<[1], [0], [0], [1], [0, 0, 1, 1], [], []>} : vector<256x128xbf16>, vector<128x128xbf16>, vector<256x128xf32> -> vector<256x128xf32>
    %101 = arith.addf %95, %100 : vector<256x128xf32>
    %c1_79 = arith.constant 1 : index
    %c0_80 = arith.constant 0 : index
    %c0_81 = arith.constant 0 : index
    %102 = vector.load %arg10[%c1_79, %c0_80, %c0_81] : memref<18x24x128xbf16, #tpu.memory_space<vmem>>, vector<16x16x128xbf16>
    %103 = vector.shape_cast %102 : vector<16x16x128xbf16> to vector<256x128xbf16>
    %c3_82 = arith.constant 3 : index
    %c0_83 = arith.constant 0 : index
    %c0_84 = arith.constant 0 : index
    %104 = vector.load %arg6[%c3_82, %c0_83, %c0_84] : memref<9x128x128xbf16, #tpu.memory_space<vmem>>, vector<1x128x128xbf16>
    %105 = vector.shape_cast %104 : vector<1x128x128xbf16> to vector<128x128xbf16>
    %cst_85 = arith.constant dense<0.000000e+00> : vector<256x128xf32>
    %106 = tpu.matmul %103, %105, %cst_85 {dimension_numbers = #tpu.dot_dimension_numbers<[1], [0], [0], [1], [0, 0, 1, 1], [], []>} : vector<256x128xbf16>, vector<128x128xbf16>, vector<256x128xf32> -> vector<256x128xf32>
    %107 = arith.addf %101, %106 : vector<256x128xf32>
    %c1_86 = arith.constant 1 : index
    %c1_87 = arith.constant 1 : index
    %c0_88 = arith.constant 0 : index
    %108 = vector.load %arg10[%c1_86, %c1_87, %c0_88] : memref<18x24x128xbf16, #tpu.memory_space<vmem>>, vector<16x16x128xbf16>
    %109 = vector.shape_cast %108 : vector<16x16x128xbf16> to vector<256x128xbf16>
    %c4_89 = arith.constant 4 : index
    %c0_90 = arith.constant 0 : index
    %c0_91 = arith.constant 0 : index
    %110 = vector.load %arg6[%c4_89, %c0_90, %c0_91] : memref<9x128x128xbf16, #tpu.memory_space<vmem>>, vector<1x128x128xbf16>
    %111 = vector.shape_cast %110 : vector<1x128x128xbf16> to vector<128x128xbf16>
    %cst_92 = arith.constant dense<0.000000e+00> : vector<256x128xf32>
    %112 = tpu.matmul %109, %111, %cst_92 {dimension_numbers = #tpu.dot_dimension_numbers<[1], [0], [0], [1], [0, 0, 1, 1], [], []>} : vector<256x128xbf16>, vector<128x128xbf16>, vector<256x128xf32> -> vector<256x128xf32>
    %113 = arith.addf %107, %112 : vector<256x128xf32>
    %c1_93 = arith.constant 1 : index
    %c2_94 = arith.constant 2 : index
    %c0_95 = arith.constant 0 : index
    %114 = vector.load %arg10[%c1_93, %c2_94, %c0_95] : memref<18x24x128xbf16, #tpu.memory_space<vmem>>, vector<16x16x128xbf16>
    %115 = vector.shape_cast %114 : vector<16x16x128xbf16> to vector<256x128xbf16>
    %c5_96 = arith.constant 5 : index
    %c0_97 = arith.constant 0 : index
    %c0_98 = arith.constant 0 : index
    %116 = vector.load %arg6[%c5_96, %c0_97, %c0_98] : memref<9x128x128xbf16, #tpu.memory_space<vmem>>, vector<1x128x128xbf16>
    %117 = vector.shape_cast %116 : vector<1x128x128xbf16> to vector<128x128xbf16>
    %cst_99 = arith.constant dense<0.000000e+00> : vector<256x128xf32>
    %118 = tpu.matmul %115, %117, %cst_99 {dimension_numbers = #tpu.dot_dimension_numbers<[1], [0], [0], [1], [0, 0, 1, 1], [], []>} : vector<256x128xbf16>, vector<128x128xbf16>, vector<256x128xf32> -> vector<256x128xf32>
    %119 = arith.addf %113, %118 : vector<256x128xf32>
    %c2_100 = arith.constant 2 : index
    %c0_101 = arith.constant 0 : index
    %c0_102 = arith.constant 0 : index
    %120 = vector.load %arg10[%c2_100, %c0_101, %c0_102] : memref<18x24x128xbf16, #tpu.memory_space<vmem>>, vector<16x16x128xbf16>
    %121 = vector.shape_cast %120 : vector<16x16x128xbf16> to vector<256x128xbf16>
    %c6_103 = arith.constant 6 : index
    %c0_104 = arith.constant 0 : index
    %c0_105 = arith.constant 0 : index
    %122 = vector.load %arg6[%c6_103, %c0_104, %c0_105] : memref<9x128x128xbf16, #tpu.memory_space<vmem>>, vector<1x128x128xbf16>
    %123 = vector.shape_cast %122 : vector<1x128x128xbf16> to vector<128x128xbf16>
    %cst_106 = arith.constant dense<0.000000e+00> : vector<256x128xf32>
    %124 = tpu.matmul %121, %123, %cst_106 {dimension_numbers = #tpu.dot_dimension_numbers<[1], [0], [0], [1], [0, 0, 1, 1], [], []>} : vector<256x128xbf16>, vector<128x128xbf16>, vector<256x128xf32> -> vector<256x128xf32>
    %125 = arith.addf %119, %124 : vector<256x128xf32>
    %c2_107 = arith.constant 2 : index
    %c1_108 = arith.constant 1 : index
    %c0_109 = arith.constant 0 : index
    %126 = vector.load %arg10[%c2_107, %c1_108, %c0_109] : memref<18x24x128xbf16, #tpu.memory_space<vmem>>, vector<16x16x128xbf16>
    %127 = vector.shape_cast %126 : vector<16x16x128xbf16> to vector<256x128xbf16>
    %c7_110 = arith.constant 7 : index
    %c0_111 = arith.constant 0 : index
    %c0_112 = arith.constant 0 : index
    %128 = vector.load %arg6[%c7_110, %c0_111, %c0_112] : memref<9x128x128xbf16, #tpu.memory_space<vmem>>, vector<1x128x128xbf16>
    %129 = vector.shape_cast %128 : vector<1x128x128xbf16> to vector<128x128xbf16>
    %cst_113 = arith.constant dense<0.000000e+00> : vector<256x128xf32>
    %130 = tpu.matmul %127, %129, %cst_113 {dimension_numbers = #tpu.dot_dimension_numbers<[1], [0], [0], [1], [0, 0, 1, 1], [], []>} : vector<256x128xbf16>, vector<128x128xbf16>, vector<256x128xf32> -> vector<256x128xf32>
    %131 = arith.addf %125, %130 : vector<256x128xf32>
    %c2_114 = arith.constant 2 : index
    %c2_115 = arith.constant 2 : index
    %c0_116 = arith.constant 0 : index
    %132 = vector.load %arg10[%c2_114, %c2_115, %c0_116] : memref<18x24x128xbf16, #tpu.memory_space<vmem>>, vector<16x16x128xbf16>
    %133 = vector.shape_cast %132 : vector<16x16x128xbf16> to vector<256x128xbf16>
    %c8_117 = arith.constant 8 : index
    %c0_118 = arith.constant 0 : index
    %c0_119 = arith.constant 0 : index
    %134 = vector.load %arg6[%c8_117, %c0_118, %c0_119] : memref<9x128x128xbf16, #tpu.memory_space<vmem>>, vector<1x128x128xbf16>
    %135 = vector.shape_cast %134 : vector<1x128x128xbf16> to vector<128x128xbf16>
    %cst_120 = arith.constant dense<0.000000e+00> : vector<256x128xf32>
    %136 = tpu.matmul %133, %135, %cst_120 {dimension_numbers = #tpu.dot_dimension_numbers<[1], [0], [0], [1], [0, 0, 1, 1], [], []>} : vector<256x128xbf16>, vector<128x128xbf16>, vector<256x128xf32> -> vector<256x128xf32>
    %137 = arith.addf %131, %136 : vector<256x128xf32>
    %138 = vector.extract_strided_slice %1 {offsets = [0, 1, 0], sizes = [16, 16, 128], strides = [1, 1, 1]} : vector<16x24x128xbf16> to vector<16x16x128xbf16>
    %139 = arith.extf %138 : vector<16x16x128xbf16> to vector<16x16x128xf32>
    %140 = vector.shape_cast %139 : vector<16x16x128xf32> to vector<256x128xf32>
    %c0_121 = arith.constant 0 : index
    %c0_122 = arith.constant 0 : index
    %141 = vector.load %arg8[%c0_121, %c0_122] : memref<1x128xf32, #tpu.memory_space<vmem>>, vector<1x128xf32>
    %142 = vector.broadcast %141 : vector<1x128xf32> to vector<256x128xf32>
    %143 = arith.addf %137, %142 : vector<256x128xf32>
    %144 = arith.addf %143, %140 : vector<256x128xf32>
    %cst_123 = arith.constant 0.000000e+00 : f32
    %145 = vector.broadcast %cst_123 : f32 to vector<256x128xf32>
    %146 = arith.maximumf %144, %145 : vector<256x128xf32>
    %147 = vector.shape_cast %146 : vector<256x128xf32> to vector<16x16x128xf32>
    %c0_124 = arith.constant 0 : index
    %c0_125 = arith.constant 0 : index
    %c0_126 = arith.constant 0 : index
    %c0_127 = arith.constant 0 : index
    %148 = vector.load %arg9[%c0_124, %c0_125, %c0_126, %c0_127] : memref<1x16x16x128xf32, #tpu.memory_space<vmem>>, vector<1x16x16x128xf32>
    %149 = vector.shape_cast %148 : vector<1x16x16x128xf32> to vector<16x16x128xf32>
    %150 = vector.shape_cast %147 : vector<16x16x128xf32> to vector<1x16x16x128xf32>
    tpu.vector_store %arg9[%c0_124, %c0_125, %c0_126, %c0_127], %150 {strides = array<i32>} : memref<1x16x16x128xf32, #tpu.memory_space<vmem>>, vector<1x16x16x128xf32>,
    return
  }
  func.func @transform_0(%arg0: i32, %arg1: i32) -> (i32, i32, i32, i32) {
    %c8_i32 = arith.constant 8 : i32
    %0 = arith.muli %arg1, %c8_i32 : i32
    %c1_i32 = arith.constant 1 : i32
    %1 = arith.subi %0, %c1_i32 : i32
    %c0_i32 = arith.constant 0 : i32
    %2 = arith.maxsi %1, %c0_i32 : i32
    %c0_i32_0 = arith.constant 0 : i32
    %c0_i32_1 = arith.constant 0 : i32
    %c0_i32_2 = arith.constant 0 : i32
    return %arg0, %2, %c0_i32_0, %c0_i32_1 : i32, i32, i32, i32
  }
  func.func @transform_1(%arg0: i32, %arg1: i32) -> (i32, i32, i32, i32) {
    %c0_i32 = arith.constant 0 : i32
    %c0_i32_0 = arith.constant 0 : i32
    %c0_i32_1 = arith.constant 0 : i32
    return %arg0, %arg1, %c0_i32, %c0_i32_0 : i32, i32, i32, i32
  }
  func.func @transform_2(%arg0: i32, %arg1: i32) -> (i32, i32, i32, i32) {
    %c1_i32 = arith.constant 1 : i32
    %0 = arith.addi %arg1, %c1_i32 : i32
    %c8_i32 = arith.constant 8 : i32
    %1 = arith.muli %0, %c8_i32 : i32
    %c0_i32 = arith.constant 0 : i32
    %c0_i32_0 = arith.constant 0 : i32
    %c0_i32_1 = arith.constant 0 : i32
    return %arg0, %1, %c0_i32, %c0_i32_0 : i32, i32, i32, i32
  }
  func.func @transform_3(%arg0: i32, %arg1: i32) -> (i32, i32, i32) {
    %c0_i32 = arith.constant 0 : i32
    %c0_i32_0 = arith.constant 0 : i32
    %c0_i32_1 = arith.constant 0 : i32
    %c0_i32_2 = arith.constant 0 : i32
    return %c0_i32, %c0_i32_0, %c0_i32_1 : i32, i32, i32
  }
  func.func @transform_4(%arg0: i32, %arg1: i32) -> (i32, i32, i32) {
    %c0_i32 = arith.constant 0 : i32
    %c0_i32_0 = arith.constant 0 : i32
    %c0_i32_1 = arith.constant 0 : i32
    %c0_i32_2 = arith.constant 0 : i32
    return %c0_i32, %c0_i32_0, %c0_i32_1 : i32, i32, i32
  }
  func.func @transform_5(%arg0: i32, %arg1: i32) -> (i32, i32) {
    %c0_i32 = arith.constant 0 : i32
    %c0_i32_0 = arith.constant 0 : i32
    %c0_i32_1 = arith.constant 0 : i32
    return %c0_i32, %c0_i32_0 : i32, i32
  }
  func.func @transform_6(%arg0: i32, %arg1: i32) -> (i32, i32) {
    %c0_i32 = arith.constant 0 : i32
    %c0_i32_0 = arith.constant 0 : i32
    %c0_i32_1 = arith.constant 0 : i32
    return %c0_i32, %c0_i32_0 : i32, i32
  }
  func.func @transform_7(%arg0: i32, %arg1: i32) -> (i32, i32, i32, i32) {
    %c0_i32 = arith.constant 0 : i32
    %c0_i32_0 = arith.constant 0 : i32
    %c0_i32_1 = arith.constant 0 : i32
    return %arg0, %arg1, %c0_i32, %c0_i32_0 : i32, i32, i32, i32
  }
}

</mosaic_0001>

<bundles_post_ra>
// kernel: hgblock_pallas.1
= control target key start
LH: loop header
LB: loop body
LE: loop exit
PB: predicated region body
PF: predicated region fallthrough
CT: control target
= control target key end

     0   :  { %s13048_s23 = smov 0   ;;  %s13050_s24 = smov 0   ;;  %s16189_s0 = inlined_call_operand.vmem [shape: bf16[2,18,24,128], index: 0, kind: input, shape index: {}, may-alias: {0,1,2}]   ;;  %s16190_s1 = inlined_call_operand.vmem [shape: bf16[2,18,24,128], index: 1, kind: input, shape index: {}, may-alias: {0,1,2}]   ;;  %s16191_s2 = inlined_call_operand.vmem [shape: bf16[2,18,24,128], index: 2, kind: input, shape index: {}, may-alias: {0,1,2}]   ;;  %s16192_s3 = inlined_call_operand.vmem [shape: bf16[9,128,128], index: 3, kind: input, shape index: {}]   ;;  %s16193_s4 = inlined_call_operand.vmem [shape: bf16[9,128,128], index: 4, kind: input, shape index: {}]   ;;  %s16194_s5 = inlined_call_operand.vmem [shape: f32[1,128], index: 5, kind: input, shape index: {}]   ;;  %s16195_s6 = inlined_call_operand.vmem [shape: f32[1,128], index: 6, kind: input, shape index: {}]   ;;  %s16196_s7 = inlined_call_operand.vmem [shape: f32[2,16,16,128], index: 7, kind: output, shape index: {}]  }
   0x1   :  { %s13052_s25 = smov 0  }
   0x2 LB: > { %s29_s26 = sadd.s32 1, %s13001_s24  ;;  %p9982_p0 = scmp.ge.s32.totalorder %s13005_s25, 1  ;;  %s13005_s25 = sphi %s13052_s25, %s17_s25   ;;  %s13001_s24 = sphi %s13050_s24, %s16540_s24   ;;  %s12997_s23 = sphi %s13048_s23, %s16539_s23  }
   0x3   : > { %p31_p1 = scmp.ge.s32.totalorder %s29_s26, 2  ;;  %p329_p2 = scmp.lt.s32.totalorder %s13005_s25, 3 }
   0x5   : > { %s16542_s26 = smov (%p31_p1, %s29_s26), 0  ;;  %p330_p3 = pnand %p9982_p0, %p329_p2 }
   0x7   : > { %333 = sbr.rel (%p330_p3) target bundleno = 1716 (0x6b4), region = 48 }
   0xe   : > { %v12677_v0 = vld [vmem:[%s16192_s3 + $0x40] sm:$0xff]   ;;  %v12678_v1 = vld [vmem:[%s16192_s3 + $0x48] sm:$0xff]   ;;  %v16197_v2 = vmov 0   ;;  %p427_p4 = scmp.lt.s32.totalorder %s12997_s23, 1  ;;  %v12679_v5 = vld [vmem:[%s16192_s3 + $0x50] sm:$0xff]   ;;  %vm1655_vm3 = vcmask 1042432  }
   0xf   : > { %v561_v3 = vrot.slane %v16197_v2, 4  ;;  %11189 = vmatprep.subr.bf16.mxu0 %v12677_v0  ;;  %v13074_v4 = vrot.slane %v16197_v2, 5  ;;  %12089 = vmatprep.subr.bf16.mxu1 %v12677_v0  ;;  %v12680_v8 = vld [vmem:[%s16192_s3 + $0x58] sm:$0xff]   ;;  %vm555_vm0 = vsmask.f32 3328  ;;  %v12681_v11 = vld [vmem:[%s16192_s3 + $0x60] sm:$0xff]  }
  0x10   : > { %11190 = vmatpush3.bf16.msra.mxu0 %v12677_v0  ;;  %12097 = vmatpush3.bf16.msra.mxu1 %v12677_v0  ;;  %s16544_s23 = smov (!%p427_p4, %s12997_s23), 1  ;;  %vm556_vm1 = vsmask.f32 7440  ;;  %v12682_v29 = vld [vmem:[%s16192_s3 + $0x68] sm:$0xff]   ;;  %v12683_v44 = vld [vmem:[%s16192_s3 + $0x70] sm:$0xff]   ;;  %v12684_v60 = vld [vmem:[%s16192_s3 + $0x78] sm:$0xff]  }
  0x11   : > { %11191 = vmatprep.subr.bf16.mxu0 %v12678_v1  ;;  %v565_v6 = vor.u32 %v13074_v4, %v561_v3  ;;  %12090 = vmatprep.subr.bf16.mxu1 %v12678_v1  ;;  %s12649_s12 = smul.u32 216, %s16544_s23  ;;  %vm13086_vm2 = vmor %vm555_vm0, %vm556_vm1  ;;  %vm1656_vm4 = vcmask 1046532   ;;  %vm4081_vm6 = vsmask.f32 256  ;;  %vm4444_vm7 = vcmask 1043456  }
  0x12   : > { %vm13451_vm5 = vmor %vm1655_vm3, %vm1656_vm4  ;;  %vm4445_vm8 = vsmask.f32 7938  ;;  %vm4451_vm9 = vcmask 1040384   ;;  %vm4082_vm10 = vsmask.f32 4368  ;;  %vm9592_vm14 = vcmask 1046528  }
  0x13   : > { %v566_v7 = vrot.slane %v565_v6, 4  ;;  %s13095_s15 = scalar_lea.vmem %s16190_s1, %s12649_s12  ;;  %s10701_s18 = sadd.s32 192, %s12649_s12  ;;  %vm14188_vm11 = vmand %vm4444_vm7, %vm4445_vm8 }
  0x14   : > { %11192 = vmatpush3.bf16.msra.mxu0 %v12678_v1  ;;  %12098 = vmatpush3.bf16.msra.mxu1 %v12678_v1  ;;  %v13106_v13 = vld [vmem:[%s13095_s15] sm:$0xf]  ;;  %v13109_v14 = vld [vmem:[%s13095_s15 + $0x4] sm:$0xf]  ;;  %v13116_v19 = vld [vmem:[%s13095_s15 + $0xc] sm:$0xf]  ;;  %s13874_s21 = scalar_lea.vmem %s16191_s2, %s10701_s18 }
  0x15   : > { %11193 = vmatprep.subr.bf16.mxu0 %v12679_v5  ;;  %12091 = vmatprep.subr.bf16.mxu1 %v12679_v5  ;;  %v571_v10 = vsel %vm13086_vm2, %v566_v7, %v13074_v4  ;;  %v607_v15 = vshrl.u32 %v13106_v13, 16  ;;  %v610_v16 = vshll.u32 %v13106_v13, 16  ;;  %v616_v17 = vshll.u32 %v13109_v14, 16  ;;  %v13120_v20 = vld [vmem:[%s13095_s15 + $0x8] sm:$0xf]  ;;  %vm14197_vm12 = vmand %vm4451_vm9, %vm4081_vm6 }
  0x16   : > { %v13103_v12 = vcombine.low %v571_v10, %v571_v10  ;;  %v620_v18 = vshrl.u32 %v13109_v14, 16  ;;  %v13123_v21 = vld [vmem:[%s13095_s15 + $0x10] sm:$0xf]  ;;  %v631_v22 = vshrl.u32 %v13116_v19, 16  ;;  %v634_v27 = vshll.u32 %v13116_v19, 16  ;;  %v12685_v10 = vld [vmem:[%s16192_s3] sm:$0xff]   ;;  %vm14203_vm13 = vmor %vm4081_vm6, %vm4082_vm10 }
  0x17   : > { %v609_v23 = vrot.slane %v607_v15, 4  ;;  %v612_v24 = vrot.slane %v610_v16, 5  ;;  %v13126_v25 = vrot.slane %v616_v17, 5  ;;  %v640_v28 = vshll.u32 %v13123_v21, 16  ;;  %v13136_v33 = vld [vmem:[%s13095_s15 + $0x14] sm:$0xf] }
  0x18   : > { %11194 = vmatpush3.bf16.msra.mxu0 %v12679_v5  ;;  %16316 = vst [vmem:[#allocation3_spill] sm:$0xff] %v13103_v12  ;;  %12099 = vmatpush3.bf16.msra.mxu1 %v12679_v5  ;;  %v622_v26 = vrot.slane %v620_v18, 4  ;;  %v626_v30 = vshll.u32 %v13120_v20, 16  ;;  %v644_v31 = vshrl.u32 %v13123_v21, 16  ;;  %v13139_v34 = vld [vmem:[%s13095_s15 + $0x18] sm:$0xf] }
  0x19   : > { %11195 = vmatprep.subr.bf16.mxu0 %v12680_v8  ;;  %12092 = vmatprep.subr.bf16.mxu1 %v12680_v8  ;;  %v613_v32 = vor.u32 %v612_v24, %v609_v23  ;;  %v633_v36 = vrot.slane %v631_v22, 4  ;;  %v636_v37 = vrot.slane %v634_v27, 5  ;;  %v13142_v38 = vrot.slane %v640_v28, 5  ;;  %v13145_v39 = vld [vmem:[%s13095_s15 + $0x1c] sm:$0xf] }
  0x1a   : > { %11205 = vmatprep.mubr.bf16.mxu0 %v13103_v12  ;;  %v623_v35 = vor.u32 %v622_v26, %v13126_v25  ;;  %v646_v40 = vrot.slane %v644_v31, 4  ;;  %v655_v41 = vshrl.u32 %v13139_v34, 16  ;;  %v658_v42 = vshll.u32 %v13139_v34, 16  ;;  %v13154_v46 = vld [vmem:[%s13095_s15 + $0x20] sm:$0xf] }
  0x1b   : > { %v664_v43 = vshll.u32 %v13145_v39, 16  ;;  %v628_v45 = vrot.slane %v626_v30, 5  ;;  %v668_v47 = vshrl.u32 %v13145_v39, 16  ;;  %v614_v48 = vrot.slane %v613_v32, 4  ;;  %v13159_v52 = vld [vmem:[%s13095_s15 + $0x24] sm:$0xf] }
  0x1c   : > { %11196 = vmatpush3.bf16.msra.mxu0 %v12680_v8  ;;  %12100 = vmatpush3.bf16.msra.mxu1 %v12680_v8  ;;  %v650_v49 = vshll.u32 %v13136_v33, 16  ;;  %v657_v50 = vrot.slane %v655_v41, 4  ;;  %v660_v51 = vrot.slane %v658_v42, 5  ;;  %v13164_v55 = vld [vmem:[%s13095_s15 + $0x28] sm:$0xf]  ;;  %v624_v56 = vrot.slane %v623_v35, 4 }
  0x1d   : > { %11197 = vmatprep.subr.bf16.mxu0 %v12681_v11  ;;  %12093 = vmatprep.subr.bf16.mxu1 %v12681_v11  ;;  %v13161_v53 = vrot.slane %v664_v43, 5  ;;  %v670_v54 = vrot.slane %v668_v47, 4  ;;  %v637_v57 = vor.u32 %v636_v37, %v633_v36  ;;  %v647_v58 = vor.u32 %v646_v40, %v13142_v38  ;;  %v13176_v3 = vld [vmem:[%s13095_s15 + $0x30] sm:$0xf]  ;;  %v13179_v5 = vld [vmem:[%s13095_s15 + $0x34] sm:$0xf] }
  0x1e   : > { %v674_v59 = vshll.u32 %v13154_v46, 16  ;;  %v661_v61 = vor.u32 %v660_v51, %v657_v50  ;;  %v679_v62 = vshrl.u32 %v13159_v52, 16  ;;  %v682_v0 = vshll.u32 %v13159_v52, 16  ;;  %v13191_v22 = vld [vmem:[%s13095_s15 + $0x2c] sm:$0xf] }
  0x1f   : > { %v671_v63 = vor.u32 %v670_v54, %v13161_v53  ;;  %v688_v1 = vshll.u32 %v13164_v55, 16  ;;  %v619_v6 = vsel %vm13086_vm2, %v614_v48, %v13126_v25  ;;  %v652_v7 = vrot.slane %v650_v49, 5  ;;  %v12686_v30 = vld [vmem:[%s16192_s3 + $0x8] sm:$0xff]   ;;  %v13203_v35 = vld [vmem:[%s13095_s15 + $0x3c] sm:$0xf] }
  0x20   : > { %11198 = vmatpush3.bf16.msra.mxu0 %v12681_v11  ;;  %12101 = vmatpush3.bf16.msra.mxu1 %v12681_v11  ;;  %v692_v8 = vshrl.u32 %v13164_v55, 16  ;;  %v629_v11 = vsel %vm13086_vm2, %v624_v56, %v628_v45  ;;  %v638_v15 = vrot.slane %v637_v57, 4  ;;  %v648_v16 = vrot.slane %v647_v58, 4  ;;  %v13208_v37 = vld [vmem:[%s13095_s15 + $0x40] sm:$0xf] }
  0x21   : > { %11199 = vmatprep.subr.bf16.mxu0 %v12682_v29  ;;  %12094 = vmatprep.subr.bf16.mxu1 %v12682_v29  ;;  %v676_v17 = vrot.slane %v674_v59, 5  ;;  %v662_v18 = vrot.slane %v661_v61, 4  ;;  %v703_v23 = vshrl.u32 %v13176_v3, 16  ;;  %v706_v24 = vshll.u32 %v13176_v3, 16  ;;  %v13217_v48 = vld [vmem:[%s13095_s15 + $0x38] sm:$0xf] }
  0x22   : > { %v712_v25 = vshll.u32 %v13179_v5, 16  ;;  %v672_v26 = vrot.slane %v671_v63, 4  ;;  %v681_v27 = vrot.slane %v679_v62, 4  ;;  %v684_v28 = vrot.slane %v682_v0, 5  ;;  %v12687_v59 = vld [vmem:[%s16192_s3 + $0x10] sm:$0xff]  }
  0x23   : > { %v694_v31 = vrot.slane %v692_v8, 4  ;;  %v716_v32 = vshrl.u32 %v13179_v5, 16  ;;  %v13205_v36 = vcombine.low %v619_v6, %v629_v11  ;;  %v705_v40 = vrot.slane %v703_v23, 4  ;;  %v13243_v23 = vld [vmem:[%s13095_s15 + $0x44] sm:$0xf] }
  0x24   : > { %11200 = vmatpush3.bf16.msra.mxu0 %v12682_v29  ;;  %12102 = vmatpush3.bf16.msra.mxu1 %v12682_v29  ;;  %v13196_v29 = vrot.slane %v688_v1, 5  ;;  %v708_v41 = vrot.slane %v706_v24, 5  ;;  %v714_v42 = vrot.slane %v712_v25, 5  ;;  %v653_v45 = vsel %vm13086_vm2, %v648_v16, %v652_v7 }
  0x25   : > { %11201 = vmatprep.subr.bf16.mxu0 %v12683_v44  ;;  %12095 = vmatprep.subr.bf16.mxu1 %v12683_v44  ;;  %16317 = vst [vmem:[#allocation4_spill] sm:$0xff] %v13205_v36  ;;  %v718_v43 = vrot.slane %v716_v32, 4  ;;  %v698_v47 = vshll.u32 %v13191_v22, 16  ;;  %v685_v49 = vor.u32 %v684_v28, %v681_v27  ;;  %v727_v51 = vshrl.u32 %v13203_v35, 16 }
  0x26   : > { %v695_v50 = vor.u32 %v694_v31, %v13196_v29  ;;  %v730_v54 = vshll.u32 %v13203_v35, 16  ;;  %v677_v56 = vsel %vm13086_vm2, %v672_v26, %v676_v17  ;;  %v736_v57 = vshll.u32 %v13208_v37, 16 }
  0x27   : > { %v740_v58 = vshrl.u32 %v13208_v37, 16  ;;  %v719_v61 = vor.u32 %v718_v43, %v714_v42  ;;  %v722_v62 = vshll.u32 %v13217_v48, 16  ;;  %v686_v0 = vrot.slane %v685_v49, 4  ;;  %v12691_v49 = vld [vmem:[%s16192_s3 + $0x30] sm:$0xff]  }
  0x28   : > { %11202 = vmatpush3.bf16.msra.mxu0 %v12683_v44  ;;  %12103 = vmatpush3.bf16.msra.mxu1 %v12683_v44  ;;  %v643_v44 = vsel %vm13086_vm2, %v638_v15, %v13142_v38  ;;  %v667_v38 = vsel %vm13086_vm2, %v662_v18, %v13161_v53  ;;  %v696_v1 = vrot.slane %v695_v50, 4  ;;  %v700_v6 = vrot.slane %v698_v47, 5  ;;  %v12688_v15 = vld [vmem:[%s16192_s3 + $0x18] sm:$0xff]  }
  0x29   : > { %11203 = vmatprep.subr.bf16.mxu0 %v12684_v60  ;;  %12096 = vmatprep.subr.bf16.mxu1 %v12684_v60  ;;  %v13235_v63 = vcombine.low %v643_v44, %v653_v45  ;;  %v13237_v53 = vcombine.low %v667_v38, %v677_v56  ;;  %v729_v7 = vrot.slane %v727_v51, 4  ;;  %v732_v8 = vrot.slane %v730_v54, 5  ;;  %v12690_v45 = vld [vmem:[%s16192_s3 + $0x28] sm:$0xff]   ;;  %v12692_v54 = vld [vmem:[%s16192_s3 + $0x38] sm:$0xff]   ;;  %v12693_v38 = vld [vmem:[%s16192_s3 + $0x80] sm:$0xff]  }
  0x2a   : > { %v742_v11 = vrot.slane %v740_v58, 4  ;;  %v720_v17 = vrot.slane %v719_v61, 4  ;;  %v724_v18 = vrot.slane %v722_v62, 5  ;;  %v691_v24 = vsel %vm13086_vm2, %v686_v0, %v13196_v29  ;;  %v12699_v58 = vld [vmem:[%s16192_s3 + $0x90] sm:$0xff]   ;;  %v12702_v61 = vld [vmem:[%s16192_s3 + $0x98] sm:$0xff]  }
  0x2b   : > { %16318 = vst [vmem:[#allocation5_spill] sm:$0xff] %v13235_v63  ;;  %16319 = vst [vmem:[#allocation6_spill] sm:$0xff] %v13237_v53  ;;  %v701_v25 = vsel %vm13086_vm2, %v696_v1, %v700_v6  ;;  %v733_v26 = vor.u32 %v732_v8, %v729_v7  ;;  %v746_v28 = vshll.u32 %v13243_v23, 16  ;;  %v13280_v51 = vcombine.low %v16197_v2, %v16197_v2  ;;  %v12705_v1 = vld [vmem:[%s16192_s3 + $0xa0] sm:$0xff]   ;;  %v12708_v8 = vld [vmem:[%s16192_s3 + $0xa8] sm:$0xff]  }
  0x2c   : > { %11204 = vmatpush3.bf16.msra.mxu0 %v12684_v60  ;;  %12104 = vmatpush3.bf16.msra.mxu1 %v12684_v60  ;;  %v709_v60 = vor.u32 %v708_v41, %v705_v40  ;;  %v725_v29 = vsel %vm13086_vm2, %v720_v17, %v724_v18  ;;  %v13260_v32 = vcombine.low %v691_v24, %v701_v25  ;;  %v13314_v62 = vrot.slane %v16197_v2, 9  ;;  %v12715_v25 = vld [vmem:[%s16192_s3 + $0xb8] sm:$0xff]   ;;  %v13440_v17 = vld [vmem:[%s13095_s15 + $0xa0] sm:$0xf] }
  0x2d   : > { %11241 = vmatprep.subr.bf16.mxu0 %v12685_v10  ;;  %v734_v41 = vrot.slane %v733_v26, 4  ;;  %v748_v44 = vrot.slane %v746_v28, 5  ;;  %v13292_v56 = vcombine.low %v13106_v13, %v13109_v14  ;;  %v16199_v6 = vrot.slane %v13109_v14, 5  ;;  %v13365_v28 = vld [vmem:[%s13095_s15 + $0x58] sm:$0xf] }
  0x2e   : > { %v710_v16 = vrot.slane %v709_v60, 4  ;;  %16320 = vst [vmem:[#allocation7_spill] sm:$0xff] %v13260_v32  ;;  %v13308_v60 = vcombine.low %v13139_v34, %v13145_v39  ;;  %v13325_v7 = vcombine.low %v13159_v52, %v13164_v55  ;;  %v13352_v24 = vcombine.low %v13203_v35, %v13208_v37 }
  0x2f   : > { %11206 = vmatmul.mubr.bf16.vlgmr.msra.gmra.mrb[0].mxu0 %v13103_v12  ;;  %v13347_v18 = vrot.slane %v16199_v6, 4  ;;  %v1691_v0 = vrot.slane %v13154_v46, 5  ;;  %v1695_v46 = vrot.slane %v13164_v55, 5  ;;  %v16339_v12 = vrot.slane %v13074_v4, 4 }
  0x30   : > { %11242 = vmatpush3.bf16.msra.mxu0 %v12685_v10  ;;  %11209 = vmatprep.mubr.bf16.mxu0 %v13205_v36  ;;  %v738_v10 = vrot.slane %v736_v57, 5  ;;  %v715_v31 = vsel %vm13086_vm2, %v710_v16, %v714_v42  ;;  %v12696_v57 = vld [vmem:[%s16192_s3 + $0x88] sm:$0xff]   ;;  %16324 = vst [vmem:[#allocation11_spill] sm:$0xff] %v13308_v60  ;;  %16325 = vst [vmem:[#allocation12_spill] sm:$0xff] %v13325_v7  ;;  %v12711_v16 = vld [vmem:[%s16192_s3 + $0xb0] sm:$0xff]  }
  0x31   : > { %11243 = vmatprep.subr.bf16.mxu0 %v12686_v30  ;;  %v13262_v40 = vcombine.low %v715_v31, %v725_v29  ;;  %16327 = vst [vmem:[#allocation14_spill] sm:$0xff] %v13352_v24  ;;  %v13372_v31 = vld [vmem:[%s13095_s15 + $0x64] sm:$0xf] }
  0x32   : > { %v743_v27 = vor.u32 %v742_v11, %v738_v10  ;;  %v739_v42 = vsel %vm13086_vm2, %v734_v41, %v738_v10  ;;  %v13332_v10 = vcombine.low %v13176_v3, %v13179_v5  ;;  %v13336_v11 = vld [vmem:[%s13095_s15 + $0x48] sm:$0xf]  ;;  %v12717_v29 = vld [vmem:[%s16192_s3 + $0xc0] sm:$0xff]   ;;  %v1677_v41 = vrot.slane %v13120_v20, 5  ;;  %v13389_v20 = vld [vmem:[%s13095_s15 + $0x6c] sm:$0xf] }
  0x33   : > { %16321 = vst [vmem:[#allocation8_spill] sm:$0xff] %v13262_v40 }
  0x34   : > { %11244 = vmatpush3.bf16.msra.mxu0 %v12686_v30  ;;  %v12689_v30 = vld [vmem:[%s16192_s3 + $0x20] sm:$0xff]   ;;  %v744_v43 = vrot.slane %v743_v27, 4  ;;  %16326 = vst [vmem:[#allocation13_spill] sm:$0xff] %v13332_v10  ;;  %v13362_v27 = vld [vmem:[%s13095_s15 + $0x54] sm:$0xf] }
  0x35   : > { %11245 = vmatprep.subr.bf16.mxu0 %v12687_v59 }
  0x36   : > { %v749_v47 = vsel %vm13086_vm2, %v744_v43, %v748_v44  ;;  %v13382_v44 = vcombine.low %v13362_v27, %v13365_v28  ;;  %v13437_v43 = vld [vmem:[%s13095_s15 + $0x9c] sm:$0xf] }
  0x37   : > { %11210 = vmatmul.mubr.bf16.gmra.mrb[4].mxu0 %v13235_v63  ;;  %v13276_v50 = vcombine.low %v739_v42, %v749_v47  ;;  %v13392_v42 = vld [vmem:[%s13095_s15 + $0x70] sm:$0xf]  ;;  %v13396_v47 = vld [vmem:[%s13095_s15 + $0x78] sm:$0xf] }
  0x38   : > { %11246 = vmatpush3.bf16.msra.mxu0 %v12687_v59  ;;  %11213 = vmatprep.mubr.bf16.mxu0 %v13237_v53  ;;  %v13304_v59 = vcombine.low %v13116_v19, %v13123_v21  ;;  %16329 = vst [vmem:[#allocation16_spill] sm:$0xff] %v13382_v44  ;;  %v13467_v53 = vld [vmem:[%s13095_s15 + $0xb4] sm:$0xf]  ;;  %v13470_v63 = vld [vmem:[%s13095_s15 + $0xb8] sm:$0xf] }
  0x39   : > { %11247 = vmatprep.subr.bf16.mxu0 %v12688_v15  ;;  %16322 = vst [vmem:[#allocation9_spill] sm:$0xff] %v13276_v50 }
  0x3a   : > { %16323 = vst [vmem:[#allocation10_spill] sm:$0xff] %v13304_v59 }
  0x3c   : > { %11248 = vmatpush3.bf16.msra.mxu0 %v12688_v15  ;;  %v13339_v15 = vld [vmem:[%s13095_s15 + $0x4c] sm:$0xf] }
  0x3d   : > { %11249 = vmatprep.subr.bf16.mxu0 %v12689_v30  ;;  %v13359_v26 = vcombine.low %v13336_v11, %v13339_v15 }
  0x3f   : > { %11214 = vmatmul.mubr.bf16.gmra.mrb[8].mxu0 %v13260_v32  ;;  %16328 = vst [vmem:[#allocation15_spill] sm:$0xff] %v13359_v26 }
  0x40   : > { %11250 = vmatpush3.bf16.msra.mxu0 %v12689_v30  ;;  %11217 = vmatprep.mubr.bf16.mxu0 %v13262_v40  ;;  %v13369_v30 = vld [vmem:[%s13095_s15 + $0x60] sm:$0xf]  ;;  %v13460_v40 = vcombine.low %v13437_v43, %v13440_v17 }
  0x41   : > { %11251 = vmatprep.subr.bf16.mxu0 %v12690_v45 }
  0x42   : > { %16337 = vst [vmem:[#allocation22_spill] sm:$0xff] %v13460_v40 }
  0x44   : > { %11252 = vmatpush3.bf16.msra.mxu0 %v12690_v45  ;;  %v13386_v45 = vcombine.low %v13369_v30, %v13372_v31 }
  0x45   : > { %11253 = vmatprep.subr.bf16.mxu0 %v12691_v49 }
  0x46   : > { %16330 = vst [vmem:[#allocation17_spill] sm:$0xff] %v13386_v45 }
  0x47   : > { %11218 = vmatmul.mubr.bf16.gmra.mrb[12].mxu0 %v13276_v50  ;;  %v10061_v50 = vrot.slane %v13159_v52, 9  ;;  %v1661_v52 = vsel %vm13451_vm5, %v13314_v62, %v13074_v4  ;;  %v16342_v62 = vrot.slane %v13109_v14, 5 }
  0x48   : > { %11254 = vmatpush3.bf16.msra.mxu0 %v12691_v49  ;;  %11257 = vmatprep.mubr.bf16.mxu0 %v13280_v51  ;;  %v13399_v49 = vld [vmem:[%s13095_s15 + $0x7c] sm:$0xf] }
  0x49   : > { %11255 = vmatprep.subr.bf16.mxu0 %v12692_v54 }
  0x4c   : > { %11256 = vmatpush3.bf16.msra.mxu0 %v12692_v54  ;;  %v1681_v54 = vrot.slane %v13123_v21, 5  ;;  %v13416_v21 = vld [vmem:[%s13095_s15 + $0x88] sm:$0xf] }
  0x4d   : > { %11293 = vmatprep.subr.bf16.mxu0 %v12693_v38 }
  0x4e   : > { %v1683_v36 = vrot.slane %v1681_v54, 4 }
  0x4f   : > { %11258 = vmatmul.mubr.bf16.vlgmr.msra.gmra.mrb[0].mxu0 %v13280_v51 }
  0x50   : > { %11294 = vmatpush3.bf16.msra.mxu0 %v12693_v38  ;;  %11261 = vmatprep.mubr.bf16.mxu0 %v13292_v56  ;;  %v1684_v38 = vrot.slane %v13136_v33, 5  ;;  %v13420_v33 = vld [vmem:[%s13095_s15 + $0x90] sm:$0xf] }
  0x51   : > { %11295 = vmatprep.subr.bf16.mxu0 %v12696_v57 }
  0x54   : > { %11296 = vmatpush3.bf16.msra.mxu0 %v12696_v57  ;;  %v13406_v57 = vcombine.low %v13389_v20, %v13392_v42 }
  0x55   : > { %11297 = vmatprep.subr.bf16.mxu0 %v12699_v58 }
  0x56   : > { %16331 = vst [vmem:[#allocation18_spill] sm:$0xff] %v13406_v57 }
  0x57   : > { %11262 = vmatmul.mubr.bf16.gmra.mrb[4].mxu0 %v13304_v59 }
  0x58   : > { %11265 = vmatprep.mubr.bf16.mxu0 %v13308_v60  ;;  %11298 = vmatpush3.bf16.msra.mxu0 %v12699_v58  ;;  %v13410_v58 = vcombine.low %v13396_v47, %v13399_v49 }
  0x59   : > { %11299 = vmatprep.subr.bf16.mxu0 %v12702_v61 }
  0x5a   : > { %16332 = vst [vmem:[#allocation19_spill] sm:$0xff] %v13410_v58 }
  0x5c   : > { %11300 = vmatpush3.bf16.msra.mxu0 %v12702_v61  ;;  %v13413_v61 = vld [vmem:[%s13095_s15 + $0x84] sm:$0xf] }
  0x5d   : > { %11301 = vmatprep.subr.bf16.mxu0 %v12705_v1 }
  0x5f   : > { %11266 = vmatmul.mubr.bf16.gmra.mrb[8].mxu0 %v13325_v7 }
  0x60   : > { %11269 = vmatprep.mubr.bf16.mxu0 %v13332_v10  ;;  %11302 = vmatpush3.bf16.msra.mxu0 %v12705_v1  ;;  %v13423_v1 = vld [vmem:[%s13095_s15 + $0x94] sm:$0xf] }
  0x61   : > { %11303 = vmatprep.subr.bf16.mxu0 %v12708_v8  ;;  %v13434_v2 = vcombine.low %v13420_v33, %v13423_v1 }
  0x63   : > { %16334 = vst [vmem:[#allocation21_spill] sm:$0xff] %v13434_v2 }
  0x64   : > { %11304 = vmatpush3.bf16.msra.mxu0 %v12708_v8  ;;  %v10060_v8 = vrot.slane %v13139_v34, 9  ;;  %v13444_v34 = vld [vmem:[%s13095_s15 + $0xa8] sm:$0xf] }
  0x65   : > { %11305 = vmatprep.subr.bf16.mxu0 %v12711_v16 }
  0x67   : > { %11270 = vmatmul.mubr.bf16.gmra.mrb[12].mxu0 %v13352_v24  ;;  %v1765_v24 = vrot.slane %v13440_v17, 5 }
  0x68   : > { %11273 = vmatprep.mubr.bf16.mxu0 %v13359_v26  ;;  %11306 = vmatpush3.bf16.msra.mxu0 %v12711_v16  ;;  %v1688_v16 = vrot.slane %v13145_v39, 5  ;;  %v13447_v39 = vld [vmem:[%s13095_s15 + $0xac] sm:$0xf] }
  0x69   : > { %11307 = vmatprep.subr.bf16.mxu0 %v12715_v25  ;;  %v13464_v32 = vcombine.low %v13444_v34, %v13447_v39 }
  0x6a   : > { %v1690_v55 = vrot.slane %v1688_v16, 4 }
  0x6b   : > { %16338 = vst [vmem:[#allocation23_spill] sm:$0xff] %v13464_v32 }
  0x6c   : > { %11308 = vmatpush3.bf16.msra.mxu0 %v12715_v25  ;;  %v13430_v25 = vcombine.low %v13413_v61, %v13416_v21 }
  0x6d   : > { %11345 = vmatprep.subr.bf16.mxu0 %v12717_v29 }
  0x6e   : > { %16333 = vst [vmem:[#allocation20_spill] sm:$0xff] %v13430_v25 }
  0x6f   : > { %11274 = vmatmul.mubr.bf16.gmra.mrb[16].mxu0 %v13382_v44 }
  0x70   : > { %11277 = vmatprep.mubr.bf16.mxu0 %v13386_v45 }
  0x77   : > { %11278 = vmatmul.mubr.bf16.gmra.mrb[20].mxu0 %v13406_v57 }
  0x78   : > { %11281 = vmatprep.mubr.bf16.mxu0 %v13410_v58  ;;  %v16343_v58 = vrot.slane %v13106_v13, 9  ;;  %v16345_v13 = vrot.slane %v13116_v19, 9  ;;  %v1692_v19 = vsel %vm13451_vm5, %v1690_v55, %v1691_v0  ;;  %v1696_v0 = vsel %vm13451_vm5, %v10061_v50, %v1695_v46 }
  0x7a   : > { %v1682_v14 = vsel %vm13451_vm5, %v16345_v13, %v1681_v54  ;;  %v10062_v54 = vrot.slane %v13176_v3, 9  ;;  %v1712_v13 = vrot.slane %v13243_v23, 5  ;;  %v12722_v23 = vld [vmem:[%s16192_s3 + $0xe8] sm:$0xff]  }
  0x7f   : > { %11282 = vmatmul.mubr.bf16.gmra.mrb[24].mxu0 %v13430_v25  ;;  %v13486_v25 = vcombine.low %v13467_v53, %v13470_v63 }
  0x80   : > { %11285 = vmatprep.mubr.bf16.mxu0 %v13434_v2  ;;  %v1664_v2 = vsel %vm13451_vm5, %v16339_v12, %v13074_v4  ;;  %v1675_v4 = vsel %vm13451_vm5, %v16343_v58, %v16342_v62  ;;  %v1678_v12 = vsel %vm13451_vm5, %v13347_v18, %v1677_v41  ;;  %v1698_v18 = vrot.slane %v13191_v22, 5  ;;  %v12719_v41 = vld [vmem:[%s16192_s3 + $0xd0] sm:$0xff]   ;;  %v12720_v22 = vld [vmem:[%s16192_s3 + $0xd8] sm:$0xff]  }
  0x81   : > { %16340 = vst [vmem:[#allocation24_spill] sm:$0xff] %v13486_v25  ;;  %v1697_v58 = vrot.slane %v1695_v46, 4  ;;  %v10063_v46 = vrot.slane %v13203_v35, 9  ;;  %v13564_v35 = vld [vmem:[%s13095_s15 + $0x68] sm:$0xf] }
  0x83   : > { %v1699_v3 = vsel %vm13451_vm5, %v1697_v58, %v1698_v18 }
  0x84   : > { %v13550_v50 = vcombine.low %v1696_v0, %v1699_v3  ;;  %v10066_v3 = vrot.slane %v13369_v30, 9 }
  0x86   : > { %16348 = vst [vmem:[#allocation29_spill] sm:$0xff] %v13550_v50 }
  0x87   : > { %11286 = vmatmul.mubr.bf16.gmra.mrb[28].mxu0 %v13460_v40  ;;  %v13488_v40 = vcombine.low %v1661_v52, %v1664_v2  ;;  %v12718_v2 = vld [vmem:[%s16192_s3 + $0xc8] sm:$0xff]   ;;  %v13505_v52 = vcombine.low %v1675_v4, %v1678_v12 }
  0x88   : > { %11289 = vmatprep.mubr.bf16.mxu0 %v13464_v32  ;;  %v1702_v32 = vrot.slane %v13179_v5, 5  ;;  %v1685_v5 = vsel %vm13451_vm5, %v1683_v36, %v1684_v38  ;;  %v1705_v36 = vrot.slane %v13217_v48, 5  ;;  %v1709_v48 = vrot.slane %v13208_v37, 5  ;;  %v12721_v37 = vld [vmem:[%s16192_s3 + $0xe0] sm:$0xff]  }
  0x89   : > { %16341 = vst [vmem:[#allocation25_spill] sm:$0xff] %v13488_v40  ;;  %16344 = vst [vmem:[#allocation26_spill] sm:$0xff] %v13505_v52  ;;  %v13525_v38 = vcombine.low %v1682_v14, %v1685_v5  ;;  %v10064_v14 = vrot.slane %v13336_v11, 9 }
  0x8a   : > { %v1704_v62 = vrot.slane %v1702_v32, 4  ;;  %v1703_v55 = vsel %vm13451_vm5, %v10062_v54, %v1702_v32  ;;  %v1710_v58 = vsel %vm13451_vm5, %v10063_v46, %v1709_v48  ;;  %v10065_v54 = vrot.slane %v13362_v27, 9 }
  0x8b   : > { %16346 = vst [vmem:[#allocation27_spill] sm:$0xff] %v13525_v38 }
  0x8c   : > { %v1706_v12 = vsel %vm13451_vm5, %v1704_v62, %v1705_v36  ;;  %v1737_v62 = vrot.slane %v13392_v42, 5 }
  0x8d   : > { %v13556_v5 = vcombine.low %v1703_v55, %v1706_v12  ;;  %v13581_v55 = vld [vmem:[%s13095_s15 + $0x74] sm:$0xf] }
  0x8f   : > { %11290 = vmatmul.mubr.bf16.gmra.mrb[32].mxu0 %v13486_v25  ;;  %16349 = vst [vmem:[#allocation30_spill] sm:$0xff] %v13556_v5 }
  0x90   : > { %11309 = vmatprep.mubr.bf16.mxu0 %v13488_v40 }
  0x97   : > { %11310 = vmatmul.mubr.bf16.vlgmr.msra.gmra.mrb[0].mxu0 %v13488_v40  ;;  %v1758_v40 = vrot.slane %v13423_v1, 5 }
  0x98   : > { %11346 = vmatpush3.bf16.msra.mxu0 %v12717_v29  ;;  %11313 = vmatprep.mubr.bf16.mxu0 %v13505_v52  ;;  %v1689_v29 = vsel %vm13451_vm5, %v10060_v8, %v1688_v16  ;;  %v13539_v8 = vld [vmem:[%s13095_s15 + $0x50] sm:$0xf]  ;;  %v1716_v16 = vrot.slane %v13339_v15, 5  ;;  %v13604_v52 = vld [vmem:[%s13095_s15 + $0x8c] sm:$0xf] }
  0x99   : > { %11347 = vmatprep.subr.bf16.mxu0 %v12718_v2  ;;  %v13530_v4 = vcombine.low %v1689_v29, %v1692_v19  ;;  %v1719_v32 = vrot.slane %v13539_v8, 5  ;;  %v1723_v29 = vrot.slane %v13365_v28, 5  ;;  %v1730_v19 = vrot.slane %v13372_v31, 5 }
  0x9a   : > { %v1718_v18 = vrot.slane %v1716_v16, 4 }
  0x9b   : > { %16347 = vst [vmem:[#allocation28_spill] sm:$0xff] %v13530_v4  ;;  %v1725_v12 = vrot.slane %v1723_v29, 4  ;;  %v1732_v46 = vrot.slane %v1730_v19, 4  ;;  %v1731_v57 = vsel %vm13451_vm5, %v10066_v3, %v1730_v19  ;;  %v12724_v19 = vld [vmem:[%s16192_s3 + $0xf8] sm:$0xff]  }
  0x9c   : > { %11348 = vmatpush3.bf16.msra.mxu0 %v12718_v2  ;;  %v1711_v2 = vrot.slane %v1709_v48, 4  ;;  %v1720_v48 = vsel %vm13451_vm5, %v1718_v18, %v1719_v32  ;;  %v13594_v32 = vld [vmem:[%s13095_s15 + $0x80] sm:$0xf] }
  0x9d   : > { %11349 = vmatprep.subr.bf16.mxu0 %v12719_v41 }
  0x9e   : > { %v1713_v36 = vsel %vm13451_vm5, %v1711_v2, %v1712_v13  ;;  %v1733_v2 = vrot.slane %v13564_v35, 5  ;;  %v1744_v13 = vrot.slane %v13399_v49, 5 }
  0x9f   : > { %11314 = vmatmul.mubr.bf16.gmra.mrb[4].mxu0 %v13525_v38  ;;  %v13597_v18 = vcombine.low %v1710_v58, %v1713_v36  ;;  %v1724_v38 = vsel %vm13451_vm5, %v10065_v54, %v1723_v29  ;;  %v10068_v58 = vrot.slane %v13396_v47, 9  ;;  %v13615_v36 = vld [vmem:[%s13095_s15 + $0x98] sm:$0xf] }
  0xa0   : > { %11317 = vmatprep.mubr.bf16.mxu0 %v13530_v4  ;;  %11350 = vmatpush3.bf16.msra.mxu0 %v12719_v41  ;;  %v13559_v41 = vld [vmem:[%s13095_s15 + $0x5c] sm:$0xf]  ;;  %v1734_v45 = vsel %vm13451_vm5, %v1732_v46, %v1733_v2  ;;  %v1746_v54 = vrot.slane %v1744_v13, 4  ;;  %v1761_v46 = vrot.slane %v13615_v36, 5 }
  0xa1   : > { %11351 = vmatprep.subr.bf16.mxu0 %v12720_v22  ;;  %v1726_v0 = vrot.slane %v13559_v41, 5  ;;  %16350 = vst [vmem:[#allocation31_spill] sm:$0xff] %v13597_v18  ;;  %v1745_v44 = vsel %vm13451_vm5, %v10068_v58, %v1744_v13 }
  0xa3   : > { %v1727_v25 = vsel %vm13451_vm5, %v1725_v12, %v1726_v0  ;;  %v10069_v0 = vrot.slane %v13413_v61, 9  ;;  %v1760_v12 = vrot.slane %v1758_v40, 4 }
  0xa4   : > { %11352 = vmatpush3.bf16.msra.mxu0 %v12720_v22  ;;  %v1717_v22 = vsel %vm13451_vm5, %v10064_v14, %v1716_v16  ;;  %v10067_v16 = vrot.slane %v13389_v20, 9  ;;  %v12723_v14 = vld [vmem:[%s16192_s3 + $0xf0] sm:$0xff]   ;;  %v13631_v2 = vcombine.low %v1724_v38, %v1727_v25  ;;  %v1772_v25 = vrot.slane %v13447_v39, 5 }
  0xa5   : > { %11353 = vmatprep.subr.bf16.mxu0 %v12721_v37  ;;  %v13599_v4 = vcombine.low %v1717_v22, %v1720_v48  ;;  %v1747_v22 = vrot.slane %v13594_v32, 5  ;;  %v1754_v48 = vrot.slane %v13604_v52, 5 }
  0xa6   : > { %v1738_v29 = vsel %vm13451_vm5, %v10067_v16, %v1737_v62  ;;  %v13633_v16 = vcombine.low %v1731_v57, %v1734_v45  ;;  %v13652_v45 = vld [vmem:[%s16192_s3 + $0x100] sm:$0xff]  }
  0xa7   : > { %11318 = vmatmul.mubr.bf16.gmra.mrb[8].mxu0 %v13550_v50  ;;  %v1740_v50 = vrot.slane %v13581_v55, 5  ;;  %16351 = vst [vmem:[#allocation32_spill] sm:$0xff] %v13599_v4  ;;  %16352 = vst [vmem:[#allocation33_spill] sm:$0xff] %v13652_v45  ;;  %v1748_v57 = vsel %vm13451_vm5, %v1746_v54, %v1747_v22  ;;  %v751_v54 = vshrl.u32 %v13336_v11, 16  ;;  %v754_v22 = vshll.u32 %v13336_v11, 16 }
  0xa8   : > { %11321 = vmatprep.mubr.bf16.mxu0 %v13556_v5  ;;  %11354 = vmatpush3.bf16.msra.mxu0 %v12721_v37  ;;  %v1739_v5 = vrot.slane %v1737_v62, 4  ;;  %v1751_v37 = vrot.slane %v13416_v21, 5  ;;  %v10070_v62 = vrot.slane %v13420_v33, 9  ;;  %v13677_v11 = vcombine.low %v1745_v44, %v1748_v57 }
  0xa9   : > { %11355 = vmatprep.subr.bf16.mxu0 %v12722_v23 }
  0xaa   : > { %v1753_v3 = vrot.slane %v1751_v37, 4  ;;  %v1759_v13 = vsel %vm13451_vm5, %v10070_v62, %v1758_v40  ;;  %v764_v40 = vshrl.u32 %v13339_v15, 16  ;;  %v10073_v62 = vrot.slane %v13467_v53, 9 }
  0xac   : > { %11356 = vmatpush3.bf16.msra.mxu0 %v12722_v23  ;;  %v1741_v23 = vsel %vm13451_vm5, %v1739_v5, %v1740_v50  ;;  %v13638_v50 = vld [vmem:[%s13095_s15 + $0xa4] sm:$0xf]  ;;  %v13641_v5 = vld [vmem:[%s13095_s15 + $0xb0] sm:$0xf]  ;;  %v1755_v38 = vsel %vm13451_vm5, %v1753_v3, %v1754_v48  ;;  %v1767_v3 = vrot.slane %v1765_v24, 4  ;;  %v1774_v48 = vrot.slane %v1772_v25, 4 }
  0xad   : > { %11357 = vmatprep.subr.bf16.mxu0 %v12723_v14  ;;  %v13643_v26 = vcombine.low %v1738_v29, %v1741_v23  ;;  %v1768_v58 = vrot.slane %v13638_v50, 5  ;;  %v10072_v29 = vrot.slane %v13444_v34, 9  ;;  %v760_v23 = vshll.u32 %v13339_v15, 16 }
  0xae   : > { %v766_v7 = vrot.slane %v764_v40, 4  ;;  %v799_v40 = vshrl.u32 %v13369_v30, 16 }
  0xaf   : > { %11322 = vmatmul.mubr.bf16.gmra.mrb[12].mxu0 %v13597_v18  ;;  %v1752_v18 = vsel %vm13451_vm5, %v10069_v0, %v1751_v37  ;;  %v1762_v37 = vsel %vm13451_vm5, %v1760_v12, %v1761_v46  ;;  %v1775_v0 = vrot.slane %v13641_v5, 5  ;;  %v1779_v12 = vrot.slane %v13470_v63, 5  ;;  %v13674_v46 = vld [vmem:[%s13095_s15 + $0xbc] sm:$0xf] }
  0xb0   : > { %11325 = vmatprep.mubr.bf16.mxu0 %v13599_v4  ;;  %11358 = vmatpush3.bf16.msra.mxu0 %v12723_v14  ;;  %v10071_v14 = vrot.slane %v13437_v43, 9  ;;  %v753_v4 = vrot.slane %v751_v54, 4  ;;  %v762_v10 = vrot.slane %v760_v23, 5  ;;  %v13679_v60 = vcombine.low %v1752_v18, %v1755_v38 }
  0xb1   : > { %11359 = vmatprep.subr.bf16.mxu0 %v12724_v19  ;;  %v13681_v15 = vcombine.low %v1759_v13, %v1762_v37  ;;  %v770_v23 = vshll.u32 %v13539_v8, 16  ;;  %v1769_v44 = vsel %vm13451_vm5, %v1767_v3, %v1768_v58  ;;  %v13693_v18 = vsel %vm13451_vm5, %v10073_v62, %v1779_v12 }
  0xb2   : > { %v1766_v59 = vsel %vm13451_vm5, %v10071_v14, %v1765_v24  ;;  %v1781_v57 = vrot.slane %v1779_v12, 4  ;;  %v1782_v38 = vrot.slane %v13674_v46, 5  ;;  %v1776_v24 = vsel %vm13451_vm5, %v1774_v48, %v1775_v0 }
  0xb3   : > { %v784_v8 = vshll.u32 %v13365_v28, 16  ;;  %v788_v37 = vshrl.u32 %v13365_v28, 16  ;;  %v802_v0 = vshll.u32 %v13369_v30, 16  ;;  %v808_v28 = vshll.u32 %v13372_v31, 16 }
  0xb4   : > { %11360 = vmatpush3.bf16.msra.mxu0 %v12724_v19  ;;  %v756_v19 = vrot.slane %v754_v22, 5  ;;  %v767_v22 = vor.u32 %v766_v7, %v762_v10  ;;  %v775_v7 = vshrl.u32 %v13362_v27, 16 }
  0xb5   : > { %11397 = vmatprep.subr.bf16.mxu0 %v13652_v45  ;;  %v1773_v45 = vsel %vm13451_vm5, %v10072_v29, %v1772_v25  ;;  %v772_v25 = vrot.slane %v770_v23, 5  ;;  %v786_v12 = vrot.slane %v784_v8, 5  ;;  %v794_v23 = vshll.u32 %v13559_v41, 16 }
  0xb6   : > { %v757_v54 = vor.u32 %v756_v19, %v753_v4  ;;  %v768_v14 = vrot.slane %v767_v22, 4  ;;  %v778_v4 = vshll.u32 %v13362_v27, 16  ;;  %v777_v48 = vrot.slane %v775_v7, 4 }
  0xb7   : > { %11326 = vmatmul.mubr.bf16.gmra.mrb[16].mxu0 %v13631_v2  ;;  %v790_v27 = vrot.slane %v788_v37, 4  ;;  %v801_v19 = vrot.slane %v799_v40, 4  ;;  %v818_v7 = vshll.u32 %v13564_v35, 16  ;;  %v796_v37 = vrot.slane %v794_v23, 5 }
  0xb8   : > { %11329 = vmatprep.mubr.bf16.mxu0 %v13633_v16  ;;  %v758_v13 = vrot.slane %v757_v54, 4  ;;  %v773_v29 = vsel %vm13086_vm2, %v768_v14, %v772_v25  ;;  %v780_v62 = vrot.slane %v778_v4, 5  ;;  %v804_v54 = vrot.slane %v802_v0, 5 }
  0xb9   : > { %v791_v30 = vor.u32 %v790_v27, %v786_v12  ;;  %v810_v25 = vrot.slane %v808_v28, 5  ;;  %v13719_v4 = vcombine.low %v1773_v45, %v1776_v24  ;;  %v823_v0 = vshrl.u32 %v13389_v20, 16 }
  0xba   : > { %v763_v58 = vsel %vm13086_vm2, %v758_v13, %v762_v10  ;;  %v13712_v10 = vcombine.low %v1766_v59, %v1769_v44  ;;  %v781_v22 = vor.u32 %v780_v62, %v777_v48  ;;  %v812_v13 = vshrl.u32 %v13372_v31, 16 }
  0xbb   : > { %v13708_v3 = vcombine.low %v763_v58, %v773_v29  ;;  %v805_v14 = vor.u32 %v804_v54, %v801_v19  ;;  %v1783_v44 = vsel %vm13451_vm5, %v1781_v57, %v1782_v38  ;;  %v792_v41 = vrot.slane %v791_v30, 4 }
  0xbc   : > { %v782_v8 = vrot.slane %v781_v22, 4  ;;  %v814_v59 = vrot.slane %v812_v13, 4  ;;  %v820_v31 = vrot.slane %v818_v7, 5  ;;  %v826_v48 = vshll.u32 %v13389_v20, 16 }
  0xbd   : > { %11221 = vmatprep.mubr.bf16.mxu1 %v13708_v3  ;;  %v806_v58 = vrot.slane %v805_v14, 4  ;;  %v797_v35 = vsel %vm13086_vm2, %v792_v41, %v796_v37  ;;  %v832_v24 = vshll.u32 %v13392_v42, 16  ;;  %v836_v57 = vshrl.u32 %v13392_v42, 16 }
  0xbe   : > { %v787_v29 = vsel %vm13086_vm2, %v782_v8, %v786_v12  ;;  %v815_v40 = vor.u32 %v814_v59, %v810_v25  ;;  %v825_v27 = vrot.slane %v823_v0, 4  ;;  %v828_v12 = vrot.slane %v826_v48, 5 }
  0xbf   : > { %11330 = vmatmul.mubr.bf16.gmra.mrb[20].mxu0 %v13643_v26  ;;  %v811_v45 = vsel %vm13086_vm2, %v806_v58, %v810_v25  ;;  %v13733_v38 = vcombine.low %v787_v29, %v797_v35  ;;  %v834_v19 = vrot.slane %v832_v24, 5  ;;  %v838_v54 = vrot.slane %v836_v57, 4 }
  0xc0   : > { %11333 = vmatprep.mubr.bf16.mxu0 %v13677_v11  ;;  %v816_v62 = vrot.slane %v815_v40, 4  ;;  %v847_v28 = vshrl.u32 %v13396_v47, 16  ;;  %v850_v20 = vshll.u32 %v13396_v47, 16  ;;  %v829_v23 = vor.u32 %v828_v12, %v825_v27 }
  0xc1   : > { %v842_v13 = vshll.u32 %v13581_v55, 16  ;;  %v856_v42 = vshll.u32 %v13399_v49, 16  ;;  %11222 = vmatmul.mubr.bf16.vlgmr.msra.gmra.mrb[0].mxu1 %v13733_v38  ;;  %v839_v14 = vor.u32 %v838_v54, %v834_v19  ;;  %v860_v59 = vshrl.u32 %v13399_v49, 16 }
  0xc2   : > { %v821_v22 = vsel %vm13086_vm2, %v816_v62, %v820_v31  ;;  %v849_v25 = vrot.slane %v847_v28, 4  ;;  %v852_v7 = vrot.slane %v850_v20, 5  ;;  %v830_v47 = vrot.slane %v829_v23, 4 }
  0xc3   : > { %v13744_v30 = vcombine.low %v811_v45, %v821_v22  ;;  %v844_v8 = vrot.slane %v842_v13, 5  ;;  %v858_v37 = vrot.slane %v856_v42, 5  ;;  %v13748_v41 = vcombine.low %v13693_v18, %v1783_v44 }
  0xc4   : > { %v840_v55 = vrot.slane %v839_v14, 4  ;;  %v853_v58 = vor.u32 %v852_v7, %v849_v25  ;;  %v866_v31 = vshll.u32 %v13594_v32, 16  ;;  %v835_v29 = vsel %vm13086_vm2, %v830_v47, %v834_v19 }
  0xc5   : > { %11225 = vmatprep.mubr.bf16.mxu1 %v13744_v30  ;;  %v862_v40 = vrot.slane %v860_v59, 4  ;;  %v871_v0 = vshrl.u32 %v13413_v61, 16  ;;  %v874_v48 = vshll.u32 %v13413_v61, 16  ;;  %v880_v44 = vshll.u32 %v13416_v21, 16 }
  0xc6   : > { %v845_v49 = vsel %vm13086_vm2, %v840_v55, %v844_v8  ;;  %v854_v35 = vrot.slane %v853_v58, 4  ;;  %v868_v18 = vrot.slane %v866_v31, 5  ;;  %v884_v12 = vshrl.u32 %v13416_v21, 16 }
  0xc7   : > { %11334 = vmatmul.mubr.bf16.gmra.mrb[24].mxu0 %v13679_v60  ;;  %v13759_v45 = vcombine.low %v835_v29, %v845_v49  ;;  %v863_v32 = vor.u32 %v862_v40, %v858_v37  ;;  %v873_v24 = vrot.slane %v871_v0, 4  ;;  %v876_v57 = vrot.slane %v874_v48, 5 }
  0xc8   : > { %11337 = vmatprep.mubr.bf16.mxu0 %v13681_v15  ;;  %v859_v62 = vsel %vm13086_vm2, %v854_v35, %v858_v37  ;;  %v882_v27 = vrot.slane %v880_v44, 5  ;;  %v895_v61 = vshrl.u32 %v13420_v33, 16  ;;  %v890_v28 = vshll.u32 %v13604_v52, 16 }
  0xc9   : > { %v864_v19 = vrot.slane %v863_v32, 4  ;;  %v877_v54 = vor.u32 %v876_v57, %v873_v24  ;;  %v898_v20 = vshll.u32 %v13420_v33, 16  ;;  %11226 = vmatmul.mubr.bf16.gmra.mrb[4].mxu1 %v13759_v45  ;;  %v886_v22 = vrot.slane %v884_v12, 4 }
  0xca   : > { %v897_v23 = vrot.slane %v895_v61, 4  ;;  %v904_v13 = vshll.u32 %v13423_v1, 16  ;;  %v908_v21 = vshrl.u32 %v13423_v1, 16  ;;  %v892_v25 = vrot.slane %v890_v28, 5 }
  0xcb   : > { %v869_v42 = vsel %vm13086_vm2, %v864_v19, %v868_v18  ;;  %v878_v14 = vrot.slane %v877_v54, 4  ;;  %v900_v7 = vrot.slane %v898_v20, 5  ;;  %v887_v52 = vor.u32 %v886_v22, %v882_v27 }
  0xcc   : > { %v13774_v47 = vcombine.low %v859_v62, %v869_v42  ;;  %v906_v33 = vrot.slane %v904_v13, 5  ;;  %v910_v8 = vrot.slane %v908_v21, 4  ;;  %v914_v55 = vshll.u32 %v13615_v36, 16 }
  0xcd   : > { %v883_v37 = vsel %vm13086_vm2, %v878_v14, %v882_v27  ;;  %v901_v59 = vor.u32 %v900_v7, %v897_v23  ;;  %v919_v58 = vshrl.u32 %v13437_v43, 16  ;;  %v888_v1 = vrot.slane %v887_v52, 4 }
  0xce   : > { %v911_v31 = vor.u32 %v910_v8, %v906_v33  ;;  %v922_v29 = vshll.u32 %v13437_v43, 16  ;;  %v928_v40 = vshll.u32 %v13440_v17, 16  ;;  %11229 = vmatprep.mubr.bf16.mxu1 %v13774_v47  ;;  %v916_v48 = vrot.slane %v914_v55, 5 }
  0xcf   : > { %11338 = vmatmul.mubr.bf16.gmra.mrb[28].mxu0 %v13712_v10  ;;  %v902_v0 = vrot.slane %v901_v59, 4  ;;  %v921_v49 = vrot.slane %v919_v58, 4  ;;  %v932_v35 = vshrl.u32 %v13440_v17, 16  ;;  %v893_v18 = vsel %vm13086_vm2, %v888_v1, %v892_v25 }
  0xd0   : > { %11341 = vmatprep.mubr.bf16.mxu0 %v13719_v4  ;;  %v912_v44 = vrot.slane %v911_v31, 4  ;;  %v924_v36 = vrot.slane %v922_v29, 5  ;;  %v930_v32 = vrot.slane %v928_v40, 5  ;;  %v13787_v24 = vcombine.low %v883_v37, %v893_v18  ;;  %v16353_v40 = vld [vmem:[#allocation33_spill] sm:$0xff]  ;;  %v12727_v18 = vld [vmem:[%s16192_s3 + $0x110] sm:$0xff]  }
  0xd1   : > { %v907_v43 = vsel %vm13086_vm2, %v902_v0, %v906_v33  ;;  %v934_v57 = vrot.slane %v932_v35, 4  ;;  %v938_v62 = vshll.u32 %v13638_v50, 16  ;;  %v943_v12 = vshrl.u32 %v13444_v34, 16  ;;  %v12726_v33 = vld [vmem:[%s16192_s3 + $0x108] sm:$0xff]   ;;  %v16354_v0 = vld [vmem:[#allocation10_spill] sm:$0xff] }
  0xd2   : > { %v917_v17 = vsel %vm13086_vm2, %v912_v44, %v916_v48  ;;  %v925_v27 = vor.u32 %v924_v36, %v921_v49  ;;  %v946_v61 = vshll.u32 %v13444_v34, 16  ;;  %v952_v20 = vshll.u32 %v13447_v39, 16  ;;  %11230 = vmatmul.mubr.bf16.gmra.mrb[8].mxu1 %v13787_v24 }
  0xd3   : > { %v13797_v19 = vcombine.low %v907_v43, %v917_v17  ;;  %v935_v54 = vor.u32 %v934_v57, %v930_v32  ;;  %v940_v28 = vrot.slane %v938_v62, 5  ;;  %v945_v50 = vrot.slane %v943_v12, 4  ;;  %v12728_v57 = vld [vmem:[%s16192_s3 + $0x118] sm:$0xff]  }
  0xd4   : > { %v926_v22 = vrot.slane %v925_v27, 4  ;;  %v948_v23 = vrot.slane %v946_v61, 5  ;;  %v954_v21 = vrot.slane %v952_v20, 5  ;;  %v962_v42 = vshll.u32 %v13641_v5, 16  ;;  %v16355_v27 = vld [vmem:[#allocation11_spill] sm:$0xff]  ;;  %v16356_v61 = vld [vmem:[#allocation12_spill] sm:$0xff] }
  0xd5   : > { %v936_v13 = vrot.slane %v935_v54, 4  ;;  %v967_v14 = vshrl.u32 %v13467_v53, 16  ;;  %11233 = vmatprep.mubr.bf16.mxu1 %v13797_v19  ;;  %v970_v52 = vshll.u32 %v13467_v53, 16  ;;  %v976_v5 = vshll.u32 %v13470_v63, 16  ;;  %v12730_v20 = vld [vmem:[%s16192_s3 + $0x128] sm:$0xff]  }
  0xd6   : > { %v931_v34 = vsel %vm13086_vm2, %v926_v22, %v930_v32  ;;  %v949_v25 = vor.u32 %v948_v23, %v945_v50  ;;  %v964_v55 = vrot.slane %v962_v42, 5  ;;  %v980_v53 = vshrl.u32 %v13470_v63, 16  ;;  %v16357_v22 = vld [vmem:[#allocation13_spill] sm:$0xff]  ;;  %v16358_v50 = vld [vmem:[#allocation14_spill] sm:$0xff]  ;;  %v12734_v42 = vld [vmem:[%s16192_s3 + $0x140] sm:$0xff]  }
  0xd7   : > { %11342 = vmatmul.mubr.bf16.gmra.mrb[32].mxu0 %v13748_v41  ;;  %v969_v8 = vrot.slane %v967_v14, 4  ;;  %v972_v58 = vrot.slane %v970_v52, 5  ;;  %v978_v31 = vrot.slane %v976_v5, 5  ;;  %v986_v29 = vshll.u32 %v13674_v46, 16  ;;  %v12731_v23 = vld [vmem:[%s16192_s3 + $0x130] sm:$0xff]   ;;  %v16361_v14 = vld [vmem:[#allocation17_spill] sm:$0xff] }
  0xd8   : > { %11361 = vmatprep.mubr.bf16.mxu0 %v13280_v51  ;;  %v956_v51 = vshrl.u32 %v13447_v39, 16  ;;  %v941_v39 = vsel %vm13086_vm2, %v936_v13, %v940_v28  ;;  %v950_v37 = vrot.slane %v949_v25, 4  ;;  %v982_v44 = vrot.slane %v980_v53, 4  ;;  %v12729_v28 = vld [vmem:[%s16192_s3 + $0x120] sm:$0xff]   ;;  %v16359_v13 = vld [vmem:[#allocation15_spill] sm:$0xff]  ;;  %v16365_v52 = vld [vmem:[#allocation21_spill] sm:$0xff] }
  0xd9   : > { %v13815_v1 = vcombine.low %v931_v34, %v941_v39  ;;  %v973_v35 = vor.u32 %v972_v58, %v969_v8  ;;  %v988_v43 = vrot.slane %v986_v29, 5  ;;  %v16362_v34 = vld [vmem:[#allocation18_spill] sm:$0xff]  ;;  %v16363_v25 = vld [vmem:[#allocation19_spill] sm:$0xff]  ;;  %v16368_v8 = vld [vmem:[#allocation24_spill] sm:$0xff] }
  0xda   : > { %v958_v7 = vrot.slane %v956_v51, 4  ;;  %v955_v48 = vsel %vm13086_vm2, %v950_v37, %v954_v21  ;;  %v983_v32 = vor.u32 %v982_v44, %v978_v31  ;;  %v12732_v51 = vld [vmem:[%s16192_s3 + $0x138] sm:$0xff]   ;;  %v13879_v5 = vld [vmem:[%s13874_s21] sm:$0xf]  ;;  %v13882_v37 = vld [vmem:[%s13874_s21 + $0x4] sm:$0xf] }
  0xdb   : > { %11234 = vmatmul.mubr.bf16.gmra.mrb[12].mxu1 %v13815_v1  ;;  %v974_v46 = vrot.slane %v973_v35, 4  ;;  %v16367_v39 = vld [vmem:[#allocation23_spill] sm:$0xff]  ;;  %v12735_v58 = vld [vmem:[%s16192_s3 + $0x148] sm:$0xff]   ;;  %v12736_v29 = vld [vmem:[%s16192_s3 + $0x150] sm:$0xff]  }
  0xdc   : > { %v959_v59 = vor.u32 %v958_v7, %v954_v21  ;;  %v984_v17 = vrot.slane %v983_v32, 4  ;;  %v16360_v21 = vld [vmem:[#allocation16_spill] sm:$0xff]  ;;  %v16371_v53 = vld [vmem:[#allocation5_spill] sm:$0xff]  ;;  %v12741_v32 = vld [vmem:[%s16192_s3 + $0x178] sm:$0xff]  }
  0xdd   : > { %v979_v62 = vsel %vm13086_vm2, %v974_v46, %v978_v31  ;;  %v16364_v7 = vld [vmem:[#allocation20_spill] sm:$0xff]  ;;  %v12740_v46 = vld [vmem:[%s16192_s3 + $0x170] sm:$0xff]  }
  0xde   : > { %v960_v49 = vrot.slane %v959_v59, 4  ;;  %v989_v12 = vsel %vm13086_vm2, %v984_v17, %v988_v43  ;;  %v13886_v59 = vcombine.low %v13879_v5, %v13882_v37  ;;  %v16370_v31 = vld [vmem:[#allocation4_spill] sm:$0xff]  ;;  %v2432_v17 = vshrl.u32 %v13882_v37, 16 }
  0xdf   : > { %11362 = vmatmul.mubr.bf16.vlgmr.msra.gmra.mrb[0].mxu0 %v13292_v56  ;;  %v13841_v54 = vcombine.low %v979_v62, %v989_v12  ;;  %v12738_v35 = vld [vmem:[%s16192_s3 + $0x160] sm:$0xff]   ;;  %v2422_v62 = vshll.u32 %v13879_v5, 16  ;;  %v2428_v12 = vshll.u32 %v13882_v37, 16 }
  0xe0   : > { %11398 = vmatpush3.bf16.msra.mxu0 %v16353_v40  ;;  %11365 = vmatprep.mubr.bf16.mxu0 %v16354_v0  ;;  %v965_v63 = vsel %vm13086_vm2, %v960_v49, %v964_v55  ;;  %v16369_v55 = vld [vmem:[#allocation3_spill] sm:$0xff]  ;;  %v16374_v44 = vld [vmem:[#allocation8_spill] sm:$0xff] }
  0xe1   : > { %11399 = vmatprep.subr.bf16.mxu0 %v12726_v33  ;;  %v13829_v36 = vcombine.low %v955_v48, %v965_v63  ;;  %v12737_v40 = vld [vmem:[%s16192_s3 + $0x158] sm:$0xff]   ;;  %v16372_v48 = vld [vmem:[#allocation6_spill] sm:$0xff]  ;;  %v16375_v63 = vld [vmem:[#allocation9_spill] sm:$0xff] }
  0xe2   : > { %v16373_v49 = vld [vmem:[#allocation7_spill] sm:$0xff]  ;;  %v12742_v43 = vld [vmem:[%s16192_s3 + $0x180] sm:$0xff]  }
  0xe3   : > { %11237 = vmatprep.mubr.bf16.mxu1 %v13829_v36 }
  0xe4   : > { %11400 = vmatpush3.bf16.msra.mxu0 %v12726_v33  ;;  %11238 = vmatmul.mubr.bf16.gmra.mrb[16].mxu1 %v13841_v54  ;;  %v16366_v33 = vld [vmem:[#allocation22_spill] sm:$0xff] }
  0xe5   : > { %11401 = vmatprep.subr.bf16.mxu0 %v12727_v18 }
  0xe7   : > { %11366 = vmatmul.mubr.bf16.gmra.mrb[4].mxu0 %v16355_v27 }
  0xe8   : > { %11369 = vmatprep.mubr.bf16.mxu0 %v16356_v61  ;;  %11402 = vmatpush3.bf16.msra.mxu0 %v12727_v18  ;;  %v12739_v18 = vld [vmem:[%s16192_s3 + $0x168] sm:$0xff]  }
  0xe9   : > { %11403 = vmatprep.subr.bf16.mxu0 %v12728_v57 }
  0xec   : > { %11404 = vmatpush3.bf16.msra.mxu0 %v12728_v57  ;;  %v2419_v57 = vshrl.u32 %v13879_v5, 16 }
  0xed   : > { %11405 = vmatprep.subr.bf16.mxu0 %v12729_v28 }
  0xef   : > { %11370 = vmatmul.mubr.bf16.gmra.mrb[8].mxu0 %v16357_v22 }
  0xf0   : > { %11373 = vmatprep.mubr.bf16.mxu0 %v16358_v50  ;;  %11406 = vmatpush3.bf16.msra.mxu0 %v12729_v28  ;;  %v2421_v28 = vrot.slane %v2419_v57, 4 }
  0xf1   : > { %11407 = vmatprep.subr.bf16.mxu0 %v12730_v20 }
  0xf4   : > { %11408 = vmatpush3.bf16.msra.mxu0 %v12730_v20  ;;  %v2424_v20 = vrot.slane %v2422_v62, 5  ;;  %v16376_v62 = vld [vmem:[#allocation25_spill] sm:$0xff] }
  0xf5   : > { %11409 = vmatprep.subr.bf16.mxu0 %v12731_v23 }
  0xf7   : > { %11374 = vmatmul.mubr.bf16.gmra.mrb[12].mxu0 %v16359_v13 }
  0xf8   : > { %11377 = vmatprep.mubr.bf16.mxu0 %v16360_v21  ;;  %11410 = vmatpush3.bf16.msra.mxu0 %v12731_v23  ;;  %v2430_v23 = vrot.slane %v2428_v12, 5  ;;  %v16377_v12 = vld [vmem:[#allocation26_spill] sm:$0xff] }
  0xf9   : > { %11411 = vmatprep.subr.bf16.mxu0 %v12732_v51 }
  0xfc   : > { %11412 = vmatpush3.bf16.msra.mxu0 %v12732_v51  ;;  %v2434_v51 = vrot.slane %v2432_v17, 4  ;;  %v12743_v17 = vld [vmem:[%s16192_s3 + $0x188] sm:$0xff]  }
  0xfd   : > { %11449 = vmatprep.subr.bf16.mxu0 %v12734_v42 }
  0xff   : > { %11378 = vmatmul.mubr.bf16.gmra.mrb[16].mxu0 %v16361_v14 }
 0x100   : > { %11381 = vmatprep.mubr.bf16.mxu0 %v16362_v34 }
 0x107   : > { %11382 = vmatmul.mubr.bf16.gmra.mrb[20].mxu0 %v16363_v25 }
 0x108   : > { %11385 = vmatprep.mubr.bf16.mxu0 %v16364_v7 }
 0x10f   : > { %11386 = vmatmul.mubr.bf16.gmra.mrb[24].mxu0 %v16365_v52 }
 0x110   : > { %11389 = vmatprep.mubr.bf16.mxu0 %v16366_v33 }
 0x117   : > { %11390 = vmatmul.mubr.bf16.gmra.mrb[28].mxu0 %v16367_v39 }
 0x118   : > { %11393 = vmatprep.mubr.bf16.mxu0 %v16368_v8 }
 0x11f   : > { %11394 = vmatmul.mubr.bf16.gmra.mrb[32].mxu0 %v13886_v59 }
 0x120   : > { %11413 = vmatprep.mubr.bf16.mxu0 %v16369_v55  ;;  %v2425_v55 = vor.u32 %v2424_v20, %v2421_v28  ;;  %v16378_v28 = vld [vmem:[#allocation27_spill] sm:$0xff]  ;;  %v12744_v20 = vld [vmem:[%s16192_s3 + $0x190] sm:$0xff]  }
 0x127   : > { %11414 = vmatmul.mubr.bf16.vlgmr.msra.gmra.mrb[0].mxu0 %v16370_v31 }
 0x128   : > { %11450 = vmatpush3.bf16.msra.mxu0 %v12734_v42  ;;  %11417 = vmatprep.mubr.bf16.mxu0 %v16371_v53  ;;  %v13931_v42 = vld [vmem:[%s13874_s21 + $0x8] sm:$0xf] }
 0x129   : > { %11451 = vmatprep.subr.bf16.mxu0 %v12735_v58 }
 0x12c   : > { %11452 = vmatpush3.bf16.msra.mxu0 %v12735_v58  ;;  %v2435_v58 = vor.u32 %v2434_v51, %v2430_v23  ;;  %v16379_v51 = vld [vmem:[#allocation28_spill] sm:$0xff] }
 0x12d   : > { %11453 = vmatprep.subr.bf16.mxu0 %v12736_v29 }
 0x12f   : > { %11418 = vmatmul.mubr.bf16.gmra.mrb[4].mxu0 %v16372_v48 }
 0x130   : > { %11421 = vmatprep.mubr.bf16.mxu0 %v16373_v49  ;;  %11454 = vmatpush3.bf16.msra.mxu0 %v12736_v29  ;;  %v2438_v29 = vshll.u32 %v13931_v42, 16 }
 0x131   : > { %11455 = vmatprep.subr.bf16.mxu0 %v12737_v40 }
 0x134   : > { %11456 = vmatpush3.bf16.msra.mxu0 %v12737_v40  ;;  %v2426_v40 = vrot.slane %v2425_v55, 4  ;;  %v16380_v55 = vld [vmem:[#allocation29_spill] sm:$0xff] }
 0x135   : > { %11457 = vmatprep.subr.bf16.mxu0 %v12738_v35 }
 0x137   : > { %11422 = vmatmul.mubr.bf16.gmra.mrb[8].mxu0 %v16374_v44 }
 0x138   : > { %11425 = vmatprep.mubr.bf16.mxu0 %v16375_v63  ;;  %11458 = vmatpush3.bf16.msra.mxu0 %v12738_v35  ;;  %v2436_v35 = vrot.slane %v2435_v58, 4  ;;  %v12747_v58 = vld [vmem:[%s16192_s3 + $0x1a8] sm:$0xff]  }
 0x139   : > { %11459 = vmatprep.subr.bf16.mxu0 %v12739_v18 }
 0x13c   : > { %11460 = vmatpush3.bf16.msra.mxu0 %v12739_v18  ;;  %v2440_v18 = vrot.slane %v2438_v29, 5  ;;  %v16381_v29 = vld [vmem:[#allocation30_spill] sm:$0xff] }
 0x13d   : > { %11461 = vmatprep.subr.bf16.mxu0 %v12740_v46 }
 0x13f   : > { %11426 = vmatmul.mubr.bf16.gmra.mrb[12].mxu0 %v13708_v3 }
 0x140   : > { %11429 = vmatprep.mubr.bf16.mxu0 %v13733_v38  ;;  %11462 = vmatpush3.bf16.msra.mxu0 %v12740_v46  ;;  %v2431_v46 = vsel %vm13086_vm2, %v2426_v40, %v2430_v23  ;;  %v12745_v23 = vld [vmem:[%s16192_s3 + $0x198] sm:$0xff]  }
 0x141   : > { %11463 = vmatprep.subr.bf16.mxu0 %v12741_v32  ;;  %v16382_v40 = vld [vmem:[#allocation31_spill] sm:$0xff] }
 0x144   : > { %11464 = vmatpush3.bf16.msra.mxu0 %v12741_v32  ;;  %v2441_v32 = vsel %vm13086_vm2, %v2436_v35, %v2440_v18  ;;  %v12748_v35 = vld [vmem:[%s16192_s3 + $0x1b0] sm:$0xff]   ;;  %v12749_v18 = vld [vmem:[%s16192_s3 + $0x1b8] sm:$0xff]  }
 0x145   : > { %11501 = vmatprep.subr.bf16.mxu0 %v12742_v43  ;;  %v13942_v57 = vcombine.low %v2431_v46, %v2441_v32  ;;  %v16383_v46 = vld [vmem:[#allocation32_spill] sm:$0xff] }
 0x146   : > { %v12750_v32 = vld [vmem:[%s16192_s3 + $0x1c0] sm:$0xff]  }
 0x147   : > { %11430 = vmatmul.mubr.bf16.gmra.mrb[16].mxu0 %v13744_v30 }
 0x148   : > { %11433 = vmatprep.mubr.bf16.mxu0 %v13759_v45 }
 0x14f   : > { %11434 = vmatmul.mubr.bf16.gmra.mrb[20].mxu0 %v13774_v47 }
 0x150   : > { %11437 = vmatprep.mubr.bf16.mxu0 %v13787_v24 }
 0x157   : > { %11438 = vmatmul.mubr.bf16.gmra.mrb[24].mxu0 %v13797_v19 }
 0x158   : > { %11441 = vmatprep.mubr.bf16.mxu0 %v13815_v1 }
 0x15f   : > { %11442 = vmatmul.mubr.bf16.gmra.mrb[28].mxu0 %v13829_v36 }
 0x160   : > { %11445 = vmatprep.mubr.bf16.mxu0 %v13841_v54 }
 0x167   : > { %11446 = vmatmul.mubr.bf16.gmra.mrb[32].mxu0 %v13942_v57 }
 0x168   : > { %11465 = vmatprep.mubr.bf16.mxu0 %v16376_v62  ;;  %v2727_v62 = vrot.slane %v13882_v37, 5  ;;  %v12752_v37 = vld [vmem:[%s16192_s3 + $0x1d0] sm:$0xff]  }
 0x16f   : > { %11466 = vmatmul.mubr.bf16.vlgmr.msra.gmra.mrb[0].mxu0 %v16377_v12 }
 0x170   : > { %11502 = vmatpush3.bf16.msra.mxu0 %v12742_v43  ;;  %11469 = vmatprep.mubr.bf16.mxu0 %v16378_v28  ;;  %v12746_v43 = vld [vmem:[%s16192_s3 + $0x1a0] sm:$0xff]  }
 0x171   : > { %11503 = vmatprep.subr.bf16.mxu0 %v12743_v17 }
 0x174   : > { %11504 = vmatpush3.bf16.msra.mxu0 %v12743_v17  ;;  %v10166_v17 = vrot.slane %v13879_v5, 9  ;;  %v12751_v5 = vld [vmem:[%s16192_s3 + $0x1c8] sm:$0xff]  }
 0x175   : > { %11505 = vmatprep.subr.bf16.mxu0 %v12744_v20 }
 0x177   : > { %11470 = vmatmul.mubr.bf16.gmra.mrb[4].mxu0 %v16379_v51 }
 0x178   : > { %11473 = vmatprep.mubr.bf16.mxu0 %v16380_v55  ;;  %11506 = vmatpush3.bf16.msra.mxu0 %v12744_v20  ;;  %v2729_v20 = vrot.slane %v2727_v62, 4 }
 0x179   : > { %11507 = vmatprep.subr.bf16.mxu0 %v12745_v23 }
 0x17c   : > { %11508 = vmatpush3.bf16.msra.mxu0 %v12745_v23  ;;  %v2730_v23 = vrot.slane %v13931_v42, 5 }
 0x17d   : > { %11509 = vmatprep.subr.bf16.mxu0 %v12746_v43 }
 0x17f   : > { %11474 = vmatmul.mubr.bf16.gmra.mrb[8].mxu0 %v16381_v29 }
 0x180   : > { %11477 = vmatprep.mubr.bf16.mxu0 %v16382_v40  ;;  %11510 = vmatpush3.bf16.msra.mxu0 %v12746_v43  ;;  %v2728_v43 = vsel %vm13451_vm5, %v10166_v17, %v2727_v62 }
 0x181   : > { %11511 = vmatprep.subr.bf16.mxu0 %v12747_v58 }
 0x184   : > { %11512 = vmatpush3.bf16.msra.mxu0 %v12747_v58  ;;  %v2731_v58 = vsel %vm13451_vm5, %v2729_v20, %v2730_v23  ;;  %v12774_v20 = vld [vmem:[%s16193_s4 + $0x78] sm:$0xff]  }
 0x185   : > { %11513 = vmatprep.subr.bf16.mxu0 %v12748_v35 }
 0x187   : > { %11478 = vmatmul.mubr.bf16.gmra.mrb[12].mxu0 %v16383_v46 }
 0x188   : > { %11481 = vmatprep.mubr.bf16.mxu0 %v13631_v2  ;;  %11514 = vmatpush3.bf16.msra.mxu0 %v12748_v35  ;;  %v13993_v35 = vcombine.low %v2728_v43, %v2731_v58  ;;  %v12775_v58 = vld [vmem:[%s16193_s4] sm:$0xff]  }
 0x189   : > { %11515 = vmatprep.subr.bf16.mxu0 %v12749_v18 }
 0x18c   : > { %11516 = vmatpush3.bf16.msra.mxu0 %v12749_v18 }
 0x18d   : > { %11553 = vmatprep.subr.bf16.mxu0 %v12750_v32 }
 0x18f   : > { %11482 = vmatmul.mubr.bf16.gmra.mrb[16].mxu0 %v13633_v16 }
 0x190   : > { %11485 = vmatprep.mubr.bf16.mxu0 %v13643_v26 }
 0x197   : > { %11486 = vmatmul.mubr.bf16.gmra.mrb[20].mxu0 %v13677_v11 }
 0x198   : > { %11489 = vmatprep.mubr.bf16.mxu0 %v13679_v60 }
 0x19f   : > { %11490 = vmatmul.mubr.bf16.gmra.mrb[24].mxu0 %v13681_v15 }
 0x1a0   : > { %11493 = vmatprep.mubr.bf16.mxu0 %v13712_v10 }
 0x1a7   : > { %11494 = vmatmul.mubr.bf16.gmra.mrb[28].mxu0 %v13719_v4 }
 0x1a8   : > { %11497 = vmatprep.mubr.bf16.mxu0 %v13748_v41 }
 0x1af   : > { %11498 = vmatmul.mubr.bf16.gmra.mrb[32].mxu0 %v13993_v35 }
 0x1b0   : > { %11517 = vmatprep.mubr.bf16.mxu0 %v13292_v56  ;;  %v12753_v56 = vld [vmem:[%s16192_s3 + $0x1d8] sm:$0xff]  }
 0x1b7   : > { %11518 = vmatmul.mubr.bf16.vlgmr.msra.gmra.mrb[0].mxu0 %v16354_v0  ;;  %v12754_v0 = vld [vmem:[%s16192_s3 + $0x1e0] sm:$0xff]  }
 0x1b8   : > { %11554 = vmatpush3.bf16.msra.mxu0 %v12750_v32  ;;  %11521 = vmatprep.mubr.bf16.mxu0 %v16355_v27  ;;  %v12755_v27 = vld [vmem:[%s16192_s3 + $0x1e8] sm:$0xff]  }
 0x1b9   : > { %11555 = vmatprep.subr.bf16.mxu0 %v12751_v5 }
 0x1bc   : > { %11556 = vmatpush3.bf16.msra.mxu0 %v12751_v5 }
 0x1bd   : > { %11557 = vmatprep.subr.bf16.mxu0 %v12752_v37 }
 0x1bf   : > { %11522 = vmatmul.mubr.bf16.gmra.mrb[4].mxu0 %v16356_v61  ;;  %v12756_v61 = vld [vmem:[%s16192_s3 + $0x1f0] sm:$0xff]  }
 0x1c0   : > { %11525 = vmatprep.mubr.bf16.mxu0 %v16357_v22  ;;  %11558 = vmatpush3.bf16.msra.mxu0 %v12752_v37  ;;  %v12757_v22 = vld [vmem:[%s16192_s3 + $0x1f8] sm:$0xff]  }
 0x1c1   : > { %11559 = vmatprep.subr.bf16.mxu0 %v12753_v56 }
 0x1c4   : > { %11560 = vmatpush3.bf16.msra.mxu0 %v12753_v56 }
 0x1c5   : > { %11561 = vmatprep.subr.bf16.mxu0 %v12754_v0 }
 0x1c7   : > { %11526 = vmatmul.mubr.bf16.gmra.mrb[8].mxu0 %v16358_v50  ;;  %v12759_v50 = vld [vmem:[%s16192_s3 + $0x200] sm:$0xff]  }
 0x1c8   : > { %11529 = vmatprep.mubr.bf16.mxu0 %v16359_v13  ;;  %11562 = vmatpush3.bf16.msra.mxu0 %v12754_v0  ;;  %v14038_v13 = vld [vmem:[%s13874_s21 + $0xc] sm:$0xf] }
 0x1c9   : > { %11563 = vmatprep.subr.bf16.mxu0 %v12755_v27 }
 0x1cc   : > { %11564 = vmatpush3.bf16.msra.mxu0 %v12755_v27 }
 0x1cd   : > { %11565 = vmatprep.subr.bf16.mxu0 %v12756_v61 }
 0x1cf   : > { %11530 = vmatmul.mubr.bf16.gmra.mrb[12].mxu0 %v16360_v21  ;;  %v14041_v21 = vld [vmem:[%s13874_s21 + $0x10] sm:$0xf] }
 0x1d0   : > { %11533 = vmatprep.mubr.bf16.mxu0 %v16361_v14  ;;  %11566 = vmatpush3.bf16.msra.mxu0 %v12756_v61  ;;  %v10208_v14 = vcombine.low %v14038_v13, %v14041_v21 }
 0x1d1   : > { %11567 = vmatprep.subr.bf16.mxu0 %v12757_v22 }
 0x1d4   : > { %11568 = vmatpush3.bf16.msra.mxu0 %v12757_v22  ;;  %v14177_v22 = vld [vmem:[%s16194_s5] ss:$0 sm:$0xff] }
 0x1d5   : > { %11605 = vmatprep.subr.bf16.mxu0 %v12759_v50 }
 0x1d7   : > { %11534 = vmatmul.mubr.bf16.gmra.mrb[16].mxu0 %v16362_v34  ;;  %v12760_v34 = vld [vmem:[%s16192_s3 + $0x208] sm:$0xff]  }
 0x1d8   : > { %11537 = vmatprep.mubr.bf16.mxu0 %v16363_v25  ;;  %v12761_v25 = vld [vmem:[%s16192_s3 + $0x210] sm:$0xff]  }
 0x1df   : > { %11538 = vmatmul.mubr.bf16.gmra.mrb[20].mxu0 %v16364_v7  ;;  %v12762_v7 = vld [vmem:[%s16192_s3 + $0x218] sm:$0xff]  }
 0x1e0   : > { %11541 = vmatprep.mubr.bf16.mxu0 %v16365_v52  ;;  %v12763_v52 = vld [vmem:[%s16192_s3 + $0x220] sm:$0xff]  }
 0x1e7   : > { %11542 = vmatmul.mubr.bf16.gmra.mrb[24].mxu0 %v16366_v33  ;;  %v12764_v33 = vld [vmem:[%s16192_s3 + $0x228] sm:$0xff]  }
 0x1e8   : > { %11545 = vmatprep.mubr.bf16.mxu0 %v16367_v39  ;;  %v12765_v39 = vld [vmem:[%s16192_s3 + $0x230] sm:$0xff]  }
 0x1ef   : > { %11546 = vmatmul.mubr.bf16.gmra.mrb[28].mxu0 %v16368_v8  ;;  %v12766_v8 = vld [vmem:[%s16192_s3 + $0x238] sm:$0xff]  }
 0x1f0   : > { %11549 = vmatprep.mubr.bf16.mxu0 %v13886_v59  ;;  %v3302_v59 = vshll.u32 %v14038_v13, 16 }
 0x1f7   : > { %11550 = vmatmul.mubr.bf16.gmra.mrb[32].mxu0 %v10208_v14 }
 0x1f8   : > { %11569 = vmatprep.mubr.bf16.mxu0 %v16370_v31  ;;  %v3312_v31 = vshrl.u32 %v14041_v21, 16 }
 0x1ff   : > { %11570 = vmatmul.mubr.bf16.vlgmr.msra.gmra.mrb[0].mxu0 %v16371_v53  ;;  %v3304_v53 = vrot.slane %v3302_v59, 5 }
 0x200   : > { %11606 = vmatpush3.bf16.msra.mxu0 %v12759_v50  ;;  %11573 = vmatprep.mubr.bf16.mxu0 %v16372_v48 }
 0x201   : > { %11607 = vmatprep.subr.bf16.mxu0 %v12760_v34 }
 0x204   : > { %11608 = vmatpush3.bf16.msra.mxu0 %v12760_v34 }
 0x205   : > { %11609 = vmatprep.subr.bf16.mxu0 %v12761_v25 }
 0x207   : > { %11574 = vmatmul.mubr.bf16.gmra.mrb[4].mxu0 %v16373_v49  ;;  %v3314_v49 = vrot.slane %v3312_v31, 4 }
 0x208   : > { %11577 = vmatprep.mubr.bf16.mxu0 %v16374_v44  ;;  %11610 = vmatpush3.bf16.msra.mxu0 %v12761_v25  ;;  %v538_v44 = vld [vmem:[%s13874_s21 + $0x14] sm:$0xf]  ;;  %s10702_s21 = sshll.u32 %s16544_s23, 8 }
 0x209   : > { %11611 = vmatprep.subr.bf16.mxu0 %v12762_v7  ;;  %s16053_s10 = scalar_lea.vmem %s16196_s7, %s10702_s21 }
 0x20c   : > { %11612 = vmatpush3.bf16.msra.mxu0 %v12762_v7 }
 0x20d   : > { %11613 = vmatprep.subr.bf16.mxu0 %v12763_v52 }
 0x20f   : > { %11578 = vmatmul.mubr.bf16.gmra.mrb[8].mxu0 %v16375_v63 }
 0x210   : > { %11581 = vmatprep.mubr.bf16.mxu0 %v13708_v3  ;;  %11614 = vmatpush3.bf16.msra.mxu0 %v12763_v52  ;;  %v3299_v3 = vshrl.u32 %v14038_v13, 16 }
 0x211   : > { %11615 = vmatprep.subr.bf16.mxu0 %v12764_v33 }
 0x214   : > { %11616 = vmatpush3.bf16.msra.mxu0 %v12764_v33 }
 0x215   : > { %11617 = vmatprep.subr.bf16.mxu0 %v12765_v39 }
 0x217   : > { %11582 = vmatmul.mubr.bf16.gmra.mrb[12].mxu0 %v13733_v38  ;;  %v3308_v38 = vshll.u32 %v14041_v21, 16 }
 0x218   : > { %11585 = vmatprep.mubr.bf16.mxu0 %v13744_v30  ;;  %11618 = vmatpush3.bf16.msra.mxu0 %v12765_v39  ;;  %v3301_v30 = vrot.slane %v3299_v3, 4 }
 0x219   : > { %11619 = vmatprep.subr.bf16.mxu0 %v12766_v8  ;;  %v3310_v48 = vrot.slane %v3308_v38, 5 }
 0x21c   : > { %11620 = vmatpush3.bf16.msra.mxu0 %v12766_v8 }
 0x21f   : > { %11586 = vmatmul.mubr.bf16.gmra.mrb[16].mxu0 %v13759_v45  ;;  %v3305_v45 = vor.u32 %v3304_v53, %v3301_v30 }
 0x220   : > { %11589 = vmatprep.mubr.bf16.mxu0 %v13774_v47  ;;  %v3315_v47 = vor.u32 %v3314_v49, %v3310_v48 }
 0x221   : > { %v3306_v63 = vrot.slane %v3305_v45, 4 }
 0x222   : > { %v3316_v42 = vrot.slane %v3315_v47, 4 }
 0x227   : > { %11590 = vmatmul.mubr.bf16.gmra.mrb[20].mxu0 %v13787_v24  ;;  %v3318_v24 = vshll.u32 %v538_v44, 16 }
 0x228   : > { %11593 = vmatprep.mubr.bf16.mxu0 %v13797_v19  ;;  %v3311_v19 = vsel %vm13086_vm2, %v3306_v63, %v3310_v48  ;;  %v4456_v63 = vld [vmem:[#allocation2 + $0xc] sm:$0xf] }
 0x229   : > { %v3320_v18 = vrot.slane %v3318_v24, 5 }
 0x22b   : > { %v3321_v32 = vsel %vm13086_vm2, %v3316_v42, %v3320_v18 }
 0x22c   : > { %v10233_v62 = vcombine.low %v3311_v19, %v3321_v32 }
 0x22f   : > { %11594 = vmatmul.mubr.bf16.gmra.mrb[24].mxu0 %v13815_v1  ;;  %v3607_v1 = vrot.slane %v14041_v21, 5 }
 0x230   : > { %11597 = vmatprep.mubr.bf16.mxu0 %v13829_v36  ;;  %v10242_v36 = vrot.slane %v14038_v13, 9 }
 0x237   : > { %11598 = vmatmul.mubr.bf16.gmra.mrb[28].mxu0 %v13841_v54  ;;  %v3609_v54 = vrot.slane %v3607_v1, 4 }
 0x238   : > { %11601 = vmatprep.mubr.bf16.mxu0 %v13942_v57  ;;  %v14130_v57 = vpop.f32.mrb[0].mxu1 }
 0x23f   : > { %11602 = vmatmul.mubr.bf16.gmra.mrb[32].mxu0 %v10233_v62 }
 0x240   : > { %11621 = vmatprep.mubr.bf16.mxu0 %v16377_v12  ;;  %v14132_v12 = vpop.f32.mrb[1].mxu1 }
 0x247   : > { %11622 = vmatmul.mubr.bf16.vlgmr.msra.gmra.mrb[0].mxu0 %v16378_v28  ;;  %v12772_v28 = vld [vmem:[%s16193_s4 + $0x68] sm:$0xff]  }
 0x248   : > { %11625 = vmatprep.mubr.bf16.mxu0 %v16379_v51  ;;  %v14137_v51 = vpop.f32.mrb[2].mxu1 }
 0x24f   : > { %11626 = vmatmul.mubr.bf16.gmra.mrb[4].mxu0 %v16380_v55  ;;  %v14139_v55 = vpop.f32.mrb[3].mxu1 }
 0x250   : > { %11629 = vmatprep.mubr.bf16.mxu0 %v16381_v29  ;;  %v12773_v29 = vld [vmem:[%s16193_s4 + $0x70] sm:$0xff]  }
 0x257   : > { %11630 = vmatmul.mubr.bf16.gmra.mrb[8].mxu0 %v16382_v40  ;;  %v14144_v40 = vpop.f32.mrb[4].mxu1 }
 0x258   : > { %11633 = vmatprep.mubr.bf16.mxu0 %v16383_v46  ;;  %v14146_v46 = vpop.f32.mrb[5].mxu1 }
 0x259   : > { %v14148_v17 = vpop.f32.mrb[6].mxu1 }
 0x25a   : > { %v14153_v23 = vpop.f32.mrb[7].mxu1 }
 0x25b   : > { %v14155_v43 = vpop.f32.mrb[8].mxu1 }
 0x25f   : > { %11634 = vmatmul.mubr.bf16.gmra.mrb[12].mxu0 %v13631_v2  ;;  %v3610_v2 = vrot.slane %v538_v44, 5 }
 0x260   : > { %11637 = vmatprep.mubr.bf16.mxu0 %v13633_v16 }
 0x267   : > { %11638 = vmatmul.mubr.bf16.gmra.mrb[16].mxu0 %v13643_v26  ;;  %v3608_v26 = vsel %vm13451_vm5, %v10242_v36, %v3607_v1 }
 0x268   : > { %11641 = vmatprep.mubr.bf16.mxu0 %v13677_v11  ;;  %v12767_v11 = vld [vmem:[%s16193_s4 + $0x40] sm:$0xff]  }
 0x269   : > { %11657 = vmatprep.subr.bf16.mxu1 %v12767_v11 }
 0x26a   : > { %11658 = vmatpush3.bf16.msra.mxu1 %v12767_v11 }
 0x26f   : > { %11642 = vmatmul.mubr.bf16.gmra.mrb[20].mxu0 %v13679_v60  ;;  %v3611_v60 = vsel %vm13451_vm5, %v3609_v54, %v3610_v2 }
 0x270   : > { %11645 = vmatprep.mubr.bf16.mxu0 %v13681_v15  ;;  %v10259_v16 = vcombine.low %v3608_v26, %v3611_v60  ;;  %v12768_v15 = vld [vmem:[%s16193_s4 + $0x48] sm:$0xff]  }
 0x271   : > { %11659 = vmatprep.subr.bf16.mxu1 %v12768_v15 }
 0x272   : > { %11660 = vmatpush3.bf16.msra.mxu1 %v12768_v15 }
 0x277   : > { %11646 = vmatmul.mubr.bf16.gmra.mrb[24].mxu0 %v13712_v10  ;;  %v12769_v10 = vld [vmem:[%s16193_s4 + $0x50] sm:$0xff]  }
 0x278   : > { %11649 = vmatprep.mubr.bf16.mxu0 %v13719_v4  ;;  %11661 = vmatprep.subr.bf16.mxu1 %v12769_v10  ;;  %v12770_v4 = vld [vmem:[%s16193_s4 + $0x58] sm:$0xff]  }
 0x279   : > { %11662 = vmatpush3.bf16.msra.mxu1 %v12769_v10  ;;  %v4447_v10 = vld [vmem:[#allocation2] sm:$0xf] }
 0x27a   : > { %11663 = vmatprep.subr.bf16.mxu1 %v12770_v4 }
 0x27d   : > { %11664 = vmatpush3.bf16.msra.mxu1 %v12770_v4 }
 0x27f   : > { %11650 = vmatmul.mubr.bf16.gmra.mrb[28].mxu0 %v13748_v41  ;;  %v12771_v41 = vld [vmem:[%s16193_s4 + $0x60] sm:$0xff]  }
 0x280   : > { %11653 = vmatprep.mubr.bf16.mxu0 %v13993_v35  ;;  %11665 = vmatprep.subr.bf16.mxu1 %v12771_v41  ;;  %v14160_v35 = vpop.f32.mrb[9].mxu1 }
 0x281   : > { %11666 = vmatpush3.bf16.msra.mxu1 %v12771_v41  ;;  %v14162_v5 = vpop.f32.mrb[10].mxu1 }
 0x282   : > { %11667 = vmatprep.subr.bf16.mxu1 %v12772_v28  ;;  %v14164_v37 = vpop.f32.mrb[11].mxu1 }
 0x283   : > { %v14166_v56 = vpop.f32.mrb[12].mxu1 }
 0x284   : > { %v14168_v0 = vpop.f32.mrb[13].mxu1 }
 0x285   : > { %11668 = vmatpush3.bf16.msra.mxu1 %v12772_v28  ;;  %v14170_v27 = vpop.f32.mrb[14].mxu1 }
 0x286   : > { %11669 = vmatprep.subr.bf16.mxu1 %v12773_v29  ;;  %v14172_v61 = vpop.f32.mrb[15].mxu1 }
 0x287   : > { %11654 = vmatmul.mubr.bf16.gmra.mrb[32].mxu0 %v10259_v16  ;;  %v14179_v50 = vpop.f32.mrb[16].mxu1 }
 0x288   : > { %v14193_v60 = vpop.f32.mrb[17].mxu1 }
 0x289   : > { %11670 = vmatpush3.bf16.msra.mxu1 %v12773_v29 }
 0x28a   : > { %11671 = vmatprep.subr.bf16.mxu1 %v12774_v20 }
 0x28d   : > { %11672 = vmatpush3.bf16.msra.mxu1 %v12774_v20 }
 0x28e   : > { %11705 = vmatprep.subr.bf16.mxu1 %v12775_v58 }
 0x31a   : > { %v11623_v13 = vpop.f32.mrb[0].mxu0 }
 0x31b   : > { %v3903_v21 = vadd.f32 %v11623_v13, %v14177_v22  ;;  %v3715_v14 = vpop.f32.mrb[1].mxu0  ;;  %v4460_v13 = vld [vmem:[#allocation2 + $0x14] sm:$0x1] }
 0x31c   : > { %v3901_v34 = vadd.f32 %v14177_v22, %v3715_v14  ;;  %v11624_v25 = vpop.f32.mrb[2].mxu0 }
 0x31d   : > { %v3939_v7 = vmax.f32 %v3903_v21, 0.0  ;;  %v3904_v52 = vadd.f32 %v11624_v25, %v14177_v22  ;;  %v3718_v33 = vpop.f32.mrb[3].mxu0 }
 0x31e   : > { %v3937_v39 = vmax.f32 %v3901_v34, 0.0  ;;  %v3902_v8 = vadd.f32 %v14177_v22, %v3718_v33  ;;  %v14207_v34 = vpop.f32.mrb[18].mxu1  ;;  %v4453_v33 = vld [vmem:[#allocation2 + $0x8] sm:$0x1] }
 0x31f   : > { %v10705_v3 = vpack.c.bf16 %v3939_v7, %v3939_v7  ;;  %v3940_v59 = vmax.f32 %v3904_v52, 0.0 }
 0x320   : > { %v10703_v31 = vpack.c.bf16 %v3937_v39, %v3937_v39  ;;  %v3938_v38 = vmax.f32 %v3902_v8, 0.0  ;;  %v14211_v8 = vpop.f32.mrb[19].mxu1 }
 0x321   : > { %v4102_v30 = vshrl.u32 %v10705_v3, 16  ;;  %v10706_v53 = vpack.c.bf16 %v3940_v59, %v3940_v59  ;;  %v4105_v48 = vshll.u32 %v10705_v3, 16 }
 0x322   : > { %v4085_v49 = vshrl.u32 %v10703_v31, 16  ;;  %v4088_v44 = vshll.u32 %v10703_v31, 16  ;;  %v10704_v45 = vpack.c.bf16 %v3938_v38, %v3938_v38  ;;  %v11627_v47 = vpop.f32.mrb[4].mxu0 }
 0x323   : > { %v4104_v24 = vrot.slane %v4102_v30, 7  ;;  %v4110_v42 = vshrl.u32 %v10706_v53, 16  ;;  %v4113_v18 = vshll.u32 %v10706_v53, 16  ;;  %v3907_v19 = vadd.f32 %v11627_v47, %v14177_v22  ;;  %v3731_v32 = vpop.f32.mrb[5].mxu0 }
 0x324   : > { %v4087_v1 = vrot.slane %v4085_v49, 7  ;;  %v4093_v36 = vshrl.u32 %v10704_v45, 16  ;;  %v4096_v54 = vshll.u32 %v10704_v45, 16  ;;  %v3905_v2 = vadd.f32 %v14177_v22, %v3731_v32  ;;  %v11628_v26 = vpop.f32.mrb[6].mxu0 }
 0x325   : > { %v4107_v16 = vor.u32 %v4105_v48, %v4104_v24  ;;  %v4108_v11 = vrot.slane %v4104_v24, 4  ;;  %v4112_v4 = vrot.slane %v4110_v42, 7  ;;  %v3943_v41 = vmax.f32 %v3907_v19, 0.0  ;;  %v3734_v28 = vpop.f32.mrb[7].mxu0 }
 0x326   : > { %v4090_v29 = vor.u32 %v4088_v44, %v4087_v1  ;;  %v4091_v20 = vrot.slane %v4087_v1, 4  ;;  %v4095_v21 = vrot.slane %v4093_v36, 7  ;;  %v3941_v14 = vmax.f32 %v3905_v2, 0.0  ;;  %v4470_v36 = vld [vmem:[#allocation2 + $0x24] sm:$0xf] }
 0x327   : > { %v4457_v25 = vsel %vm14188_vm11, %v4107_v16, %v4456_v63  ;;  %v4115_v7 = vor.u32 %v4113_v18, %v4112_v4  ;;  %v4117_v52 = vrot.slane %v4112_v4, 4  ;;  %v10709_v39 = vpack.c.bf16 %v3943_v41, %v3943_v41  ;;  %v4463_v41 = vld [vmem:[#allocation2 + $0x18] sm:$0xf] }
 0x328   : > { %4458 = vst [vmem:[#allocation2 + $0xc] sm:$0xf] %v4457_v25  ;;  %v4448_v3 = vsel %vm14188_vm11, %v4090_v29, %v4447_v10  ;;  %v4098_v59 = vor.u32 %v4096_v54, %v4095_v21  ;;  %v4100_v31 = vrot.slane %v4095_v21, 4  ;;  %v10707_v38 = vpack.c.bf16 %v3941_v14, %v3941_v14 }
 0x329   : > { %4449 = vst [vmem:[#allocation2] sm:$0xf] %v4448_v3  ;;  %v4116_v30 = vsel %vm14203_vm13, %v4108_v11, %v4115_v7  ;;  %v4461_v53 = vsel %vm14197_vm12, %v4117_v52, %v4460_v13  ;;  %v4136_v48 = vshrl.u32 %v10709_v39, 16  ;;  %v4139_v45 = vshll.u32 %v10709_v39, 16 }
 0x32a   : > { %4459 = vst [vmem:[#allocation2 + $0x10] sm:$0xf] %v4116_v30  ;;  %4462 = vst [vmem:[#allocation2 + $0x14] sm:$0x1] %v4461_v53  ;;  %v4099_v49 = vsel %vm14203_vm13, %v4091_v20, %v4098_v59  ;;  %v4454_v44 = vsel %vm14197_vm12, %v4100_v31, %v4453_v33  ;;  %v4119_v47 = vshrl.u32 %v10707_v38, 16  ;;  %v11631_v24 = vpop.f32.mrb[8].mxu0  ;;  %v3908_v42 = vadd.f32 %v11628_v26, %v14177_v22 }
 0x32b   : > { %4450 = vst [vmem:[#allocation2 + $0x4] sm:$0xf] %v4099_v49  ;;  %4455 = vst [vmem:[#allocation2 + $0x8] sm:$0x1] %v4454_v44  ;;  %v14223_v63 = vrot.slane %v4136_v48, 7  ;;  %v3906_v18 = vadd.f32 %v14177_v22, %v3734_v28  ;;  %v3911_v19 = vadd.f32 %v11631_v24, %v14177_v22  ;;  %v3747_v32 = vpop.f32.mrb[9].mxu0 }
 0x32c   : > { %v16390_v1 = vmov 0   ;;  %v14229_v54 = vrot.slane %v4119_v47, 7  ;;  %v4122_v2 = vshll.u32 %v10707_v38, 16  ;;  %v3909_v16 = vadd.f32 %v14177_v22, %v3747_v32  ;;  %v11632_v11 = vpop.f32.mrb[10].mxu0 }
 0x32d   : > { %4687 = vst [vmem:[#allocation2 + $0x4] sm:$0xf] %v16390_v1  ;;  %v4141_v10 = vor.u32 %v4139_v45, %v14223_v63  ;;  %v4142_v4 = vrot.slane %v14223_v63, 4  ;;  %v3944_v26 = vmax.f32 %v3908_v42, 0.0  ;;  %v3942_v29 = vmax.f32 %v3906_v18, 0.0  ;;  %v3750_v28 = vpop.f32.mrb[11].mxu0 }
 0x32e   : > { %v4124_v20 = vor.u32 %v4122_v2, %v14229_v54  ;;  %v4125_v13 = vrot.slane %v14229_v54, 4  ;;  %v3947_v21 = vmax.f32 %v3911_v19, 0.0  ;;  %v3945_v14 = vmax.f32 %v3909_v16, 0.0  ;;  %v4474_v63 = vld [vmem:[#allocation2 + $0x2c] sm:$0x1] }
 0x32f   : > { %v4578_v25 = vld [vmem:[#allocation2 + $0xc] sm:$0x1]  ;;  %v4471_v7 = vsel %vm14188_vm11, %v4141_v10, %v4470_v36  ;;  %v10710_v52 = vpack.c.bf16 %v3944_v26, %v3944_v26  ;;  %v10708_v33 = vpack.c.bf16 %v3942_v29, %v3942_v29  ;;  %v3912_v39 = vadd.f32 %v11632_v11, %v14177_v22  ;;  %v4467_v11 = vld [vmem:[#allocation2 + $0x20] sm:$0x1] }
 0x330   : > { %v4579_v3 = vsel %vm14197_vm12, 0, %v4578_v25  ;;  %v4575_v59 = vld [vmem:[#allocation2] sm:$0x1]  ;;  %4472 = vst [vmem:[#allocation2 + $0x24] sm:$0xf] %v4471_v7  ;;  %v4464_v31 = vsel %vm14188_vm11, %v4124_v20, %v4463_v41  ;;  %v10713_v38 = vpack.c.bf16 %v3947_v21, %v3947_v21  ;;  %v10711_v30 = vpack.c.bf16 %v3945_v14, %v3945_v14 }
 0x331   : > { %4580 = vst [vmem:[#allocation2 + $0xc] sm:$0x1] %v4579_v3  ;;  %v4576_v53 = vsel %vm14197_vm12, 0, %v4575_v59  ;;  %v4632_v48 = vld [vmem:[#allocation2 + $0x14] sm:$0xf]  ;;  %v4144_v49 = vshrl.u32 %v10710_v52, 16  ;;  %v3910_v29 = vadd.f32 %v14177_v22, %v3750_v28 }
 0x332   : > { %4465 = vst [vmem:[#allocation2 + $0x18] sm:$0xf] %v4464_v31  ;;  %v4147_v44 = vshll.u32 %v10710_v52, 16  ;;  %v4127_v45 = vshrl.u32 %v10708_v33, 16  ;;  %4577 = vst [vmem:[#allocation2] sm:$0x1] %v4576_v53 }
 0x333   : > { %v4633_v47 = vsel %vm14188_vm11, 0, %v4632_v48  ;;  %v4629_v24 = vld [vmem:[#allocation2 + $0x8] sm:$0xf]  ;;  %v4130_v42 = vshll.u32 %v10708_v33, 16  ;;  %v4170_v18 = vshrl.u32 %v10713_v38, 16  ;;  %v4173_v19 = vshll.u32 %v10713_v38, 16 }
 0x334   : > { %4686 = vst [vmem:[#allocation2] sm:$0xf] %v16390_v1  ;;  %4634 = vst [vmem:[#allocation2 + $0x14] sm:$0xf] %v4633_v47  ;;  %v4630_v32 = vsel %vm14188_vm11, 0, %v4629_v24  ;;  %v4146_v36 = vrot.slane %v4144_v49, 7 }
 0x335   : > { %v4129_v54 = vrot.slane %v4127_v45, 7  ;;  %v4153_v2 = vshrl.u32 %v10711_v30, 16  ;;  %v11635_v16 = vpop.f32.mrb[12].mxu0  ;;  %4631 = vst [vmem:[#allocation2 + $0x8] sm:$0xf] %v4630_v32  ;;  %v14250_v10 = vrot.slane %v4170_v18, 7 }
 0x336   : > { %v4156_v41 = vshll.u32 %v10711_v30, 16  ;;  %v3948_v26 = vmax.f32 %v3912_v39, 0.0  ;;  %v3763_v20 = vpop.f32.mrb[13].mxu0  ;;  %4688 = vst [vmem:[#allocation2 + $0x8] sm:$0xf] %v16390_v1  ;;  %v4149_v21 = vor.u32 %v4147_v44, %v4146_v36  ;;  %v4151_v14 = vrot.slane %v4146_v36, 4 }
 0x337   : > { %v4132_v25 = vor.u32 %v4130_v42, %v4129_v54  ;;  %v4134_v7 = vrot.slane %v4129_v54, 4  ;;  %v4484_v52 = vld [vmem:[#allocation2 + $0x3c] sm:$0xf]  ;;  %v11636_v33 = vpop.f32.mrb[14].mxu0  ;;  %v4175_v3 = vor.u32 %v4173_v19, %v14250_v10  ;;  %v4176_v59 = vrot.slane %v14250_v10, 4 }
 0x338   : > { %v14256_v31 = vrot.slane %v4153_v2, 7  ;;  %v10714_v38 = vpack.c.bf16 %v3948_v26, %v3948_v26  ;;  %v3766_v30 = vpop.f32.mrb[15].mxu0  ;;  %v4584_v39 = vld [vmem:[#allocation2 + $0x24] sm:$0x1]  ;;  %v4150_v28 = vsel %vm14203_vm13, %v4142_v4, %v4149_v21  ;;  %v4475_v53 = vsel %vm14197_vm12, %v4151_v14, %v4474_v63  ;;  %v4477_v44 = vld [vmem:[#allocation2 + $0x30] sm:$0xf] }
 0x339   : > { %v4133_v48 = vsel %vm14203_vm13, %v4125_v13, %v4132_v25  ;;  %v4468_v49 = vsel %vm14197_vm12, %v4134_v7, %v4467_v11  ;;  %v4585_v45 = vsel %vm14197_vm12, 0, %v4584_v39  ;;  %v4581_v47 = vld [vmem:[#allocation2 + $0x18] sm:$0x1]  ;;  %4473 = vst [vmem:[#allocation2 + $0x28] sm:$0xf] %v4150_v28  ;;  %v4485_v4 = vsel %vm14188_vm11, %v4175_v3, %v4484_v52 }
 0x33a   : > { %4476 = vst [vmem:[#allocation2 + $0x2c] sm:$0x1] %v4475_v53  ;;  %4466 = vst [vmem:[#allocation2 + $0x1c] sm:$0xf] %v4133_v48  ;;  %v4158_v24 = vor.u32 %v4156_v41, %v14256_v31  ;;  %v4159_v63 = vrot.slane %v14256_v31, 4  ;;  %v4582_v13 = vsel %vm14197_vm12, 0, %v4581_v47  ;;  %v3915_v36 = vadd.f32 %v11635_v16, %v14177_v22 }
 0x33b   : > { %4469 = vst [vmem:[#allocation2 + $0x20] sm:$0x1] %v4468_v49  ;;  %4586 = vst [vmem:[#allocation2 + $0x24] sm:$0x1] %v4585_v45  ;;  %v4178_v42 = vshrl.u32 %v10714_v38, 16  ;;  %v4181_v18 = vshll.u32 %v10714_v38, 16  ;;  %v3913_v54 = vadd.f32 %v14177_v22, %v3763_v20  ;;  %v3916_v2 = vadd.f32 %v11636_v33, %v14177_v22 }
 0x33c   : > { %4486 = vst [vmem:[#allocation2 + $0x3c] sm:$0xf] %v4485_v4  ;;  %v3946_v19 = vmax.f32 %v3910_v29, 0.0  ;;  %4583 = vst [vmem:[#allocation2 + $0x18] sm:$0x1] %v4582_v13  ;;  %v4478_v32 = vsel %vm14188_vm11, %v4158_v24, %v4477_v44  ;;  %v11639_v11 = vpop.f32.mrb[16].mxu0  ;;  %v3914_v26 = vadd.f32 %v14177_v22, %v3766_v30 }
 0x33d   : > { %4479 = vst [vmem:[#allocation2 + $0x30] sm:$0xf] %v4478_v32  ;;  %v4180_v10 = vrot.slane %v4178_v42, 7  ;;  %v12105_v21 = vadd.f32 %v11639_v11, %v14130_v57  ;;  %v3779_v14 = vpop.f32.mrb[17].mxu0  ;;  %v4488_v29 = vld [vmem:[#allocation2 + $0x44] sm:$0x1] }
 0x33e   : > { %v10712_v41 = vpack.c.bf16 %v3946_v19, %v3946_v19  ;;  %v3951_v25 = vmax.f32 %v3915_v36, 0.0  ;;  %v3949_v7 = vmax.f32 %v3913_v54, 0.0  ;;  %v3952_v52 = vmax.f32 %v3916_v2, 0.0  ;;  %v14282_v16 = vpop.f32.mrb[18].mxu0  ;;  %v4481_v28 = vld [vmem:[#allocation2 + $0x38] sm:$0x1] }
 0x33f   : > { %v12106_v3 = vadd.f32 %v3779_v14, %v14132_v12  ;;  %v4183_v20 = vor.u32 %v4181_v18, %v4180_v10  ;;  %v4185_v31 = vrot.slane %v4180_v10, 4  ;;  %v14284_v39 = vpop.f32.mrb[19].mxu0  ;;  %v3950_v57 = vmax.f32 %v3914_v26, 0.0 }
 0x340   : > { %v4161_v33 = vshrl.u32 %v10712_v41, 16  ;;  %v4164_v38 = vshll.u32 %v10712_v41, 16  ;;  %v10717_v53 = vpack.c.bf16 %v3951_v25, %v3951_v25  ;;  %v10715_v30 = vpack.c.bf16 %v3949_v7, %v3949_v7  ;;  %v4498_v25 = vld [vmem:[#allocation2 + $0x54] sm:$0xf] }
 0x341   : > { %v10718_v48 = vpack.c.bf16 %v3952_v52, %v3952_v52  ;;  %v4638_v49 = vld [vmem:[#allocation2 + $0x2c] sm:$0xf]  ;;  %v4184_v45 = vsel %vm14203_vm13, %v4176_v59, %v4183_v20  ;;  %v4489_v12 = vsel %vm14197_vm12, %v4185_v31, %v4488_v29  ;;  %v3919_v4 = vadd.f32 %v12105_v21, %v14177_v22 }
 0x342   : > { %v4635_v44 = vld [vmem:[#allocation2 + $0x20] sm:$0xf]  ;;  %v4163_v47 = vrot.slane %v4161_v33, 7  ;;  %v4639_v24 = vsel %vm14188_vm11, 0, %v4638_v49  ;;  %4487 = vst [vmem:[#allocation2 + $0x40] sm:$0xf] %v4184_v45 }
 0x343   : > { %v4636_v13 = vsel %vm14188_vm11, 0, %v4635_v44  ;;  %v4590_v42 = vld [vmem:[#allocation2 + $0x3c] sm:$0x1]  ;;  %4490 = vst [vmem:[#allocation2 + $0x44] sm:$0x1] %v4489_v12  ;;  %v4204_v18 = vshrl.u32 %v10717_v53, 16 }
 0x344   : > { %v4207_v19 = vshll.u32 %v10717_v53, 16  ;;  %4640 = vst [vmem:[#allocation2 + $0x2c] sm:$0xf] %v4639_v24  ;;  %4637 = vst [vmem:[#allocation2 + $0x20] sm:$0xf] %v4636_v13  ;;  %v4591_v59 = vsel %vm14197_vm12, 0, %v4590_v42  ;;  %v4166_v32 = vor.u32 %v4164_v38, %v4163_v47  ;;  %v10716_v53 = vpack.c.bf16 %v3950_v57, %v3950_v57 }
 0x345   : > { %v4168_v36 = vrot.slane %v4163_v47, 4  ;;  %v4187_v54 = vshrl.u32 %v10715_v30, 16  ;;  %4592 = vst [vmem:[#allocation2 + $0x3c] sm:$0x1] %v4591_v59  ;;  %v4587_v2 = vld [vmem:[#allocation2 + $0x30] sm:$0x1] }
 0x346   : > { %v4206_v11 = vrot.slane %v4204_v18, 7  ;;  %v4190_v10 = vshll.u32 %v10715_v30, 16  ;;  %v4212_v41 = vshrl.u32 %v10718_v48, 16  ;;  %v4215_v26 = vshll.u32 %v10718_v48, 16  ;;  %v11643_v52 = vpop.f32.mrb[20].mxu0 }
 0x347   : > { %v4588_v21 = vsel %vm14197_vm12, 0, %v4587_v2  ;;  %v4167_v14 = vsel %vm14203_vm13, %v4159_v63, %v4166_v32  ;;  %v4482_v29 = vsel %vm14197_vm12, %v4168_v36, %v4481_v28  ;;  %v4189_v7 = vrot.slane %v4187_v54, 7  ;;  %v4491_v33 = vld [vmem:[#allocation2 + $0x48] sm:$0xf]  ;;  %v3795_v30 = vpop.f32.mrb[21].mxu0 }
 0x348   : > { %4589 = vst [vmem:[#allocation2 + $0x30] sm:$0x1] %v4588_v21  ;;  %4480 = vst [vmem:[#allocation2 + $0x34] sm:$0xf] %v4167_v14  ;;  %v4209_v20 = vor.u32 %v4207_v19, %v4206_v11  ;;  %v4210_v31 = vrot.slane %v4206_v11, 4  ;;  %v4214_v38 = vrot.slane %v4212_v41, 7  ;;  %v3917_v63 = vadd.f32 %v12106_v3, %v14177_v22 }
 0x349   : > { %4483 = vst [vmem:[#allocation2 + $0x38] sm:$0x1] %v4482_v29  ;;  %v4192_v48 = vor.u32 %v4190_v10, %v4189_v7  ;;  %v4193_v49 = vrot.slane %v4189_v7, 4  ;;  %v4502_v44 = vld [vmem:[#allocation2 + $0x5c] sm:$0x1]  ;;  %v3955_v45 = vmax.f32 %v3919_v4, 0.0  ;;  %v12108_v29 = vadd.f32 %v14284_v39, %v14139_v55 }
 0x34a   : > { %v11644_v12 = vpop.f32.mrb[22].mxu0  ;;  %v4499_v28 = vsel %vm14188_vm11, %v4209_v20, %v4498_v25  ;;  %v4217_v47 = vor.u32 %v4215_v26, %v4214_v38  ;;  %v4219_v24 = vrot.slane %v4214_v38, 4  ;;  %v4195_v13 = vshrl.u32 %v10716_v53, 16  ;;  %v4644_v18 = vld [vmem:[#allocation2 + $0x44] sm:$0xf] }
 0x34b   : > { %v14306_v42 = vpop.f32.mrb[23].mxu0  ;;  %4500 = vst [vmem:[#allocation2 + $0x54] sm:$0xf] %v4499_v28  ;;  %v4492_v57 = vsel %vm14188_vm11, %v4192_v48, %v4491_v33  ;;  %v4198_v19 = vshll.u32 %v10716_v53, 16  ;;  %v10721_v59 = vpack.c.bf16 %v3955_v45, %v3955_v45  ;;  %v3953_v32 = vmax.f32 %v3917_v63, 0.0 }
 0x34c   : > { %v4645_v3 = vsel %vm14188_vm11, 0, %v4644_v18  ;;  %4493 = vst [vmem:[#allocation2 + $0x48] sm:$0xf] %v4492_v57  ;;  %v4218_v4 = vsel %vm14203_vm13, %v4210_v31, %v4217_v47  ;;  %v4503_v36 = vsel %vm14197_vm12, %v4219_v24, %v4502_v44  ;;  %v4197_v54 = vrot.slane %v4195_v13, 7  ;;  %v4495_v2 = vld [vmem:[#allocation2 + $0x50] sm:$0x1] }
 0x34d   : > { %4646 = vst [vmem:[#allocation2 + $0x44] sm:$0xf] %v4645_v3  ;;  %4501 = vst [vmem:[#allocation2 + $0x58] sm:$0xf] %v4218_v4  ;;  %v4238_v11 = vshrl.u32 %v10721_v59, 16  ;;  %v4241_v10 = vshll.u32 %v10721_v59, 16  ;;  %v10719_v41 = vpack.c.bf16 %v3953_v32, %v3953_v32  ;;  %v12107_v26 = vadd.f32 %v14282_v16, %v14137_v51 }
 0x34e   : > { %4504 = vst [vmem:[#allocation2 + $0x5c] sm:$0x1] %v4503_v36  ;;  %v4200_v21 = vor.u32 %v4198_v19, %v4197_v54  ;;  %v4202_v14 = vrot.slane %v4197_v54, 4  ;;  %v12109_v25 = vadd.f32 %v11643_v52, %v14144_v40  ;;  %v14321_v7 = vpop.f32.mrb[24].mxu0  ;;  %v4512_v40 = vld [vmem:[#allocation2 + $0x6c] sm:$0xf]  ;;  %v3918_v52 = vadd.f32 %v12108_v29, %v14177_v22 }
 0x34f   : > { %v14323_v31 = vrot.slane %v4238_v11, 7  ;;  %v4221_v33 = vshrl.u32 %v10719_v41, 16  ;;  %v4224_v38 = vshll.u32 %v10719_v41, 16  ;;  %v3920_v53 = vadd.f32 %v12107_v26, %v14177_v22  ;;  %v14326_v48 = vpop.f32.mrb[25].mxu0  ;;  %v4505_v39 = vld [vmem:[#allocation2 + $0x60] sm:$0xf] }
 0x350   : > { %v4641_v20 = vld [vmem:[#allocation2 + $0x38] sm:$0xf]  ;;  %v4201_v16 = vsel %vm14203_vm13, %v4193_v49, %v4200_v21  ;;  %v4496_v55 = vsel %vm14197_vm12, %v4202_v14, %v4495_v2  ;;  %v14335_v44 = vpop.f32.mrb[26].mxu0  ;;  %v3954_v13 = vmax.f32 %v3918_v52, 0.0  ;;  %v3923_v18 = vadd.f32 %v12109_v25, %v14177_v22  ;;  %v14360_v26 = vld [vmem:[#allocation2] sm:$0xf] }
 0x351   : > { %v4642_v51 = vsel %vm14188_vm11, 0, %v4641_v20  ;;  %4494 = vst [vmem:[#allocation2 + $0x4c] sm:$0xf] %v4201_v16  ;;  %4497 = vst [vmem:[#allocation2 + $0x50] sm:$0x1] %v4496_v55  ;;  %v4243_v45 = vor.u32 %v4241_v10, %v14323_v31  ;;  %v4244_v63 = vrot.slane %v14323_v31, 4  ;;  %v12110_v57 = vadd.f32 %v3795_v30, %v14146_v46 }
 0x352   : > { %4643 = vst [vmem:[#allocation2 + $0x38] sm:$0xf] %v4642_v51  ;;  %v14339_v28 = vrot.slane %v4221_v33, 7  ;;  %v3956_v47 = vmax.f32 %v3920_v53, 0.0  ;;  %v14341_v49 = vpop.f32.mrb[27].mxu0  ;;  %v12111_v19 = vadd.f32 %v11644_v12, %v14148_v17  ;;  %v10720_v30 = vpack.c.bf16 %v3954_v13, %v3954_v13 }
 0x353   : > { %v4596_v24 = vld [vmem:[#allocation2 + $0x54] sm:$0x1]  ;;  %v4593_v32 = vld [vmem:[#allocation2 + $0x48] sm:$0x1]  ;;  %v4513_v3 = vsel %vm14188_vm11, %v4243_v45, %v4512_v40  ;;  %v3959_v17 = vmax.f32 %v3923_v18, 0.0  ;;  %v3921_v10 = vadd.f32 %v12110_v57, %v14177_v22  ;;  %v14362_v20 = vpop.f32.mrb[28].mxu0  ;;  %v12112_v16 = vadd.f32 %v14306_v42, %v14153_v23 }
 0x354   : > { %v4597_v59 = vsel %vm14197_vm12, 0, %v4596_v24  ;;  %v4226_v4 = vor.u32 %v4224_v38, %v14339_v28  ;;  %v4227_v36 = vrot.slane %v14339_v28, 4  ;;  %v4594_v54 = vsel %vm14197_vm12, 0, %v4593_v32  ;;  %4514 = vst [vmem:[#allocation2 + $0x6c] sm:$0xf] %v4513_v3  ;;  %v14366_v55 = vpop.f32.mrb[29].mxu0 }
 0x355   : > { %4598 = vst [vmem:[#allocation2 + $0x54] sm:$0x1] %v4597_v59  ;;  %v4650_v2 = vld [vmem:[#allocation2 + $0x5c] sm:$0xf]  ;;  %v10722_v46 = vpack.c.bf16 %v3956_v47, %v3956_v47  ;;  %4595 = vst [vmem:[#allocation2 + $0x48] sm:$0x1] %v4594_v54  ;;  %v3924_v41 = vadd.f32 %v12111_v19, %v14177_v22  ;;  %v10725_v38 = vpack.c.bf16 %v3959_v17, %v3959_v17 }
 0x356   : > { %v4651_v12 = vsel %vm14188_vm11, 0, %v4650_v2  ;;  %v4506_v11 = vsel %vm14188_vm11, %v4226_v4, %v4505_v39  ;;  %v4229_v29 = vshrl.u32 %v10720_v30, 16  ;;  %v4232_v25 = vshll.u32 %v10720_v30, 16  ;;  %v4516_v33 = vld [vmem:[#allocation2 + $0x74] sm:$0x1]  ;;  %v14372_v19 = vpop.f32.mrb[30].mxu0 }
 0x357   : > { %4652 = vst [vmem:[#allocation2 + $0x5c] sm:$0xf] %v4651_v12  ;;  %4507 = vst [vmem:[#allocation2 + $0x60] sm:$0xf] %v4506_v11  ;;  %v4246_v21 = vshrl.u32 %v10722_v46, 16  ;;  %v4249_v14 = vshll.u32 %v10722_v46, 16 }
 0x358   : > { %v3957_v53 = vmax.f32 %v3921_v10, 0.0  ;;  %v3960_v51 = vmax.f32 %v3924_v41, 0.0  ;;  %v4647_v40 = vld [vmem:[#allocation2 + $0x50] sm:$0xf]  ;;  %v4231_v52 = vrot.slane %v4229_v29, 7  ;;  %v4758_v45 = vshrl.u32 %v14360_v26, 16 }
 0x359   : > { %v4248_v39 = vrot.slane %v4246_v21, 7  ;;  %v4761_v28 = vshll.u32 %v14360_v26, 16  ;;  %v4648_v47 = vsel %vm14188_vm11, 0, %v4647_v40  ;;  %v4509_v24 = vld [vmem:[#allocation2 + $0x68] sm:$0x1]  ;;  %v4272_v13 = vshrl.u32 %v10725_v38, 16 }
 0x35a   : > { %v4275_v18 = vshll.u32 %v10725_v38, 16  ;;  %v10723_v57 = vpack.c.bf16 %v3957_v53, %v3957_v53  ;;  %4649 = vst [vmem:[#allocation2 + $0x50] sm:$0xf] %v4648_v47  ;;  %v4234_v59 = vor.u32 %v4232_v25, %v4231_v52  ;;  %v4236_v32 = vrot.slane %v4231_v52, 4  ;;  %v4526_v3 = vld [vmem:[#allocation2 + $0x84] sm:$0xf] }
 0x35b   : > { %v4251_v23 = vor.u32 %v4249_v14, %v4248_v39  ;;  %v4253_v42 = vrot.slane %v4248_v39, 4  ;;  %v14374_v4 = vpop.f32.mrb[31].mxu0  ;;  %v4602_v54 = vld [vmem:[#allocation2 + $0x6c] sm:$0x1]  ;;  %v4274_v2 = vrot.slane %v4272_v13, 7  ;;  %v10726_v17 = vpack.c.bf16 %v3960_v51, %v3960_v51 }
 0x35c   : > { %v4255_v46 = vshrl.u32 %v10723_v57, 16  ;;  %v4258_v30 = vshll.u32 %v10723_v57, 16  ;;  %v4603_v12 = vsel %vm14197_vm12, 0, %v4602_v54  ;;  %v4235_v41 = vsel %vm14203_vm13, %v4227_v36, %v4234_v59  ;;  %v4519_v26 = vld [vmem:[#allocation2 + $0x78] sm:$0xf]  ;;  %v14393_v39 = vpop.f32.mrb[32].mxu0 }
 0x35d   : > { %v4252_v11 = vsel %vm14203_vm13, %v4244_v63, %v4251_v23  ;;  %v4517_v10 = vsel %vm14197_vm12, %v4253_v42, %v4516_v33  ;;  %v4694_v21 = vld [vmem:[#allocation2 + $0x4] sm:$0xf]  ;;  %4604 = vst [vmem:[#allocation2 + $0x6c] sm:$0x1] %v4603_v12  ;;  %4508 = vst [vmem:[#allocation2 + $0x64] sm:$0xf] %v4235_v41  ;;  %v4510_v29 = vsel %vm14197_vm12, %v4236_v32, %v4509_v24 }
 0x35e   : > { %v4599_v14 = vld [vmem:[#allocation2 + $0x60] sm:$0x1]  ;;  %4515 = vst [vmem:[#allocation2 + $0x70] sm:$0xf] %v4252_v11  ;;  %4518 = vst [vmem:[#allocation2 + $0x74] sm:$0x1] %v4517_v10  ;;  %v4277_v31 = vor.u32 %v4275_v18, %v4274_v2  ;;  %v3922_v51 = vadd.f32 %v12112_v16, %v14177_v22 }
 0x35f   : > { %v4278_v25 = vrot.slane %v4274_v2, 4  ;;  %v14388_v38 = vrot.slane %v4255_v46, 7  ;;  %v4695_v63 = vld [vmem:[#allocation2 + $0xc] sm:$0xf]  ;;  %v4600_v33 = vsel %vm14197_vm12, 0, %v4599_v14  ;;  %v4280_v36 = vshrl.u32 %v10726_v17, 16 }
 0x360   : > { %4511 = vst [vmem:[#allocation2 + $0x68] sm:$0x1] %v4510_v29  ;;  %v4283_v53 = vshll.u32 %v10726_v17, 16  ;;  %v4741_v40 = vld [vmem:[#allocation2 + $0x8] sm:$0x1]  ;;  %v4527_v52 = vsel %vm14188_vm11, %v4277_v31, %v4526_v3  ;;  %v4760_v13 = vrot.slane %v4758_v45, 4 }
 0x361   : > { %4601 = vst [vmem:[#allocation2 + $0x60] sm:$0x1] %v4600_v33  ;;  %v4260_v47 = vor.u32 %v4258_v30, %v14388_v38  ;;  %v4261_v24 = vrot.slane %v14388_v38, 4  ;;  %v14399_v18 = vpop.f32.mrb[33].mxu0  ;;  %4528 = vst [vmem:[#allocation2 + $0x84] sm:$0xf] %v4527_v52  ;;  %v12115_v38 = vadd.f32 %v14335_v44, %v14162_v5 }
 0x362   : > { %v4282_v57 = vrot.slane %v4280_v36, 7  ;;  %v3958_v23 = vmax.f32 %v3922_v51, 0.0  ;;  %v4763_v42 = vrot.slane %v4761_v28, 5  ;;  %v4767_v59 = vshll.u32 %v4694_v21, 16  ;;  %v14401_v16 = vpop.f32.mrb[34].mxu0 }
 0x363   : > { %v4520_v32 = vsel %vm14188_vm11, %v4260_v47, %v4519_v26  ;;  %v4530_v54 = vld [vmem:[#allocation2 + $0x8c] sm:$0x1]  ;;  %v4771_v2 = vshrl.u32 %v4694_v21, 16  ;;  %v4777_v3 = vshll.u32 %v4741_v40, 16  ;;  %v4782_v46 = vshrl.u32 %v4695_v63, 16  ;;  %v14405_v30 = vpop.f32.mrb[35].mxu0 }
 0x364   : > { %4521 = vst [vmem:[#allocation2 + $0x78] sm:$0xf] %v4520_v32  ;;  %v4285_v45 = vor.u32 %v4283_v53, %v4282_v57  ;;  %v4287_v17 = vrot.slane %v4282_v57, 4  ;;  %v10724_v12 = vpack.c.bf16 %v3958_v23, %v3958_v23  ;;  %v4764_v11 = vor.u32 %v4763_v42, %v4760_v13  ;;  %v4696_v10 = vld [vmem:[#allocation2 + $0x10] sm:$0xf] }
 0x365   : > { %v4769_v41 = vrot.slane %v4767_v59, 5  ;;  %v4773_v28 = vrot.slane %v4771_v2, 4  ;;  %v4779_v14 = vrot.slane %v4777_v3, 5  ;;  %v4784_v29 = vrot.slane %v4782_v46, 4  ;;  %v4656_v31 = vld [vmem:[#allocation2 + $0x74] sm:$0xf] }
 0x366   : > { %v4286_v26 = vsel %vm14203_vm13, %v4278_v25, %v4285_v45  ;;  %v4531_v21 = vsel %vm14197_vm12, %v4287_v17, %v4530_v54  ;;  %v4263_v33 = vshrl.u32 %v10724_v12, 16  ;;  %v4266_v36 = vshll.u32 %v10724_v12, 16  ;;  %v4742_v51 = vld [vmem:[#allocation2 + $0x14] sm:$0x1]  ;;  %v4523_v23 = vld [vmem:[#allocation2 + $0x80] sm:$0x1] }
 0x367   : > { %v4657_v53 = vsel %vm14188_vm11, 0, %v4656_v31  ;;  %v4653_v40 = vld [vmem:[#allocation2 + $0x68] sm:$0xf]  ;;  %4529 = vst [vmem:[#allocation2 + $0x88] sm:$0xf] %v4286_v26  ;;  %v4765_v52 = vrot.slane %v4764_v11, 4  ;;  %v4774_v47 = vor.u32 %v4773_v28, %v4769_v41  ;;  %v3928_v5 = vadd.f32 %v12115_v38, %v14177_v22 }
 0x368   : > { %4532 = vst [vmem:[#allocation2 + $0x8c] sm:$0x1] %v4531_v21  ;;  %v4785_v13 = vshll.u32 %v4695_v63, 16  ;;  %4658 = vst [vmem:[#allocation2 + $0x74] sm:$0xf] %v4657_v53  ;;  %v4654_v57 = vsel %vm14188_vm11, 0, %v4653_v40  ;;  %v12113_v53 = vadd.f32 %v14321_v7, %v14155_v43  ;;  %v12114_v40 = vadd.f32 %v14326_v48, %v14160_v35 }
 0x369   : > { %v4265_v25 = vrot.slane %v4263_v33, 7  ;;  %v4791_v42 = vshll.u32 %v4696_v10, 16  ;;  %v4795_v59 = vshrl.u32 %v4696_v10, 16  ;;  %4655 = vst [vmem:[#allocation2 + $0x68] sm:$0xf] %v4654_v57  ;;  %v4770_v54 = vsel %vm13086_vm2, %v4765_v52, %v4769_v41 }
 0x36a   : > { %v4608_v32 = vld [vmem:[#allocation2 + $0x84] sm:$0x1]  ;;  %v4775_v2 = vrot.slane %v4774_v47, 4  ;;  %v4787_v3 = vrot.slane %v4785_v13, 5  ;;  %v4801_v46 = vshll.u32 %v4742_v51, 16  ;;  %v3927_v35 = vadd.f32 %v12113_v53, %v14177_v22 }
 0x36b   : > { %v4609_v45 = vsel %vm14197_vm12, 0, %v4608_v32  ;;  %v4268_v63 = vor.u32 %v4266_v36, %v4265_v25  ;;  %v4270_v17 = vrot.slane %v4265_v25, 4  ;;  %v4793_v12 = vrot.slane %v4791_v42, 5  ;;  %v4605_v11 = vld [vmem:[#allocation2 + $0x78] sm:$0x1] }
 0x36c   : > { %4610 = vst [vmem:[#allocation2 + $0x84] sm:$0x1] %v4609_v45  ;;  %v4780_v28 = vsel %vm13086_vm2, %v4775_v2, %v4779_v14  ;;  %v4788_v10 = vor.u32 %v4787_v3, %v4784_v29  ;;  %v4797_v31 = vrot.slane %v4795_v59, 4  ;;  %v4803_v26 = vrot.slane %v4801_v46, 5  ;;  %v4697_v21 = vld [vmem:[#allocation2 + $0x18] sm:$0xf] }
 0x36d   : > { %v4606_v41 = vsel %vm14197_vm12, 0, %v4605_v11  ;;  %v4269_v33 = vsel %vm14203_vm13, %v4261_v24, %v4268_v63  ;;  %v4524_v36 = vsel %vm14197_vm12, %v4270_v17, %v4523_v23  ;;  %v10321_v51 = vcombine.low %v4770_v54, %v4780_v28  ;;  %v4698_v47 = vld [vmem:[#allocation2 + $0x1c] sm:$0xf]  ;;  %v12776_v45 = vld [vmem:[%s16193_s4 + $0x8] sm:$0xff]  }
 0x36e   : > { %4607 = vst [vmem:[#allocation2 + $0x78] sm:$0x1] %v4606_v41  ;;  %4522 = vst [vmem:[#allocation2 + $0x7c] sm:$0xf] %v4269_v33  ;;  %v4789_v14 = vrot.slane %v4788_v10, 4  ;;  %v4798_v29 = vor.u32 %v4797_v31, %v4793_v12  ;;  %v12116_v24 = vadd.f32 %v14341_v49, %v14164_v37  ;;  %v4806_v13 = vshrl.u32 %v4697_v21, 16 }
 0x36f   : > { %4525 = vst [vmem:[#allocation2 + $0x80] sm:$0x1] %v4524_v36  ;;  %v4662_v52 = vld [vmem:[#allocation2 + $0x8c] sm:$0xf]  ;;  %11673 = vmatprep.mubr.bf16.mxu1 %v10321_v51  ;;  %v4809_v57 = vshll.u32 %v4697_v21, 16  ;;  %v3925_v48 = vadd.f32 %v12114_v40, %v14177_v22  ;;  %v3963_v42 = vmax.f32 %v3927_v35, 0.0 }
 0x370   : > { %v4663_v25 = vsel %vm14188_vm11, 0, %v4662_v52  ;;  %v4794_v43 = vsel %vm13086_vm2, %v4789_v14, %v4793_v12  ;;  %v4799_v7 = vrot.slane %v4798_v29, 4  ;;  %v3926_v44 = vadd.f32 %v12116_v24, %v14177_v22  ;;  %v4743_v37 = vld [vmem:[#allocation2 + $0x20] sm:$0x1]  ;;  %v12777_v21 = vld [vmem:[%s16193_s4 + $0x10] sm:$0xff]  }
 0x371   : > { %4664 = vst [vmem:[#allocation2 + $0x8c] sm:$0xf] %v4663_v25  ;;  %v4808_v49 = vrot.slane %v4806_v13, 4  ;;  %v4811_v59 = vrot.slane %v4809_v57, 5  ;;  %v4815_v32 = vshll.u32 %v4698_v47, 16  ;;  %v3961_v2 = vmax.f32 %v3925_v48, 0.0 }
 0x372   : > { %v4804_v23 = vsel %vm13086_vm2, %v4799_v7, %v4803_v26  ;;  %v3964_v3 = vmax.f32 %v3928_v5, 0.0  ;;  %v3962_v46 = vmax.f32 %v3926_v44, 0.0  ;;  %v10729_v63 = vpack.c.bf16 %v3963_v42, %v3963_v42  ;;  %v12887_v33 = vld [vmem:[%s16193_s4] sm:$0xff]   ;;  %v4540_v53 = vld [vmem:[#allocation2 + $0x9c] sm:$0xf] }
 0x373   : > { %v10322_v54 = vcombine.low %v4794_v43, %v4804_v23  ;;  %v4812_v17 = vor.u32 %v4811_v59, %v4808_v49  ;;  %v14450_v12 = vrot.slane %v4815_v32, 5  ;;  %v4819_v22 = vshrl.u32 %v4698_v47, 16  ;;  %v4699_v29 = vld [vmem:[#allocation2 + $0x24] sm:$0xf]  ;;  %v4533_v13 = vld [vmem:[#allocation2 + $0x90] sm:$0xf] }
 0x374   : > { %v10727_v28 = vpack.c.bf16 %v3961_v2, %v3961_v2  ;;  %v10730_v10 = vpack.c.bf16 %v3964_v3, %v3964_v3  ;;  %v10728_v31 = vpack.c.bf16 %v3962_v46, %v3962_v46  ;;  %v4825_v26 = vshll.u32 %v4743_v37, 16  ;;  %v4544_v57 = vld [vmem:[#allocation2 + $0xa4] sm:$0x1]  ;;  %v4537_v5 = vld [vmem:[#allocation2 + $0x98] sm:$0x1] }
 0x375   : > { %11674 = vmatmul.mubr.bf16.vlgmr.msra.gmra.mrb[20].mxu1 %v10322_v54  ;;  %v4306_v36 = vshrl.u32 %v10729_v63, 16  ;;  %v4309_v51 = vshll.u32 %v10729_v63, 16  ;;  %v14460_v14 = vrot.slane %v4812_v17, 4  ;;  %v4821_v44 = vrot.slane %v4819_v22, 4  ;;  %v12778_v32 = vld [vmem:[%s16193_s4 + $0x18] sm:$0xff]  }
 0x376   : > { %v4659_v11 = vld [vmem:[#allocation2 + $0x80] sm:$0xf]  ;;  %11706 = vmatpush3.bf16.msra.mxu1 %v12887_v33  ;;  %v4289_v40 = vshrl.u32 %v10727_v28, 16  ;;  %v4292_v52 = vshll.u32 %v10727_v28, 16  ;;  %v4314_v38 = vshrl.u32 %v10730_v10, 16  ;;  %v4317_v24 = vshll.u32 %v10730_v10, 16 }
 0x377   : > { %v4660_v41 = vsel %vm14188_vm11, 0, %v4659_v11  ;;  %11707 = vmatprep.subr.bf16.mxu1 %v12776_v45  ;;  %v4308_v47 = vrot.slane %v4306_v36, 7  ;;  %v4297_v25 = vshrl.u32 %v10728_v31, 16  ;;  %v4300_v43 = vshll.u32 %v10728_v31, 16  ;;  %v4700_v63 = vld [vmem:[#allocation2 + $0x28] sm:$0xf] }
 0x378   : > { %4661 = vst [vmem:[#allocation2 + $0x80] sm:$0xf] %v4660_v41  ;;  %v4818_v7 = vsel %vm13086_vm2, %v14460_v14, %v14450_v12  ;;  %v4291_v35 = vrot.slane %v4289_v40, 7  ;;  %v4316_v48 = vrot.slane %v4314_v38, 7  ;;  %v4827_v37 = vrot.slane %v4825_v26, 5  ;;  %v12779_v38 = vld [vmem:[%s16193_s4 + $0x20] sm:$0xff]  }
 0x379   : > { %v4311_v49 = vor.u32 %v4309_v51, %v4308_v47  ;;  %v4312_v23 = vrot.slane %v4308_v47, 4  ;;  %v4299_v42 = vrot.slane %v4297_v25, 7  ;;  %v4830_v59 = vshrl.u32 %v4699_v29, 16  ;;  %v4744_v10 = vld [vmem:[#allocation2 + $0x2c] sm:$0x1] }
 0x37a   : > { %11708 = vmatpush3.bf16.msra.mxu1 %v12776_v45  ;;  %v4294_v54 = vor.u32 %v4292_v52, %v4291_v35  ;;  %v4295_v2 = vrot.slane %v4291_v35, 4  ;;  %v4319_v3 = vor.u32 %v4317_v24, %v4316_v48  ;;  %v4321_v46 = vrot.slane %v4316_v48, 4  ;;  %v14498_v35 = vld [vmem:[%s16194_s5] ss:$0 sm:$0xff] }
 0x37b   : > { %11709 = vmatprep.subr.bf16.mxu1 %v12777_v21  ;;  %v4541_v17 = vsel %vm14188_vm11, %v4311_v49, %v4540_v53  ;;  %v4302_v22 = vor.u32 %v4300_v43, %v4299_v42  ;;  %v4304_v11 = vrot.slane %v4299_v42, 4  ;;  %v4822_v28 = vor.u32 %v4821_v44, %v14450_v12  ;;  %v12780_v44 = vld [vmem:[%s16193_s4 + $0x28] sm:$0xff]  }
 0x37c   : > { %4542 = vst [vmem:[#allocation2 + $0x9c] sm:$0xf] %v4541_v17  ;;  %v4534_v45 = vsel %vm14188_vm11, %v4294_v54, %v4533_v13  ;;  %v4320_v31 = vsel %vm14203_vm13, %v4312_v23, %v4319_v3  ;;  %v4545_v26 = vsel %vm14197_vm12, %v4321_v46, %v4544_v57  ;;  %v4832_v41 = vrot.slane %v4830_v59, 4  ;;  %v14493_v13 = vld [vmem:[#allocation2 + $0x30] sm:$0xf] }
 0x37d   : > { %4535 = vst [vmem:[#allocation2 + $0x90] sm:$0xf] %v4534_v45  ;;  %4543 = vst [vmem:[#allocation2 + $0xa0] sm:$0xf] %v4320_v31  ;;  %v4303_v33 = vsel %vm14203_vm13, %v4295_v2, %v4302_v22  ;;  %v4538_v12 = vsel %vm14197_vm12, %v4304_v11, %v4537_v5  ;;  %v4823_v36 = vrot.slane %v4822_v28, 4  ;;  %v4833_v51 = vshll.u32 %v4699_v29, 16 }
 0x37e   : > { %4546 = vst [vmem:[#allocation2 + $0xa4] sm:$0x1] %v4545_v26  ;;  %11710 = vmatpush3.bf16.msra.mxu1 %v12777_v21  ;;  %4536 = vst [vmem:[#allocation2 + $0x94] sm:$0xf] %v4303_v33  ;;  %v4839_v14 = vshll.u32 %v4700_v63, 16  ;;  %v4843_v53 = vshrl.u32 %v4700_v63, 16  ;;  %v12117_v52 = vadd.f32 %v14362_v20, %v14166_v56  ;;  %v12118_v21 = vadd.f32 %v14366_v55, %v14168_v0 }
 0x37f   : > { %4539 = vst [vmem:[#allocation2 + $0x98] sm:$0x1] %v4538_v12  ;;  %v4849_v40 = vshll.u32 %v4744_v10, 16  ;;  %11711 = vmatprep.subr.bf16.mxu1 %v12778_v32  ;;  %v4828_v24 = vsel %vm13086_vm2, %v4823_v36, %v4827_v37  ;;  %v4835_v47 = vrot.slane %v4833_v51, 5  ;;  %v12119_v29 = vadd.f32 %v14372_v19, %v14170_v27  ;;  %v14527_v33 = vld [vmem:[#allocation2 + $0x34] sm:$0xf] }
 0x380   : > { %v10323_v57 = vcombine.low %v4818_v7, %v4828_v24  ;;  %v4841_v25 = vrot.slane %v4839_v14, 5  ;;  %v4845_v56 = vrot.slane %v4843_v53, 4  ;;  %v3931_v48 = vadd.f32 %v14498_v35, %v12117_v52  ;;  %v12781_v12 = vld [vmem:[%s16193_s4 + $0x30] sm:$0xff]  }
 0x381   : > { %v4851_v20 = vrot.slane %v4849_v40, 5  ;;  %v4836_v43 = vor.u32 %v4835_v47, %v4832_v41  ;;  %v3929_v5 = vadd.f32 %v14498_v35, %v12118_v21  ;;  %v3932_v0 = vadd.f32 %v14498_v35, %v12119_v29  ;;  %v4554_v36 = vld [vmem:[#allocation2 + $0xb4] sm:$0xf] }
 0x382   : > { %11712 = vmatpush3.bf16.msra.mxu1 %v12778_v32  ;;  %11677 = vmatprep.mubr.bf16.mxu1 %v10323_v57  ;;  %v4846_v27 = vor.u32 %v4845_v56, %v4841_v25  ;;  %v12120_v55 = vadd.f32 %v14374_v4, %v14172_v61  ;;  %v4854_v19 = vshrl.u32 %v14493_v13, 16  ;;  %v4857_v7 = vshll.u32 %v14493_v13, 16 }
 0x383   : > { %11713 = vmatprep.subr.bf16.mxu1 %v12779_v38  ;;  %v4614_v37 = vld [vmem:[#allocation2 + $0x9c] sm:$0x1]  ;;  %v4837_v49 = vrot.slane %v4836_v43, 4  ;;  %v3967_v23 = vmax.f32 %v3931_v48, 0.0  ;;  %v3965_v42 = vmax.f32 %v3929_v5, 0.0  ;;  %v3968_v59 = vmax.f32 %v3932_v0, 0.0 }
 0x384   : > { %v4615_v32 = vsel %vm14197_vm12, 0, %v4614_v37  ;;  %v4611_v54 = vld [vmem:[#allocation2 + $0x90] sm:$0x1]  ;;  %v4847_v61 = vrot.slane %v4846_v27, 4  ;;  %v3930_v4 = vadd.f32 %v14498_v35, %v12120_v55  ;;  %v14515_v3 = vadd.f32 %v14393_v39, %v14179_v50  ;;  %v4558_v48 = vld [vmem:[#allocation2 + $0xbc] sm:$0x1] }
 0x385   : > { %v4668_v2 = vld [vmem:[#allocation2 + $0xa4] sm:$0xf]  ;;  %4616 = vst [vmem:[#allocation2 + $0x9c] sm:$0x1] %v4615_v32  ;;  %v4612_v46 = vsel %vm14197_vm12, 0, %v4611_v54  ;;  %v4842_v22 = vsel %vm13086_vm2, %v4837_v49, %v4841_v25  ;;  %v10733_v11 = vpack.c.bf16 %v3967_v23, %v3967_v23  ;;  %v10731_v39 = vpack.c.bf16 %v3965_v42, %v3965_v42  ;;  %v12782_v27 = vld [vmem:[%s16193_s4 + $0x38] sm:$0xff]  }
 0x386   : > { %v4669_v63 = vsel %vm14188_vm11, 0, %v4668_v2  ;;  %v4665_v17 = vld [vmem:[#allocation2 + $0x98] sm:$0xf]  ;;  %11714 = vmatpush3.bf16.msra.mxu1 %v12779_v38  ;;  %4613 = vst [vmem:[#allocation2 + $0x90] sm:$0x1] %v4612_v46  ;;  %v4852_v50 = vsel %vm13086_vm2, %v4847_v61, %v4851_v20  ;;  %v10734_v10 = vpack.c.bf16 %v3968_v59, %v3968_v59  ;;  %v3966_v41 = vmax.f32 %v3930_v4, 0.0 }
 0x387   : > { %4670 = vst [vmem:[#allocation2 + $0xa4] sm:$0xf] %v4669_v63  ;;  %v4666_v28 = vsel %vm14188_vm11, 0, %v4665_v17  ;;  %11715 = vmatprep.subr.bf16.mxu1 %v12780_v44  ;;  %v10324_v45 = vcombine.low %v4842_v22, %v4852_v50  ;;  %v4340_v31 = vshrl.u32 %v10733_v11, 16  ;;  %v4343_v26 = vshll.u32 %v10733_v11, 16  ;;  %v14552_v50 = vld [vmem:[%s16193_s4 + $0x80] sm:$0xff]  }
 0x388   : > { %4667 = vst [vmem:[#allocation2 + $0x98] sm:$0xf] %v4666_v28  ;;  %v4323_v51 = vshrl.u32 %v10731_v39, 16  ;;  %v4326_v14 = vshll.u32 %v10731_v39, 16  ;;  %v4348_v53 = vshrl.u32 %v10734_v10, 16  ;;  %v4351_v40 = vshll.u32 %v10734_v10, 16 }
 0x389   : > { %11678 = vmatmul.mubr.bf16.gmra.mrb[24].mxu1 %v10324_v45  ;;  %v4342_v52 = vrot.slane %v4340_v31, 7  ;;  %v4547_v38 = vld [vmem:[#allocation2 + $0xa8] sm:$0xf]  ;;  %v10732_v24 = vpack.c.bf16 %v3966_v41, %v3966_v41  ;;  %v4856_v47 = vrot.slane %v4854_v19, 4  ;;  %v4859_v21 = vrot.slane %v4857_v7, 5 }
 0x38a   : > { %v4325_v29 = vrot.slane %v4323_v51, 7  ;;  %v4350_v57 = vrot.slane %v4348_v53, 7  ;;  %v4863_v25 = vshll.u32 %v14527_v33, 16  ;;  %v4867_v56 = vshrl.u32 %v14527_v33, 16  ;;  %11716 = vmatpush3.bf16.msra.mxu1 %v12780_v44  ;;  %v4745_v49 = vld [vmem:[#allocation2 + $0x38] sm:$0x1] }
 0x38b   : > { %v4345_v20 = vor.u32 %v4343_v26, %v4342_v52  ;;  %v4346_v43 = vrot.slane %v4342_v52, 4  ;;  %v4331_v5 = vshrl.u32 %v10732_v24, 16  ;;  %v4334_v0 = vshll.u32 %v10732_v24, 16  ;;  %11717 = vmatprep.subr.bf16.mxu1 %v12781_v12  ;;  %v14539_v32 = vld [vmem:[#allocation2 + $0x3c] sm:$0xf] }
 0x38c   : > { %v4328_v55 = vor.u32 %v4326_v14, %v4325_v29  ;;  %v4329_v19 = vrot.slane %v4325_v29, 4  ;;  %v4353_v7 = vor.u32 %v4351_v40, %v4350_v57  ;;  %v4355_v37 = vrot.slane %v4350_v57, 4  ;;  %v14541_v54 = vld [vmem:[#allocation2 + $0x40] sm:$0xf]  ;;  %v4551_v46 = vld [vmem:[#allocation2 + $0xb0] sm:$0x1] }
 0x38d   : > { %v4555_v23 = vsel %vm14188_vm11, %v4345_v20, %v4554_v36  ;;  %v4333_v42 = vrot.slane %v4331_v5, 7  ;;  %v4860_v44 = vor.u32 %v4859_v21, %v4856_v47  ;;  %v4865_v59 = vrot.slane %v4863_v25, 5  ;;  %v4746_v10 = vld [vmem:[#allocation2 + $0x44] sm:$0x1]  ;;  %v14575_v20 = vld [vmem:[#allocation2 + $0x48] sm:$0xf] }
 0x38e   : > { %4556 = vst [vmem:[#allocation2 + $0xb4] sm:$0xf] %v4555_v23  ;;  %v4548_v2 = vsel %vm14188_vm11, %v4328_v55, %v4547_v38  ;;  %v4354_v61 = vsel %vm14203_vm13, %v4346_v43, %v4353_v7  ;;  %v4559_v4 = vsel %vm14197_vm12, %v4355_v37, %v4558_v48  ;;  %v4869_v63 = vrot.slane %v4867_v56, 4  ;;  %11718 = vmatpush3.bf16.msra.mxu1 %v12781_v12 }
 0x38f   : > { %4549 = vst [vmem:[#allocation2 + $0xa8] sm:$0xf] %v4548_v2  ;;  %4557 = vst [vmem:[#allocation2 + $0xb8] sm:$0xf] %v4354_v61  ;;  %v4336_v17 = vor.u32 %v4334_v0, %v4333_v42  ;;  %v4338_v22 = vrot.slane %v4333_v42, 4  ;;  %v4861_v11 = vrot.slane %v4860_v44, 4  ;;  %11719 = vmatprep.subr.bf16.mxu1 %v12782_v27  ;;  %v3935_v47 = vadd.f32 %v14498_v35, %v14515_v3 }
 0x390   : > { %4560 = vst [vmem:[#allocation2 + $0xbc] sm:$0x1] %v4559_v4  ;;  %v4873_v28 = vshll.u32 %v4745_v49, 16  ;;  %v4870_v39 = vor.u32 %v4869_v63, %v4865_v59  ;;  %v4878_v45 = vshrl.u32 %v14539_v32, 16  ;;  %v4881_v31 = vshll.u32 %v14539_v32, 16 }
 0x391   : > { %v4887_v26 = vshll.u32 %v14541_v54, 16  ;;  %v4337_v41 = vsel %vm14203_vm13, %v4329_v19, %v4336_v17  ;;  %v4552_v12 = vsel %vm14197_vm12, %v4338_v22, %v4551_v46  ;;  %v4866_v36 = vsel %vm13086_vm2, %v4861_v11, %v4865_v59 }
 0x392   : > { %v4875_v51 = vrot.slane %v4873_v28, 5  ;;  %4550 = vst [vmem:[#allocation2 + $0xac] sm:$0xf] %v4337_v41  ;;  %4553 = vst [vmem:[#allocation2 + $0xb0] sm:$0x1] %v4552_v12  ;;  %v4871_v14 = vrot.slane %v4870_v39, 4  ;;  %11720 = vmatpush3.bf16.msra.mxu1 %v12782_v27  ;;  %v12122_v21 = vadd.f32 %v14399_v18, %v14193_v60  ;;  %v12123_v25 = vadd.f32 %v14401_v16, %v14207_v34 }
 0x393   : > { %v4880_v53 = vrot.slane %v4878_v45, 4  ;;  %v4883_v40 = vrot.slane %v4881_v31, 5  ;;  %v4889_v52 = vrot.slane %v4887_v26, 5  ;;  %v4891_v38 = vshrl.u32 %v14541_v54, 16  ;;  %11753 = vmatprep.subr.bf16.mxu1 %v14552_v50  ;;  %v14593_v39 = vld [vmem:[#allocation2 + $0x4c] sm:$0xf] }
 0x394   : > { %v4897_v24 = vshll.u32 %v4746_v10, 16  ;;  %v4876_v29 = vsel %vm13086_vm2, %v4871_v14, %v4875_v51  ;;  %v12124_v56 = vadd.f32 %v14405_v30, %v14211_v8  ;;  %v3971_v0 = vmax.f32 %v3935_v47, 0.0  ;;  %v4568_v31 = vld [vmem:[#allocation2 + $0xcc] sm:$0xf]  ;;  %v4561_v14 = vld [vmem:[#allocation2 + $0xc0] sm:$0xf] }
 0x395   : > { %v4884_v57 = vor.u32 %v4883_v40, %v4880_v53  ;;  %v4620_v43 = vld [vmem:[#allocation2 + $0xb4] sm:$0x1]  ;;  %v10325_v48 = vcombine.low %v4866_v36, %v4876_v29  ;;  %v4893_v3 = vrot.slane %v4891_v38, 4  ;;  %v3933_v19 = vadd.f32 %v14498_v35, %v12122_v21 }
 0x396   : > { %v4899_v5 = vrot.slane %v4897_v24, 5  ;;  %v4621_v60 = vsel %vm14197_vm12, 0, %v4620_v43  ;;  %v4617_v18 = vld [vmem:[#allocation2 + $0xa8] sm:$0x1]  ;;  %v3936_v34 = vadd.f32 %v14498_v35, %v12123_v25  ;;  %v10737_v7 = vpack.c.bf16 %v3971_v0, %v3971_v0  ;;  %v4572_v24 = vld [vmem:[#allocation2 + $0xd4] sm:$0x1] }
 0x397   : > { %v4674_v27 = vld [vmem:[#allocation2 + $0xbc] sm:$0xf]  ;;  %v4885_v55 = vrot.slane %v4884_v57, 4  ;;  %4622 = vst [vmem:[#allocation2 + $0xb4] sm:$0x1] %v4621_v60  ;;  %v4618_v8 = vsel %vm14197_vm12, 0, %v4617_v18  ;;  %11681 = vmatprep.mubr.bf16.mxu1 %v10325_v48  ;;  %v4894_v30 = vor.u32 %v4893_v3, %v4889_v52  ;;  %v3934_v42 = vadd.f32 %v14498_v35, %v12124_v56 }
 0x398   : > { %v4675_v16 = vsel %vm14188_vm11, 0, %v4674_v27  ;;  %4619 = vst [vmem:[#allocation2 + $0xa8] sm:$0x1] %v4618_v8  ;;  %v3969_v49 = vmax.f32 %v3933_v19, 0.0  ;;  %v3972_v23 = vmax.f32 %v3936_v34, 0.0  ;;  %v4374_v2 = vshrl.u32 %v10737_v7, 16 }
 0x399   : > { %4676 = vst [vmem:[#allocation2 + $0xbc] sm:$0xf] %v4675_v16  ;;  %v4890_v37 = vsel %vm13086_vm2, %v4885_v55, %v4889_v52  ;;  %v4671_v44 = vld [vmem:[#allocation2 + $0xb0] sm:$0xf]  ;;  %v4895_v59 = vrot.slane %v4894_v30, 4  ;;  %v4377_v61 = vshll.u32 %v10737_v7, 16 }
 0x39a   : > { %v4902_v4 = vshrl.u32 %v14575_v20, 16  ;;  %v4672_v46 = vsel %vm14188_vm11, 0, %v4671_v44  ;;  %v10735_v63 = vpack.c.bf16 %v3969_v49, %v3969_v49  ;;  %v10738_v17 = vpack.c.bf16 %v3972_v23, %v3972_v23  ;;  %v14599_v56 = vld [vmem:[#allocation2 + $0x50] sm:$0x1]  ;;  %v14602_v48 = vld [vmem:[#allocation2 + $0x58] sm:$0xf] }
 0x39b   : > { %v3970_v22 = vmax.f32 %v3934_v42, 0.0  ;;  %4673 = vst [vmem:[#allocation2 + $0xb0] sm:$0xf] %v4672_v46  ;;  %v4900_v11 = vsel %vm13086_vm2, %v4895_v59, %v4899_v5  ;;  %v4376_v28 = vrot.slane %v4374_v2, 7  ;;  %v4905_v10 = vshll.u32 %v14575_v20, 16 }
 0x39c   : > { %v4904_v35 = vrot.slane %v4902_v4, 4  ;;  %v10326_v45 = vcombine.low %v4890_v37, %v4900_v11  ;;  %v4357_v26 = vshrl.u32 %v10735_v63, 16  ;;  %v4360_v41 = vshll.u32 %v10735_v63, 16  ;;  %v14604_v18 = vld [vmem:[#allocation2 + $0x54] sm:$0xf] }
 0x39d   : > { %v4382_v12 = vshrl.u32 %v10738_v17, 16  ;;  %v4379_v36 = vor.u32 %v4377_v61, %v4376_v28  ;;  %v4380_v51 = vrot.slane %v4376_v28, 4  ;;  %v4385_v53 = vshll.u32 %v10738_v17, 16  ;;  %v4565_v7 = vld [vmem:[#allocation2 + $0xc8] sm:$0x1] }
 0x39e   : > { %v10736_v40 = vpack.c.bf16 %v3970_v22, %v3970_v22  ;;  %11682 = vmatmul.mubr.bf16.gmra.mrb[28].mxu1 %v10326_v45  ;;  %v4359_v52 = vrot.slane %v4357_v26, 7  ;;  %v4907_v47 = vrot.slane %v4905_v10, 5  ;;  %v4911_v21 = vshll.u32 %v14593_v39, 16  ;;  %v14613_v59 = vld [vmem:[#allocation2 + $0x5c] sm:$0x1] }
 0x39f   : > { %v4384_v38 = vrot.slane %v4382_v12, 7  ;;  %v4569_v29 = vsel %vm14188_vm11, %v4379_v36, %v4568_v31  ;;  %v4915_v43 = vshrl.u32 %v14593_v39, 16  ;;  %v4921_v37 = vshll.u32 %v14599_v56, 16  ;;  %v14619_v63 = vld [vmem:[#allocation2 + $0x60] sm:$0xf] }
 0x3a0   : > { %v4365_v57 = vshrl.u32 %v10736_v40, 16  ;;  %v4368_v25 = vshll.u32 %v10736_v40, 16  ;;  %4570 = vst [vmem:[#allocation2 + $0xcc] sm:$0xf] %v4569_v29  ;;  %v4362_v3 = vor.u32 %v4360_v41, %v4359_v52  ;;  %v4363_v5 = vrot.slane %v4359_v52, 4 }
 0x3a1   : > { %v4387_v0 = vor.u32 %v4385_v53, %v4384_v38  ;;  %v4389_v60 = vrot.slane %v4384_v38, 4  ;;  %v4908_v55 = vor.u32 %v4907_v47, %v4904_v35  ;;  %v4913_v19 = vrot.slane %v4911_v21, 5  ;;  %v14628_v26 = vld [vmem:[#allocation2 + $0x64] sm:$0xf]  ;;  %v14637_v38 = vld [vmem:[#allocation2 + $0x6c] sm:$0xf] }
 0x3a2   : > { %v4367_v27 = vrot.slane %v4365_v57, 7  ;;  %v4917_v34 = vrot.slane %v4915_v43, 4  ;;  %v4562_v8 = vsel %vm14188_vm11, %v4362_v3, %v4561_v14  ;;  %v4923_v2 = vrot.slane %v4921_v37, 5  ;;  %v14641_v21 = vld [vmem:[#allocation2 + $0x68] sm:$0x1] }
 0x3a3   : > { %v4388_v16 = vsel %vm14203_vm13, %v4380_v51, %v4387_v0  ;;  %v4573_v30 = vsel %vm14197_vm12, %v4389_v60, %v4572_v24  ;;  %4563 = vst [vmem:[#allocation2 + $0xc0] sm:$0xf] %v4562_v8  ;;  %v4909_v42 = vrot.slane %v4908_v55, 4  ;;  %v4926_v61 = vshrl.u32 %v14604_v18, 16  ;;  %v14639_v24 = vld [vmem:[#allocation2 + $0x70] sm:$0xf] }
 0x3a4   : > { %4571 = vst [vmem:[#allocation2 + $0xd0] sm:$0xf] %v4388_v16  ;;  %4574 = vst [vmem:[#allocation2 + $0xd4] sm:$0x1] %v4573_v30  ;;  %v4370_v49 = vor.u32 %v4368_v25, %v4367_v27  ;;  %v4372_v23 = vrot.slane %v4367_v27, 4  ;;  %v4918_v44 = vor.u32 %v4917_v34, %v4913_v19  ;;  %v4929_v4 = vshll.u32 %v14604_v18, 16 }
 0x3a5   : > { %4691 = vst [vmem:[#allocation2 + $0xd0] sm:$0xf] %v16390_v1  ;;  %v4935_v46 = vshll.u32 %v14602_v48, 16  ;;  %v4914_v11 = vsel %vm13086_vm2, %v4909_v42, %v4913_v19  ;;  %v4928_v35 = vrot.slane %v4926_v61, 4  ;;  %v4939_v31 = vshrl.u32 %v14602_v48, 16 }
 0x3a6   : > { %v4371_v17 = vsel %vm14203_vm13, %v4363_v5, %v4370_v49  ;;  %v4566_v22 = vsel %vm14197_vm12, %v4372_v23, %v4565_v7  ;;  %v4919_v28 = vrot.slane %v4918_v44, 4  ;;  %v4931_v10 = vrot.slane %v4929_v4, 5  ;;  %v14650_v8 = vld [vmem:[#allocation2 + $0x74] sm:$0x1]  ;;  %v14655_v49 = vld [vmem:[#allocation2 + $0x78] sm:$0xf] }
 0x3a7   : > { %4564 = vst [vmem:[#allocation2 + $0xc4] sm:$0xf] %v4371_v17  ;;  %4567 = vst [vmem:[#allocation2 + $0xc8] sm:$0x1] %v4566_v22  ;;  %v4937_v45 = vrot.slane %v4935_v46, 5  ;;  %v4945_v12 = vshll.u32 %v14613_v59, 16 }
 0x3a8   : > { %v4626_v41 = vld [vmem:[#allocation2 + $0xcc] sm:$0x1]  ;;  %v4924_v58 = vsel %vm13086_vm2, %v4919_v28, %v4923_v2  ;;  %v4950_v36 = vshrl.u32 %v14619_v63, 16  ;;  %v4953_v51 = vshll.u32 %v14619_v63, 16  ;;  %v4932_v40 = vor.u32 %v4931_v10, %v4928_v35  ;;  %v14665_v22 = vld [vmem:[#allocation2 + $0x7c] sm:$0xf] }
 0x3a9   : > { %v4627_v14 = vsel %vm14197_vm12, 0, %v4626_v41  ;;  %v10327_v53 = vcombine.low %v4914_v11, %v4924_v58  ;;  %v4941_v52 = vrot.slane %v4939_v31, 4  ;;  %v4947_v47 = vrot.slane %v4945_v12, 5  ;;  %v14671_v58 = vld [vmem:[#allocation2 + $0x80] sm:$0x1] }
 0x3aa   : > { %4628 = vst [vmem:[#allocation2 + $0xcc] sm:$0x1] %v4627_v14  ;;  %v4952_v29 = vrot.slane %v4950_v36, 4  ;;  %v4955_v57 = vrot.slane %v4953_v51, 5  ;;  %v4959_v25 = vshll.u32 %v14628_v26, 16  ;;  %v4933_v5 = vrot.slane %v4932_v40, 4 }
 0x3ab   : > { %4690 = vst [vmem:[#allocation2 + $0xcc] sm:$0xf] %v16390_v1  ;;  %v4623_v43 = vld [vmem:[#allocation2 + $0xc0] sm:$0x1]  ;;  %v4680_v3 = vld [vmem:[#allocation2 + $0xd4] sm:$0xf]  ;;  %11685 = vmatprep.mubr.bf16.mxu1 %v10327_v53  ;;  %v4942_v0 = vor.u32 %v4941_v52, %v4937_v45 }
 0x3ac   : > { %v4963_v60 = vshrl.u32 %v14628_v26, 16  ;;  %v4624_v27 = vsel %vm14197_vm12, 0, %v4623_v43  ;;  %v4681_v55 = vsel %vm14188_vm11, 0, %v4680_v3  ;;  %v4956_v19 = vor.u32 %v4955_v57, %v4952_v29  ;;  %v14676_v14 = vld [vmem:[#allocation2 + $0x88] sm:$0xf] }
 0x3ad   : > { %v4961_v34 = vrot.slane %v4959_v25, 5  ;;  %4625 = vst [vmem:[#allocation2 + $0xc0] sm:$0x1] %v4624_v27  ;;  %4682 = vst [vmem:[#allocation2 + $0xd4] sm:$0xf] %v4681_v55  ;;  %v4938_v16 = vsel %vm13086_vm2, %v4933_v5, %v4937_v45  ;;  %v4943_v30 = vrot.slane %v4942_v0, 4 }
 0x3ae   : > { %v4965_v7 = vrot.slane %v4963_v60, 4  ;;  %v4969_v37 = vshll.u32 %v14641_v21, 16  ;;  %4692 = vst [vmem:[#allocation2 + $0xd4] sm:$0xf] %v16390_v1  ;;  %v4677_v15 = vld [vmem:[#allocation2 + $0xc8] sm:$0xf] }
 0x3af   : > { %v4957_v23 = vrot.slane %v4956_v19, 4  ;;  %v4974_v42 = vshrl.u32 %v14637_v38, 16  ;;  %v4977_v44 = vshll.u32 %v14637_v38, 16  ;;  %v4983_v2 = vshll.u32 %v14639_v24, 16  ;;  %v14681_v29 = vld [vmem:[#allocation2 + $0x84] sm:$0xf] }
 0x3b0   : > { %v4678_v61 = vsel %vm14188_vm11, 0, %v4677_v15  ;;  %v4948_v4 = vsel %vm13086_vm2, %v4943_v30, %v4947_v47  ;;  %v4966_v46 = vor.u32 %v4965_v7, %v4961_v34  ;;  %v4971_v17 = vrot.slane %v4969_v37, 5 }
 0x3b1   : > { %4679 = vst [vmem:[#allocation2 + $0xc8] sm:$0xf] %v4678_v61  ;;  %v10328_v1 = vcombine.low %v4938_v16, %v4948_v4  ;;  %v4962_v11 = vsel %vm13086_vm2, %v4957_v23, %v4961_v34  ;;  %v4976_v28 = vrot.slane %v4974_v42, 4  ;;  %v4979_v35 = vrot.slane %v4977_v44, 5  ;;  %v14686_v34 = vld [vmem:[#allocation2 + $0x8c] sm:$0x1] }
 0x3b2   : > { %v4967_v10 = vrot.slane %v4966_v46, 4  ;;  %v4985_v45 = vrot.slane %v4983_v2, 5  ;;  %v4987_v31 = vshrl.u32 %v14639_v24, 16  ;;  %v4993_v62 = vshll.u32 %v14650_v8, 16  ;;  %v14692_v4 = vld [vmem:[#allocation2 + $0x90] sm:$0xf] }
 0x3b3   : > { %11686 = vmatmul.mubr.bf16.gmra.mrb[32].mxu1 %v10328_v1  ;;  %v4980_v41 = vor.u32 %v4979_v35, %v4976_v28  ;;  %v4998_v12 = vshrl.u32 %v14655_v49, 16  ;;  %v5001_v36 = vshll.u32 %v14655_v49, 16  ;;  %v5007_v51 = vshll.u32 %v14665_v22, 16  ;;  %v14697_v28 = vld [vmem:[#allocation2 + $0x94] sm:$0xf] }
 0x3b4   : > { %v4972_v53 = vsel %vm13086_vm2, %v4967_v10, %v4971_v17  ;;  %v4989_v40 = vrot.slane %v4987_v31, 4  ;;  %v4995_v52 = vrot.slane %v4993_v62, 5  ;;  %v5011_v47 = vshrl.u32 %v14665_v22, 16  ;;  %v14701_v62 = vld [vmem:[#allocation2 + $0x98] sm:$0x1] }
 0x3b5   : > { %v10329_v57 = vcombine.low %v4962_v11, %v4972_v53  ;;  %v4981_v25 = vrot.slane %v4980_v41, 4  ;;  %v5000_v43 = vrot.slane %v4998_v12, 4  ;;  %v5003_v3 = vrot.slane %v5001_v36, 5  ;;  %v14707_v53 = vld [vmem:[#allocation2 + $0x9c] sm:$0xf] }
 0x3b6   : > { %v4990_v5 = vor.u32 %v4989_v40, %v4985_v45  ;;  %v5009_v0 = vrot.slane %v5007_v51, 5  ;;  %v5013_v60 = vrot.slane %v5011_v47, 4  ;;  %v5017_v27 = vshll.u32 %v14671_v58, 16 }
 0x3b7   : > { %11689 = vmatprep.mubr.bf16.mxu1 %v10329_v57  ;;  %v4986_v55 = vsel %vm13086_vm2, %v4981_v25, %v4985_v45  ;;  %v5004_v19 = vor.u32 %v5003_v3, %v5000_v43  ;;  %v5022_v16 = vshrl.u32 %v14681_v29, 16  ;;  %v5025_v30 = vshll.u32 %v14681_v29, 16 }
 0x3b8   : > { %v4991_v7 = vrot.slane %v4990_v5, 4  ;;  %v5014_v37 = vor.u32 %v5013_v60, %v5009_v0  ;;  %v5019_v15 = vrot.slane %v5017_v27, 5  ;;  %v5031_v23 = vshll.u32 %v14676_v14, 16 }
 0x3b9   : > { %v5005_v42 = vrot.slane %v5004_v19, 4  ;;  %v5024_v44 = vrot.slane %v5022_v16, 4  ;;  %v5027_v2 = vrot.slane %v5025_v30, 5  ;;  %v5035_v61 = vshrl.u32 %v14676_v14, 16  ;;  %v14716_v19 = vld [vmem:[#allocation2 + $0xa4] sm:$0x1] }
 0x3ba   : > { %v4996_v46 = vsel %vm13086_vm2, %v4991_v7, %v4995_v52  ;;  %v5015_v17 = vrot.slane %v5014_v37, 4  ;;  %v5033_v1 = vrot.slane %v5031_v23, 5  ;;  %v5041_v11 = vshll.u32 %v14686_v34, 16  ;;  %v14720_v23 = vld [vmem:[#allocation2 + $0xa8] sm:$0xf] }
 0x3bb   : > { %v10330_v35 = vcombine.low %v4986_v55, %v4996_v46  ;;  %v5010_v10 = vsel %vm13086_vm2, %v5005_v42, %v5009_v0  ;;  %v5028_v45 = vor.u32 %v5027_v2, %v5024_v44  ;;  %v5037_v31 = vrot.slane %v5035_v61, 4  ;;  %v14712_v0 = vld [vmem:[#allocation2 + $0xa0] sm:$0xf]  ;;  %v14722_v42 = vld [vmem:[#allocation2 + $0xac] sm:$0xf] }
 0x3bc   : > { %v5020_v41 = vsel %vm13086_vm2, %v5015_v17, %v5019_v15  ;;  %v5043_v12 = vrot.slane %v5041_v11, 5  ;;  %v5046_v36 = vshrl.u32 %v14692_v4, 16  ;;  %v5049_v51 = vshll.u32 %v14692_v4, 16 }
 0x3bd   : > { %11690 = vmatmul.mubr.bf16.gmra.mrb[36].mxu1 %v10330_v35  ;;  %v10331_v40 = vcombine.low %v5010_v10, %v5020_v41  ;;  %v5029_v52 = vrot.slane %v5028_v45, 4  ;;  %v5038_v47 = vor.u32 %v5037_v31, %v5033_v1  ;;  %v5055_v57 = vshll.u32 %v14697_v28, 16  ;;  %v14728_v10 = vld [vmem:[#allocation2 + $0xb0] sm:$0x1] }
 0x3be   : > { %v5048_v25 = vrot.slane %v5046_v36, 4  ;;  %v5051_v43 = vrot.slane %v5049_v51, 5  ;;  %v5059_v3 = vshrl.u32 %v14697_v28, 16  ;;  %v5065_v5 = vshll.u32 %v14701_v62, 16  ;;  %v14732_v51 = vld [vmem:[#allocation2 + $0xb4] sm:$0xf] }
 0x3bf   : > { %11693 = vmatprep.mubr.bf16.mxu1 %v10331_v40  ;;  %v5034_v60 = vsel %vm13086_vm2, %v5029_v52, %v5033_v1  ;;  %v5039_v27 = vrot.slane %v5038_v47, 4  ;;  %v5057_v55 = vrot.slane %v5055_v57, 5  ;;  %v5070_v16 = vshrl.u32 %v14707_v53, 16  ;;  %v14737_v57 = vld [vmem:[#allocation2 + $0xb8] sm:$0xf] }
 0x3c0   : > { %v5052_v30 = vor.u32 %v5051_v43, %v5048_v25  ;;  %v5061_v7 = vrot.slane %v5059_v3, 4  ;;  %v5067_v37 = vrot.slane %v5065_v5, 5  ;;  %v5073_v15 = vshll.u32 %v14707_v53, 16 }
 0x3c1   : > { %v5044_v44 = vsel %vm13086_vm2, %v5039_v27, %v5043_v12  ;;  %v5072_v2 = vrot.slane %v5070_v16, 4  ;;  %v5079_v61 = vshll.u32 %v14712_v0, 16  ;;  %v5083_v46 = vshrl.u32 %v14712_v0, 16 }
 0x3c2   : > { %v10332_v17 = vcombine.low %v5034_v60, %v5044_v44  ;;  %v5053_v1 = vrot.slane %v5052_v30, 4  ;;  %v5062_v11 = vor.u32 %v5061_v7, %v5057_v55  ;;  %v5075_v35 = vrot.slane %v5073_v15, 5 }
 0x3c3   : > { %v5081_v45 = vrot.slane %v5079_v61, 5  ;;  %v5085_v31 = vrot.slane %v5083_v46, 4  ;;  %v5089_v41 = vshll.u32 %v14716_v19, 16  ;;  %v5094_v36 = vshrl.u32 %v14720_v23, 16 }
 0x3c4   : > { %v5058_v12 = vsel %vm13086_vm2, %v5053_v1, %v5057_v55  ;;  %v5063_v40 = vrot.slane %v5062_v11, 4  ;;  %v5076_v52 = vor.u32 %v5075_v35, %v5072_v2  ;;  %v5097_v47 = vshll.u32 %v14720_v23, 16 }
 0x3c5   : > { %11694 = vmatmul.mubr.bf16.gmra.mrb[40].mxu1 %v10332_v17  ;;  %v5086_v25 = vor.u32 %v5085_v31, %v5081_v45  ;;  %v5091_v43 = vrot.slane %v5089_v41, 5  ;;  %v5096_v3 = vrot.slane %v5094_v36, 4  ;;  %v5103_v5 = vshll.u32 %v14722_v42, 16  ;;  %v14746_v17 = vld [vmem:[#allocation2 + $0xbc] sm:$0x1] }
 0x3c6   : > { %v5068_v60 = vsel %vm13086_vm2, %v5063_v40, %v5067_v37  ;;  %v5077_v27 = vrot.slane %v5076_v52, 4  ;;  %v5099_v16 = vrot.slane %v5097_v47, 5  ;;  %v5107_v30 = vshrl.u32 %v14722_v42, 16 }
 0x3c7   : > { %v10333_v55 = vcombine.low %v5058_v12, %v5068_v60  ;;  %v5087_v7 = vrot.slane %v5086_v25, 4  ;;  %v5105_v15 = vrot.slane %v5103_v5, 5  ;;  %v5113_v44 = vshll.u32 %v14728_v10, 16 }
 0x3c8   : > { %v5082_v2 = vsel %vm13086_vm2, %v5077_v27, %v5081_v45  ;;  %v5100_v61 = vor.u32 %v5099_v16, %v5096_v3  ;;  %v5109_v46 = vrot.slane %v5107_v30, 4  ;;  %v5118_v1 = vshrl.u32 %v14732_v51, 16 }
 0x3c9   : > { %11697 = vmatprep.mubr.bf16.mxu1 %v10333_v55  ;;  %v5092_v37 = vsel %vm13086_vm2, %v5087_v7, %v5091_v43  ;;  %v5115_v11 = vrot.slane %v5113_v44, 5  ;;  %v5121_v35 = vshll.u32 %v14732_v51, 16  ;;  %v5127_v31 = vshll.u32 %v14737_v57, 16 }
 0x3ca   : > { %v10334_v41 = vcombine.low %v5082_v2, %v5092_v37  ;;  %v5101_v36 = vrot.slane %v5100_v61, 4  ;;  %v5110_v12 = vor.u32 %v5109_v46, %v5105_v15  ;;  %v5120_v40 = vrot.slane %v5118_v1, 4  ;;  %v5747_v1 = vld [vmem:[#allocation2 + $0x84] sm:$0xe]  ;;  %v5748_v46 = vld [vmem:[#allocation2 + $0x90] sm:$0xe] }
 0x3cb   : > { %v5123_v45 = vrot.slane %v5121_v35, 5  ;;  %v5129_v52 = vrot.slane %v5127_v31, 5  ;;  %v5131_v47 = vshrl.u32 %v14737_v57, 16  ;;  %v5137_v25 = vshll.u32 %v14746_v17, 16  ;;  %v5746_v35 = vld [vmem:[#allocation2 + $0x78] sm:$0xe] }
 0x3cc   : > { %v5106_v3 = vsel %vm13086_vm2, %v5101_v36, %v5105_v15  ;;  %v5111_v5 = vrot.slane %v5110_v12, 4  ;;  %v10351_v30 = vcombine.low %v14575_v20, %v14593_v39  ;;  %v10352_v2 = vcombine.low %v14604_v18, %v14602_v48  ;;  %v5749_v61 = vld [vmem:[#allocation2 + $0x9c] sm:$0xe] }
 0x3cd   : > { %11698 = vmatmul.mubr.bf16.gmra.mrb[44].mxu1 %v10334_v41  ;;  %v5124_v43 = vor.u32 %v5123_v45, %v5120_v40  ;;  %v5133_v60 = vrot.slane %v5131_v47, 4  ;;  %v5139_v16 = vrot.slane %v5137_v25, 5  ;;  %v10353_v15 = vcombine.low %v14619_v63, %v14628_v26  ;;  %v12889_v40 = vld [vmem:[#allocation2] sm:$0xf]  ;;  %v14783_v45 = vld [vmem:[#allocation2 + $0x4] sm:$0xf] }
 0x3ce   : > { %v5116_v27 = vsel %vm13086_vm2, %v5111_v5, %v5115_v11  ;;  %v5742_v25 = vld [vmem:[#allocation2 + $0x48] sm:$0xe]  ;;  %v12891_v5 = vld [vmem:[#allocation2 + $0xc] sm:$0xf]  ;;  %v5849_v31 = vrot.slane %v14639_v24, 5  ;;  %v16393_v18 = vcombine.low %v14681_v29, %v14676_v14  ;;  %v16394_v63 = vcombine.low %v14692_v4, %v14697_v28 }
 0x3cf   : > { %v10335_v55 = vcombine.low %v5106_v3, %v5116_v27  ;;  %v5125_v7 = vrot.slane %v5124_v43, 4  ;;  %v5134_v44 = vor.u32 %v5133_v60, %v5129_v52  ;;  %v5743_v3 = vld [vmem:[#allocation2 + $0x54] sm:$0xe]  ;;  %v14786_v43 = vld [vmem:[#allocation2 + $0x10] sm:$0xf] }
 0x3d0   : > { %v10346_v60 = vcombine.low %v12891_v5, %v14786_v43  ;;  %v12893_v27 = vld [vmem:[#allocation2 + $0x18] sm:$0xf]  ;;  %v14798_v5 = vld [vmem:[#allocation2 + $0x28] sm:$0xf]  ;;  %v5745_v41 = vld [vmem:[#allocation2 + $0x6c] sm:$0xe] }
 0x3d1   : > { %11701 = vmatprep.mubr.bf16.mxu1 %v10335_v55  ;;  %v5130_v37 = vsel %vm13086_vm2, %v5125_v7, %v5129_v52  ;;  %v5135_v11 = vrot.slane %v5134_v44, 4  ;;  %v10345_v52 = vcombine.low %v12889_v40, %v14783_v45  ;;  %v14789_v55 = vld [vmem:[#allocation2 + $0x1c] sm:$0xf]  ;;  %v12788_v7 = vld [vmem:[%s16193_s4 + $0x88] sm:$0xff]   ;;  %v5828_v44 = vrot.slane %v14593_v39, 5 }
 0x3d2   : > { %v5835_v40 = vrot.slane %v14602_v48, 5  ;;  %v12806_v39 = vld [vmem:[%s16193_s4 + $0xb8] sm:$0xff]   ;;  %v16392_v48 = vcombine.low %v14655_v49, %v14665_v22  ;;  %v16396_v49 = vcombine.low %v14720_v23, %v14722_v42  ;;  %v5793_v4 = vrot.slane %v14786_v43, 5  ;;  %v12899_v23 = vld [vmem:[#allocation2 + $0x20] sm:$0x1] }
 0x3d3   : > { %v5140_v12 = vsel %vm13086_vm2, %v5135_v11, %v5139_v16  ;;  %v10347_v16 = vcombine.low %v12893_v27, %v14789_v55  ;;  %v5831_v11 = vrot.slane %v14599_v56, 5  ;;  %v5830_v27 = vrot.slane %v5828_v44, 4 }
 0x3d4   : > { %v10336_v47 = vcombine.low %v5130_v37, %v5140_v12  ;;  %v10375_v37 = vrot.slane %v5742_v25, 9  ;;  %v10376_v12 = vrot.slane %v5743_v3, 9  ;;  %v5837_v3 = vrot.slane %v5835_v40, 4 }
 0x3d6   : > { %11702 = vmatmul.mubr.bf16.gmra.mrb[48].mxu1 %v10336_v47  ;;  %v12895_v47 = vld [vmem:[#allocation2 + $0x24] sm:$0xf]  ;;  %v14804_v25 = vsel %vm13451_vm5, %v10375_v37, %v5828_v44  ;;  %v14808_v56 = vsel %vm13451_vm5, %v10376_v12, %v5835_v40  ;;  %v5842_v44 = vrot.slane %v14628_v26, 5  ;;  %v5845_v37 = vrot.slane %v14641_v21, 5 }
 0x3d7   : > { %11721 = vmatprep.mubr.bf16.mxu1 %v10345_v52  ;;  %v5744_v52 = vld [vmem:[#allocation2 + $0x60] sm:$0xe]  ;;  %v10348_v36 = vcombine.low %v12895_v47, %v14798_v5  ;;  %v12791_v47 = vld [vmem:[%s16193_s4 + $0x90] sm:$0xff]   ;;  %v10378_v40 = vrot.slane %v5745_v41, 9  ;;  %v5852_v21 = vrot.slane %v14650_v8, 5  ;;  %v10379_v8 = vrot.slane %v5746_v35, 9 }
 0x3d8   : > { %v5786_v26 = vrot.slane %v14783_v45, 5  ;;  %v12898_v45 = vld [vmem:[#allocation2 + $0x14] sm:$0x1] }
 0x3d9   : > { %v14838_v41 = vsel %vm13451_vm5, %v10378_v40, %v5849_v31 }
 0x3de   : > { %11722 = vmatmul.mubr.bf16.vlgmr.msra.gmra.mrb[20].mxu1 %v10346_v60  ;;  %v5838_v60 = vrot.slane %v14613_v59, 5 }
 0x3df   : > { %11725 = vmatprep.mubr.bf16.mxu1 %v10347_v16  ;;  %11754 = vmatpush3.bf16.msra.mxu1 %v14552_v50  ;;  %v14816_v16 = vsel %vm13451_vm5, %v5830_v27, %v5831_v11  ;;  %v10377_v50 = vrot.slane %v5744_v52, 9  ;;  %v10349_v11 = vcombine.low %v14493_v13, %v14527_v33  ;;  %v5844_v27 = vrot.slane %v5842_v44, 4  ;;  %v12794_v13 = vld [vmem:[%s16193_s4 + $0x98] sm:$0xff]  }
 0x3e0   : > { %11755 = vmatprep.subr.bf16.mxu1 %v12788_v7  ;;  %v14824_v59 = vsel %vm13451_vm5, %v5837_v3, %v5838_v60  ;;  %v5851_v3 = vrot.slane %v5849_v31, 4  ;;  %v5856_v60 = vrot.slane %v14665_v22, 5  ;;  %v10380_v52 = vrot.slane %v5747_v1, 9 }
 0x3e1   : > { %v14834_v12 = vsel %vm13451_vm5, %v10377_v50, %v5842_v44  ;;  %v14846_v33 = vsel %vm13451_vm5, %v5844_v27, %v5845_v37  ;;  %v5863_v50 = vrot.slane %v14676_v14, 5  ;;  %v5866_v27 = vrot.slane %v14686_v34, 5  ;;  %v12797_v34 = vld [vmem:[%s16193_s4 + $0xa0] sm:$0xff]  }
 0x3e2   : > { %v14854_v31 = vsel %vm13451_vm5, %v5851_v3, %v5852_v21  ;;  %v5858_v40 = vrot.slane %v5856_v60, 4  ;;  %v14860_v35 = vsel %vm13451_vm5, %v10379_v8, %v5856_v60  ;;  %v5873_v3 = vrot.slane %v14701_v62, 5 }
 0x3e3   : > { %11756 = vmatpush3.bf16.msra.mxu1 %v12788_v7  ;;  %v5859_v7 = vrot.slane %v14671_v58, 5  ;;  %v5865_v58 = vrot.slane %v5863_v50, 4  ;;  %v14869_v1 = vsel %vm13451_vm5, %v10380_v52, %v5863_v50  ;;  %v10381_v60 = vrot.slane %v5748_v46, 9 }
 0x3e4   : > { %11757 = vmatprep.subr.bf16.mxu1 %v12791_v47  ;;  %v5877_v52 = vrot.slane %v14712_v0, 5  ;;  %v10382_v62 = vrot.slane %v5749_v61, 9  ;;  %v5880_v50 = vrot.slane %v14716_v19, 5  ;;  %v10350_v37 = vcombine.low %v14539_v32, %v14541_v54  ;;  %v12800_v54 = vld [vmem:[%s16193_s4 + $0xa8] sm:$0xff]  }
 0x3e5   : > { %v14865_v21 = vsel %vm13451_vm5, %v5858_v40, %v5859_v7  ;;  %v5750_v40 = vld [vmem:[#allocation2 + $0xa8] sm:$0xe]  ;;  %v5884_v46 = vrot.slane %v14722_v42, 5  ;;  %v5887_v61 = vrot.slane %v14728_v10, 5  ;;  %v5891_v32 = vrot.slane %v14737_v57, 5 }
 0x3e6   : > { %11726 = vmatmul.mubr.bf16.gmra.mrb[24].mxu1 %v10348_v36  ;;  %v5870_v36 = vrot.slane %v14697_v28, 5  ;;  %v14899_v19 = vsel %vm13451_vm5, %v10382_v62, %v5877_v52  ;;  %v5894_v62 = vrot.slane %v14746_v17, 5  ;;  %v5800_v28 = vrot.slane %v14789_v55, 5 }
 0x3e7   : > { %11729 = vmatprep.mubr.bf16.mxu1 %v10349_v11  ;;  %11758 = vmatpush3.bf16.msra.mxu1 %v12791_v47  ;;  %v14880_v11 = vsel %vm13451_vm5, %v5865_v58, %v5866_v27  ;;  %v5879_v58 = vrot.slane %v5877_v52, 4  ;;  %v5751_v27 = vld [vmem:[#allocation2 + $0xb4] sm:$0xe]  ;;  %v5803_v42 = vrot.slane %v12899_v23, 5  ;;  %v5741_v23 = vld [vmem:[#allocation2 + $0x3c] sm:$0xe] }
 0x3e8   : > { %11759 = vmatprep.subr.bf16.mxu1 %v12794_v13  ;;  %v5872_v7 = vrot.slane %v5870_v36, 4  ;;  %v14890_v47 = vsel %vm13451_vm5, %v10381_v60, %v5870_v36  ;;  %v5886_v60 = vrot.slane %v5884_v46, 4  ;;  %v10384_v10 = vrot.slane %v5751_v27, 9 }
 0x3e9   : > { %v14910_v36 = vsel %vm13451_vm5, %v5879_v58, %v5880_v50  ;;  %v5788_v58 = vrot.slane %v5786_v26, 4  ;;  %v5796_v27 = vrot.slane %v12898_v45, 5  ;;  %v12810_v45 = vld [vmem:[%s16193_s4 + $0xd8] sm:$0xff]  }
 0x3ea   : > { %v14895_v8 = vsel %vm13451_vm5, %v5872_v7, %v5873_v3  ;;  %v10383_v3 = vrot.slane %v5750_v40, 9  ;;  %v5893_v7 = vrot.slane %v5891_v32, 4  ;;  %v14930_v17 = vsel %vm13451_vm5, %v10384_v10, %v5891_v32  ;;  %v12803_v40 = vld [vmem:[%s16193_s4 + $0xb0] sm:$0xff]   ;;  %v5738_v32 = vld [vmem:[#allocation2 + $0x18] sm:$0xe] }
 0x3eb   : > { %11760 = vmatpush3.bf16.msra.mxu1 %v12794_v13  ;;  %v14921_v13 = vsel %vm13451_vm5, %v5886_v60, %v5887_v61  ;;  %v5795_v61 = vrot.slane %v5793_v4, 4  ;;  %v10371_v43 = vrot.slane %v5738_v32, 9  ;;  %v10374_v32 = vrot.slane %v5741_v23, 9 }
 0x3ec   : > { %11761 = vmatprep.subr.bf16.mxu1 %v12797_v34  ;;  %v14917_v44 = vsel %vm13451_vm5, %v10383_v3, %v5884_v46  ;;  %v12897_v46 = vld [vmem:[#allocation2 + $0x8] sm:$0x1] }
 0x3ed   : > { %v5797_v60 = vsel %vm13451_vm5, %v5795_v61, %v5796_v27  ;;  %v12811_v61 = vld [vmem:[%s16193_s4 + $0xe0] sm:$0xff]  }
 0x3ee   : > { %11730 = vmatmul.mubr.bf16.gmra.mrb[28].mxu1 %v10350_v37  ;;  %v14934_v37 = vsel %vm13451_vm5, %v5893_v7, %v5894_v62  ;;  %v5801_v7 = vsel %vm13451_vm5, %v10371_v43, %v5800_v28  ;;  %v12808_v62 = vld [vmem:[%s16193_s4 + $0xc8] sm:$0xff]  }
 0x3ef   : > { %11733 = vmatprep.mubr.bf16.mxu1 %v10351_v30  ;;  %11762 = vmatpush3.bf16.msra.mxu1 %v12797_v34  ;;  %v12807_v30 = vld [vmem:[%s16193_s4 + $0xc0] sm:$0xff]   ;;  %v16391_v34 = vcombine.low %v14637_v38, %v14639_v24  ;;  %v5789_v38 = vrot.slane %v12897_v46, 5  ;;  %v16395_v24 = vcombine.low %v14707_v53, %v14712_v0  ;;  %v16397_v53 = vcombine.low %v14732_v51, %v14737_v57  ;;  %v5737_v0 = vld [vmem:[#allocation2 + $0xc] sm:$0xe]  ;;  %v12809_v46 = vld [vmem:[%s16193_s4 + $0xd0] sm:$0xff]  }
 0x3f0   : > { %11763 = vmatprep.subr.bf16.mxu1 %v12800_v54  ;;  %v10370_v3 = vrot.slane %v5737_v0, 9  ;;  %v5807_v51 = vrot.slane %v14798_v5, 5  ;;  %v12812_v43 = vld [vmem:[%s16193_s4 + $0xe8] sm:$0xff]  }
 0x3f1   : > { %v5790_v14 = vsel %vm13451_vm5, %v5788_v58, %v5789_v38 }
 0x3f2   : > { %v5794_v10 = vsel %vm13451_vm5, %v10370_v3, %v5793_v4  ;;  %v5809_v5 = vrot.slane %v5807_v51, 4 }
 0x3f3   : > { %11764 = vmatpush3.bf16.msra.mxu1 %v12800_v54  ;;  %v5802_v54 = vrot.slane %v5800_v28, 4  ;;  %v10402_v57 = vcombine.low %v5794_v10, %v5797_v60  ;;  %v12813_v10 = vld [vmem:[%s16193_s4 + $0xf0] sm:$0xff]  }
 0x3f4   : > { %11765 = vmatprep.subr.bf16.mxu1 %v12803_v40 }
 0x3f5   : > { %v5804_v55 = vsel %vm13451_vm5, %v5802_v54, %v5803_v42 }
 0x3f6   : > { %11734 = vmatmul.mubr.bf16.gmra.mrb[32].mxu1 %v10352_v2  ;;  %v5736_v2 = vld [vmem:[#allocation2] sm:$0xe] }
 0x3f7   : > { %11737 = vmatprep.mubr.bf16.mxu1 %v10353_v15  ;;  %11766 = vmatpush3.bf16.msra.mxu1 %v12803_v40  ;;  %v10369_v15 = vrot.slane %v5736_v2, 9  ;;  %v12900_v40 = vld [vmem:[#allocation2 + $0x34] sm:$0xf] }
 0x3f8   : > { %11767 = vmatprep.subr.bf16.mxu1 %v12806_v39 }
 0x3f9   : > { %v5787_v22 = vsel %vm13451_vm5, %v10369_v15, %v5786_v26  ;;  %v12902_v26 = vld [vmem:[#allocation2 + $0x38] sm:$0x1]  ;;  %v5740_v15 = vld [vmem:[#allocation2 + $0x30] sm:$0xe] }
 0x3fa   : > { %v10401_v29 = vcombine.low %v5787_v22, %v5790_v14  ;;  %v5817_v2 = vrot.slane %v12902_v26, 5  ;;  %v15044_v26 = vld [vmem:[#allocation2 + $0x50] sm:$0x1] }
 0x3fb   : > { %11768 = vmatpush3.bf16.msra.mxu1 %v12806_v39  ;;  %v5814_v39 = vrot.slane %v12900_v40, 5  ;;  %v7362_v40 = vld [vmem:[#allocation2 + $0x30] sm:$0xe] }
 0x3fc   : > { %11801 = vmatprep.subr.bf16.mxu1 %v12807_v30 }
 0x3fd   : > { %v5816_v58 = vrot.slane %v5814_v39, 4 }
 0x3fe   : > { %11738 = vmatmul.mubr.bf16.gmra.mrb[36].mxu1 %v16391_v34  ;;  %v10403_v34 = vcombine.low %v5801_v7, %v5804_v55  ;;  %v16398_v55 = vcombine.low %v14804_v25, %v14816_v16  ;;  %v15027_v7 = vld [vmem:[#allocation2 + $0x34] sm:$0xf]  ;;  %v12814_v25 = vld [vmem:[%s16193_s4 + $0xf8] sm:$0xff]  }
 0x3ff   : > { %11741 = vmatprep.mubr.bf16.mxu1 %v16392_v48  ;;  %v12901_v48 = vld [vmem:[#allocation2 + $0x2c] sm:$0x1]  ;;  %v5818_v22 = vsel %vm13451_vm5, %v5816_v58, %v5817_v2  ;;  %v15032_v16 = vld [vmem:[#allocation2 + $0x38] sm:$0x1]  ;;  %v7446_v58 = vrot.slane %v15027_v7, 5 }
 0x406   : > { %11742 = vmatmul.mubr.bf16.gmra.mrb[40].mxu1 %v16393_v18  ;;  %v5810_v18 = vrot.slane %v12901_v48, 5  ;;  %v15038_v48 = vld [vmem:[#allocation2 + $0x4c] sm:$0xf] }
 0x407   : > { %11745 = vmatprep.mubr.bf16.mxu1 %v16394_v63  ;;  %v5739_v63 = vld [vmem:[#allocation2 + $0x24] sm:$0xe] }
 0x408   : > { %v10372_v38 = vrot.slane %v5739_v63, 9  ;;  %v16399_v63 = vcombine.low %v14808_v56, %v14824_v59  ;;  %v15056_v56 = vld [vmem:[%s16193_s4 + $0x100] sm:$0xff]   ;;  %v15058_v59 = vld [vmem:[#allocation2 + $0x5c] sm:$0x1] }
 0x40a   : > { %v5808_v14 = vsel %vm13451_vm5, %v10372_v38, %v5807_v51  ;;  %v15023_v51 = vld [vmem:[#allocation2 + $0x28] sm:$0xf]  ;;  %v16400_v38 = vcombine.low %v14834_v12, %v14846_v33  ;;  %v7448_v33 = vrot.slane %v7446_v58, 4 }
 0x40e   : > { %11746 = vmatmul.mubr.bf16.gmra.mrb[44].mxu1 %v16395_v24  ;;  %v5811_v24 = vsel %vm13451_vm5, %v5809_v5, %v5810_v18  ;;  %v7439_v18 = vrot.slane %v15023_v51, 5 }
 0x40f   : > { %11749 = vmatprep.mubr.bf16.mxu1 %v16396_v49  ;;  %v10373_v49 = vrot.slane %v5740_v15, 9  ;;  %v10404_v4 = vcombine.low %v5808_v14, %v5811_v24  ;;  %v10508_v15 = vrot.slane %v7362_v40, 9  ;;  %v15051_v24 = vld [vmem:[#allocation2 + $0x58] sm:$0xf] }
 0x411   : > { %v5815_v28 = vsel %vm13451_vm5, %v10373_v49, %v5814_v39  ;;  %v15034_v39 = vld [vmem:[#allocation2 + $0x40] sm:$0xf]  ;;  %v7441_v49 = vrot.slane %v7439_v18, 4  ;;  %v15066_v12 = vsel %vm13451_vm5, %v10508_v15, %v7446_v58 }
 0x412   : > { %v10405_v27 = vcombine.low %v5815_v28, %v5818_v22  ;;  %v7364_v22 = vld [vmem:[#allocation2 + $0x48] sm:$0xe]  ;;  %v7453_v28 = vrot.slane %v15034_v39, 5 }
 0x416   : > { %11750 = vmatmul.mubr.bf16.gmra.mrb[48].mxu1 %v16397_v53  ;;  %v12904_v53 = vld [vmem:[#allocation2 + $0x44] sm:$0x1] }
 0x417   : > { %11769 = vmatprep.mubr.bf16.mxu1 %v10401_v29  ;;  %v5824_v0 = vrot.slane %v12904_v53, 5  ;;  %v15075_v53 = vld [vmem:[#allocation2 + $0x64] sm:$0xf] }
 0x418   : > { %v7474_v58 = vrot.slane %v15075_v53, 5 }
 0x41e   : > { %11770 = vmatmul.mubr.bf16.vlgmr.msra.gmra.mrb[20].mxu1 %v10402_v57  ;;  %v15025_v57 = vld [vmem:[#allocation2 + $0x2c] sm:$0x1] }
 0x41f   : > { %11773 = vmatprep.mubr.bf16.mxu1 %v10403_v34  ;;  %11802 = vmatpush3.bf16.msra.mxu1 %v12807_v30  ;;  %v12903_v30 = vld [vmem:[#allocation2 + $0x40] sm:$0xf]  ;;  %v15036_v34 = vld [vmem:[#allocation2 + $0x44] sm:$0x1]  ;;  %v7442_v5 = vrot.slane %v15025_v57, 5 }
 0x420   : > { %11803 = vmatprep.subr.bf16.mxu1 %v12808_v62  ;;  %v5821_v29 = vrot.slane %v12903_v30, 5  ;;  %v7449_v30 = vrot.slane %v15032_v16, 5 }
 0x422   : > { %v5823_v42 = vrot.slane %v5821_v29, 4  ;;  %v5822_v3 = vsel %vm13451_vm5, %v10374_v32, %v5821_v29  ;;  %v15071_v29 = vsel %vm13451_vm5, %v7441_v49, %v7442_v5  ;;  %v15081_v23 = vsel %vm13451_vm5, %v7448_v33, %v7449_v30  ;;  %v7366_v32 = vld [vmem:[#allocation2 + $0x60] sm:$0xe]  ;;  %v15112_v49 = vld [vmem:[#allocation2 + $0x7c] sm:$0xf] }
 0x423   : > { %11804 = vmatpush3.bf16.msra.mxu1 %v12808_v62  ;;  %v7361_v62 = vld [vmem:[#allocation2 + $0x24] sm:$0xe]  ;;  %v7470_v5 = vrot.slane %v15058_v59, 5  ;;  %v10512_v15 = vrot.slane %v7366_v32, 9 }
 0x424   : > { %11805 = vmatprep.subr.bf16.mxu1 %v12809_v46  ;;  %v5825_v54 = vsel %vm13451_vm5, %v5823_v42, %v5824_v0  ;;  %v10507_v2 = vrot.slane %v7361_v62, 9  ;;  %v10510_v42 = vrot.slane %v7364_v22, 9  ;;  %v15096_v62 = vld [vmem:[#allocation2 + $0x74] sm:$0x1]  ;;  %v6640_v22 = vld [vmem:[#allocation2 + $0x98] sm:$0x1] }
 0x425   : > { %v10406_v60 = vcombine.low %v5822_v3, %v5825_v54  ;;  %v15084_v54 = vld [vmem:[#allocation2 + $0x68] sm:$0x1]  ;;  %v15086_v3 = vld [vmem:[#allocation2 + $0x70] sm:$0xf]  ;;  %v6643_v0 = vld [vmem:[#allocation2 + $0xa4] sm:$0x1] }
 0x426   : > { %11774 = vmatmul.mubr.bf16.gmra.mrb[24].mxu1 %v10404_v4  ;;  %v15062_v14 = vsel %vm13451_vm5, %v10507_v2, %v7439_v18  ;;  %v7477_v32 = vrot.slane %v15084_v54, 5 }
 0x427   : > { %11777 = vmatprep.mubr.bf16.mxu1 %v10405_v27  ;;  %11806 = vmatpush3.bf16.msra.mxu1 %v12809_v46  ;;  %v7363_v46 = vld [vmem:[#allocation2 + $0x3c] sm:$0xe]  ;;  %v7365_v27 = vld [vmem:[#allocation2 + $0x54] sm:$0xe] }
 0x428   : > { %11807 = vmatprep.subr.bf16.mxu1 %v12810_v45  ;;  %v10509_v4 = vrot.slane %v7363_v46, 9  ;;  %v10511_v18 = vrot.slane %v7365_v27, 9  ;;  %v7367_v46 = vld [vmem:[#allocation2 + $0x6c] sm:$0xe]  ;;  %v7370_v27 = vld [vmem:[#allocation2 + $0x90] sm:$0xe] }
 0x42b   : > { %11808 = vmatpush3.bf16.msra.mxu1 %v12810_v45  ;;  %v7456_v45 = vrot.slane %v15036_v34, 5 }
 0x42c   : > { %11809 = vmatprep.subr.bf16.mxu1 %v12811_v61 }
 0x42e   : > { %11778 = vmatmul.mubr.bf16.gmra.mrb[28].mxu1 %v10406_v60  ;;  %v15158_v60 = vld [vmem:[#allocation2 + $0xa0] sm:$0xf] }
 0x42f   : > { %11781 = vmatprep.mubr.bf16.mxu1 %v16398_v55  ;;  %11810 = vmatpush3.bf16.msra.mxu1 %v12811_v61  ;;  %v7460_v61 = vrot.slane %v15038_v48, 5  ;;  %v7455_v55 = vrot.slane %v7453_v28, 4 }
 0x430   : > { %11811 = vmatprep.subr.bf16.mxu1 %v12812_v43 }
 0x431   : > { %v15100_v40 = vsel %vm13451_vm5, %v10510_v42, %v7460_v61  ;;  %v15105_v2 = vsel %vm13451_vm5, %v7455_v55, %v7456_v45  ;;  %v16406_v45 = vcombine.low %v14860_v35, %v14865_v21  ;;  %v15135_v42 = vsel %vm13451_vm5, %v10512_v15, %v7474_v58  ;;  %v15138_v55 = vld [vmem:[#allocation2 + $0x8c] sm:$0x1] }
 0x432   : > { %16401 = vst [vmem:[#allocation33_spill] sm:$0xff] %v15100_v40  ;;  %16402 = vst [vmem:[#allocation10_spill] sm:$0xff] %v15105_v2  ;;  %v10513_v21 = vrot.slane %v7367_v46, 9  ;;  %v7498_v50 = vrot.slane %v15138_v55, 5  ;;  %v9003_v2 = vld [vmem:[#allocation2 + $0x54] sm:$0xe] }
 0x433   : > { %11812 = vmatpush3.bf16.msra.mxu1 %v12812_v43  ;;  %v15092_v43 = vsel %vm13451_vm5, %v10509_v4, %v7453_v28  ;;  %v7368_v28 = vld [vmem:[#allocation2 + $0x78] sm:$0xe]  ;;  %16407 = vst [vmem:[#allocation13_spill] sm:$0xff] %v15135_v42  ;;  %v7371_v42 = vld [vmem:[#allocation2 + $0x9c] sm:$0xe] }
 0x434   : > { %11813 = vmatprep.subr.bf16.mxu1 %v12813_v10 }
 0x436   : > { %11782 = vmatmul.mubr.bf16.gmra.mrb[32].mxu1 %v16399_v63  ;;  %v7467_v63 = vrot.slane %v15051_v24, 5 }
 0x437   : > { %11785 = vmatprep.mubr.bf16.mxu1 %v16400_v38  ;;  %11814 = vmatpush3.bf16.msra.mxu1 %v12813_v10  ;;  %v7463_v10 = vrot.slane %v15044_v26, 5  ;;  %v16403_v38 = vcombine.low %v14838_v41, %v14854_v31  ;;  %v15127_v41 = vld [vmem:[#allocation2 + $0x80] sm:$0x1]  ;;  %v15129_v31 = vld [vmem:[#allocation2 + $0x88] sm:$0xf] }
 0x438   : > { %11815 = vmatprep.subr.bf16.mxu1 %v12814_v25  ;;  %v15122_v30 = vsel %vm13451_vm5, %v10511_v18, %v7467_v63  ;;  %v7469_v4 = vrot.slane %v7467_v63, 4  ;;  %v15146_v18 = vld [vmem:[#allocation2 + $0x94] sm:$0xf] }
 0x439   : > { %16405 = vst [vmem:[#allocation12_spill] sm:$0xff] %v15122_v30  ;;  %v7502_v52 = vrot.slane %v15146_v18, 5 }
 0x43a   : > { %v15142_v35 = vsel %vm13451_vm5, %v7469_v4, %v7470_v5  ;;  %v7491_v4 = vrot.slane %v15127_v41, 5 }
 0x43b   : > { %11816 = vmatpush3.bf16.msra.mxu1 %v12814_v25  ;;  %v7462_v25 = vrot.slane %v7460_v61, 4  ;;  %v7476_v61 = vrot.slane %v7474_v58, 4  ;;  %16408 = vst [vmem:[#allocation14_spill] sm:$0xff] %v15142_v35  ;;  %v10514_v58 = vrot.slane %v7368_v28, 9 }
 0x43c   : > { %11849 = vmatprep.subr.bf16.mxu1 %v15056_v56 }
 0x43d   : > { %v15118_v33 = vsel %vm13451_vm5, %v7462_v25, %v7463_v10  ;;  %v7481_v10 = vrot.slane %v15086_v3, 5  ;;  %v7484_v25 = vrot.slane %v15096_v62, 5  ;;  %v15152_v15 = vsel %vm13451_vm5, %v7476_v61, %v7477_v32 }
 0x43e   : > { %11786 = vmatmul.mubr.bf16.gmra.mrb[36].mxu1 %v16403_v38  ;;  %16404 = vst [vmem:[#allocation11_spill] sm:$0xff] %v15118_v33  ;;  %16409 = vst [vmem:[#allocation15_spill] sm:$0xff] %v15152_v15  ;;  %v7488_v38 = vrot.slane %v15112_v49, 5  ;;  %v7495_v32 = vrot.slane %v15129_v31, 5  ;;  %v6645_v15 = vld [vmem:[#allocation2 + $0xac] sm:$0xf] }
 0x43f   : > { %11789 = vmatprep.mubr.bf16.mxu1 %v16406_v45  ;;  %v7369_v45 = vld [vmem:[#allocation2 + $0x84] sm:$0xe]  ;;  %v7483_v46 = vrot.slane %v7481_v10, 4  ;;  %v15162_v63 = vsel %vm13451_vm5, %v10513_v21, %v7481_v10  ;;  %v7504_v21 = vrot.slane %v7502_v52, 4 }
 0x440   : > { %16410 = vst [vmem:[#allocation16_spill] sm:$0xff] %v15162_v63  ;;  %v15166_v28 = vsel %vm13451_vm5, %v10514_v58, %v7488_v38  ;;  %v7490_v61 = vrot.slane %v7488_v38, 4  ;;  %v10515_v20 = vrot.slane %v7369_v45, 9  ;;  %v7497_v58 = vrot.slane %v7495_v32, 4  ;;  %v6646_v45 = vld [vmem:[#allocation2 + $0xb0] sm:$0x1] }
 0x441   : > { %16411 = vst [vmem:[#allocation17_spill] sm:$0xff] %v15166_v28  ;;  %v15171_v5 = vsel %vm13451_vm5, %v7483_v46, %v7484_v25  ;;  %v10516_v38 = vrot.slane %v7370_v27, 9  ;;  %v16414_v25 = vcombine.low %v14869_v1, %v14880_v11  ;;  %v7372_v63 = vld [vmem:[#allocation2 + $0xa8] sm:$0xe]  ;;  %v6648_v27 = vld [vmem:[#allocation2 + $0xb8] sm:$0xf] }
 0x442   : > { %16412 = vst [vmem:[#allocation18_spill] sm:$0xff] %v15171_v5  ;;  %v15179_v10 = vsel %vm13451_vm5, %v7490_v61, %v7491_v4  ;;  %v15188_v35 = vsel %vm13451_vm5, %v10515_v20, %v7495_v32  ;;  %v7505_v5 = vrot.slane %v6640_v22, 5  ;;  %v16416_v4 = vcombine.low %v14890_v47, %v14895_v8  ;;  %v6649_v32 = vld [vmem:[#allocation2 + $0xbc] sm:$0x1]  ;;  %v7373_v46 = vld [vmem:[#allocation2 + $0xb4] sm:$0xe] }
 0x443   : > { %16413 = vst [vmem:[#allocation19_spill] sm:$0xff] %v15179_v10  ;;  %16415 = vst [vmem:[#allocation20_spill] sm:$0xff] %v15188_v35  ;;  %v15195_v1 = vsel %vm13451_vm5, %v7497_v58, %v7498_v50  ;;  %v15199_v11 = vsel %vm13451_vm5, %v10516_v38, %v7502_v52  ;;  %v7509_v61 = vrot.slane %v15158_v60, 5  ;;  %v7512_v20 = vrot.slane %v6643_v0, 5  ;;  %v6652_v10 = vld [vmem:[#allocation2 + $0xc8] sm:$0x1] }
 0x444   : > { %16417 = vst [vmem:[#allocation21_spill] sm:$0xff] %v15195_v1  ;;  %16418 = vst [vmem:[#allocation22_spill] sm:$0xff] %v15199_v11  ;;  %v15206_v47 = vsel %vm13451_vm5, %v7504_v21, %v7505_v5  ;;  %v10517_v8 = vrot.slane %v7371_v42, 9  ;;  %v10518_v52 = vrot.slane %v7372_v63, 9  ;;  %v7519_v38 = vrot.slane %v6646_v45, 5  ;;  %v12837_v33 = vld [vmem:[#allocation2 + $0xc0] sm:$0xff]  }
 0x445   : > { %16419 = vst [vmem:[#allocation23_spill] sm:$0xff] %v15206_v47  ;;  %v7511_v58 = vrot.slane %v7509_v61, 4  ;;  %v7523_v22 = vrot.slane %v6648_v27, 5  ;;  %v7374_v1 = vld [vmem:[#allocation2 + $0xc0] sm:$0xe]  ;;  %v7533_v50 = vrot.slane %v6652_v10, 5 }
 0x446   : > { %11790 = vmatmul.mubr.bf16.gmra.mrb[40].mxu1 %v16414_v25  ;;  %v6651_v25 = vld [vmem:[#allocation2 + $0xc4] sm:$0xf]  ;;  %v15212_v0 = vsel %vm13451_vm5, %v10517_v8, %v7509_v61  ;;  %v10519_v61 = vrot.slane %v7373_v46, 9  ;;  %v16427_v46 = vcombine.low %v14917_v44, %v14921_v13  ;;  %v12816_v44 = vld [vmem:[#allocation2 + $0x18] sm:$0xff]   ;;  %v12820_v13 = vld [vmem:[%s16193_s4 + $0x108] sm:$0xff]  }
 0x447   : > { %11793 = vmatprep.mubr.bf16.mxu1 %v16416_v4  ;;  %v7516_v4 = vrot.slane %v6645_v15, 5  ;;  %16420 = vst [vmem:[#allocation24_spill] sm:$0xff] %v15212_v0  ;;  %v15216_v5 = vsel %vm13451_vm5, %v7511_v58, %v7512_v20  ;;  %v7526_v15 = vrot.slane %v6649_v32, 5  ;;  %v7530_v63 = vrot.slane %v6651_v25, 5  ;;  %v12815_v25 = vld [vmem:[#allocation2 + $0xc] sm:$0xff]  }
 0x448   : > { %16421 = vst [vmem:[#allocation3_spill] sm:$0xff] %v15216_v5  ;;  %v7525_v27 = vrot.slane %v7523_v22, 4  ;;  %v10520_v20 = vrot.slane %v7374_v1, 9  ;;  %v15235_v32 = vsel %vm13451_vm5, %v10519_v61, %v7523_v22  ;;  %v16430_v22 = vcombine.low %v14930_v17, %v14934_v37  ;;  %v6606_v17 = vld [vmem:[#allocation2 + $0x10] sm:$0xf]  ;;  %v12826_v61 = vld [vmem:[%s16193_s4 + $0x118] sm:$0xff]  }
 0x449   : > { %v7518_v28 = vrot.slane %v7516_v4, 4  ;;  %v15220_v42 = vsel %vm13451_vm5, %v10518_v52, %v7516_v4  ;;  %v7532_v58 = vrot.slane %v7530_v63, 4  ;;  %v16424_v4 = vcombine.low %v14899_v19, %v14910_v36  ;;  %16425 = vst [vmem:[#allocation6_spill] sm:$0xff] %v15235_v32  ;;  %v12818_v52 = vld [vmem:[#allocation2 + $0x24] sm:$0xff]   ;;  %v15274_v1 = vld [vmem:[#allocation2 + $0x20] sm:$0x1] }
 0x44a   : > { %16422 = vst [vmem:[#allocation4_spill] sm:$0xff] %v15220_v42  ;;  %v15248_v10 = vsel %vm13451_vm5, %v10520_v20, %v7530_v63  ;;  %v12819_v63 = vld [vmem:[#allocation2 + $0x30] sm:$0xff]   ;;  %v6608_v20 = vld [vmem:[#allocation2 + $0x18] sm:$0xf]  ;;  %v6611_v21 = vld [vmem:[#allocation2 + $0x24] sm:$0xf] }
 0x44b   : > { %v15226_v45 = vsel %vm13451_vm5, %v7518_v28, %v7519_v38  ;;  %v15239_v28 = vsel %vm13451_vm5, %v7525_v27, %v7526_v15  ;;  %16428 = vst [vmem:[#allocation8_spill] sm:$0xff] %v15248_v10  ;;  %v15252_v19 = vsel %vm13451_vm5, %v7532_v58, %v7533_v50  ;;  %v12823_v50 = vld [vmem:[%s16193_s4 + $0x110] sm:$0xff]   ;;  %v6605_v38 = vld [vmem:[#allocation2 + $0xc] sm:$0xf]  ;;  %v12821_v27 = vld [vmem:[#allocation2 + $0x3c] sm:$0xff]   ;;  %v6667_v58 = vshrl.u32 %v6606_v17, 16 }
 0x44c   : > { %16423 = vst [vmem:[#allocation5_spill] sm:$0xff] %v15226_v45  ;;  %16426 = vst [vmem:[#allocation7_spill] sm:$0xff] %v15239_v28  ;;  %v6654_v37 = vshrl.u32 %v6605_v38, 16  ;;  %v6657_v15 = vshll.u32 %v6605_v38, 16  ;;  %v6705_v10 = vshll.u32 %v6611_v21, 16  ;;  %v12825_v45 = vld [vmem:[#allocation2 + $0x60] sm:$0xff]  }
 0x44d   : > { %16429 = vst [vmem:[#allocation9_spill] sm:$0xff] %v15252_v19  ;;  %v6669_v36 = vrot.slane %v6667_v58, 4  ;;  %v6739_v42 = vshrl.u32 %v15027_v7, 16 }
 0x44e   : > { %11794 = vmatmul.mubr.bf16.gmra.mrb[44].mxu1 %v16424_v4  ;;  %v6656_v4 = vrot.slane %v6654_v37, 4  ;;  %v12822_v37 = vld [vmem:[#allocation2 + $0x48] sm:$0xff]  }
 0x44f   : > { %11797 = vmatprep.mubr.bf16.mxu1 %v16427_v46  ;;  %v6659_v46 = vrot.slane %v6657_v15, 5  ;;  %v12832_v15 = vld [vmem:[%s16193_s4 + $0x128] sm:$0xff]  }
 0x456   : > { %11798 = vmatmul.mubr.bf16.gmra.mrb[48].mxu1 %v16430_v22  ;;  %v6609_v22 = vld [vmem:[#allocation2 + $0x1c] sm:$0xf] }
 0x457   : > { %11817 = vmatprep.mubr.bf16.mxu1 %v12815_v25  ;;  %v12829_v25 = vld [vmem:[%s16193_s4 + $0x120] sm:$0xff]  }
 0x45e   : > { %11818 = vmatmul.mubr.bf16.vlgmr.msra.gmra.mrb[20].mxu1 %v12816_v44  ;;  %v6678_v44 = vshrl.u32 %v6608_v20, 16 }
 0x45f   : > { %11821 = vmatprep.mubr.bf16.mxu1 %v12818_v52  ;;  %11850 = vmatpush3.bf16.msra.mxu1 %v15056_v56  ;;  %v6663_v56 = vshll.u32 %v6606_v17, 16  ;;  %v15272_v52 = vld [vmem:[#allocation2 + $0x14] sm:$0x1]  ;;  %v6687_v17 = vshll.u32 %v6609_v22, 16 }
 0x460   : > { %11851 = vmatprep.subr.bf16.mxu1 %v12820_v13  ;;  %v6673_v19 = vshll.u32 %v15272_v52, 16 }
 0x461   : > { %v6665_v38 = vrot.slane %v6663_v56, 5 }
 0x462   : > { %v6675_v28 = vrot.slane %v6673_v19, 5  ;;  %v6707_v19 = vrot.slane %v6705_v10, 5 }
 0x463   : > { %11852 = vmatpush3.bf16.msra.mxu1 %v12820_v13  ;;  %v6681_v13 = vshll.u32 %v6608_v20, 16  ;;  %v12824_v20 = vld [vmem:[#allocation2 + $0x54] sm:$0xff]   ;;  %v6670_v56 = vor.u32 %v6669_v36, %v6665_v38  ;;  %v6614_v36 = vld [vmem:[#allocation2 + $0x30] sm:$0xf] }
 0x464   : > { %11853 = vmatprep.subr.bf16.mxu1 %v12823_v50 }
 0x465   : > { %v6683_v8 = vrot.slane %v6681_v13, 5 }
 0x466   : > { %11822 = vmatmul.mubr.bf16.gmra.mrb[24].mxu1 %v12819_v63  ;;  %v6660_v63 = vor.u32 %v6659_v46, %v6656_v4  ;;  %v15281_v4 = vrot.slane %v6687_v17, 5 }
 0x467   : > { %11825 = vmatprep.mubr.bf16.mxu1 %v12821_v27  ;;  %11854 = vmatpush3.bf16.msra.mxu1 %v12823_v50  ;;  %v6691_v50 = vshrl.u32 %v6609_v22, 16  ;;  %v6680_v27 = vrot.slane %v6678_v44, 4  ;;  %v6702_v22 = vshrl.u32 %v6611_v21, 16  ;;  %v12835_v44 = vld [vmem:[%s16193_s4 + $0x130] sm:$0xff]   ;;  %v12838_v21 = vld [vmem:[%s16193_s4 + $0x138] sm:$0xff]  }
 0x468   : > { %11855 = vmatprep.subr.bf16.mxu1 %v12826_v61  ;;  %v6661_v58 = vrot.slane %v6660_v63, 4  ;;  %v6671_v63 = vrot.slane %v6670_v56, 4 }
 0x469   : > { %v6693_v46 = vrot.slane %v6691_v50, 4  ;;  %v6684_v13 = vor.u32 %v6683_v8, %v6680_v27  ;;  %v6704_v50 = vrot.slane %v6702_v22, 4  ;;  %v6715_v27 = vshrl.u32 %v15023_v51, 16 }
 0x46a   : > { %v6676_v56 = vsel %vm13086_vm2, %v6671_v63, %v6675_v28  ;;  %v6735_v22 = vshll.u32 %v15027_v7, 16  ;;  %v6759_v63 = vshll.u32 %v15034_v39, 16 }
 0x46b   : > { %11856 = vmatpush3.bf16.msra.mxu1 %v12826_v61  ;;  %v6697_v61 = vshll.u32 %v15274_v1, 16  ;;  %v6694_v17 = vor.u32 %v6693_v46, %v15281_v4  ;;  %v15294_v8 = vrot.slane %v6684_v13, 4  ;;  %v6729_v46 = vshll.u32 %v6614_v36, 16 }
 0x46c   : > { %11857 = vmatprep.subr.bf16.mxu1 %v12829_v25  ;;  %v6708_v7 = vor.u32 %v6707_v19, %v6704_v50  ;;  %v6783_v50 = vshll.u32 %v15038_v48, 16  ;;  %v6787_v19 = vshrl.u32 %v15038_v48, 16 }
 0x46d   : > { %v15286_v32 = vrot.slane %v6697_v61, 5  ;;  %v6721_v61 = vshll.u32 %v15025_v57, 16  ;;  %v6690_v57 = vsel %vm13086_vm2, %v15294_v8, %v15281_v4 }
 0x46e   : > { %11826 = vmatmul.mubr.bf16.gmra.mrb[28].mxu1 %v12822_v37  ;;  %v6617_v37 = vld [vmem:[#allocation2 + $0x3c] sm:$0xf]  ;;  %v6789_v35 = vrot.slane %v6787_v19, 4 }
 0x46f   : > { %11829 = vmatprep.mubr.bf16.mxu1 %v12824_v20  ;;  %11858 = vmatpush3.bf16.msra.mxu1 %v12829_v25  ;;  %v6666_v25 = vsel %vm13086_vm2, %v6661_v58, %v6665_v38  ;;  %v6620_v20 = vld [vmem:[#allocation2 + $0x48] sm:$0xf]  ;;  %v12827_v38 = vld [vmem:[#allocation2 + $0x6c] sm:$0xff]   ;;  %v6726_v58 = vshrl.u32 %v6614_v36, 16  ;;  %v6750_v13 = vshrl.u32 %v6617_v37, 16  ;;  %v6753_v5 = vshll.u32 %v6617_v37, 16 }
 0x470   : > { %11859 = vmatprep.subr.bf16.mxu1 %v12832_v15  ;;  %v15303_v10 = vcombine.low %v6666_v25, %v6676_v56  ;;  %v6774_v0 = vshrl.u32 %v6620_v20, 16  ;;  %v6777_v47 = vshll.u32 %v6620_v20, 16  ;;  %v6731_v25 = vrot.slane %v6729_v46, 5  ;;  %v6623_v37 = vld [vmem:[#allocation2 + $0x54] sm:$0xf]  ;;  %v12830_v46 = vld [vmem:[#allocation2 + $0x84] sm:$0xff]  }
 0x471   : > { %v6728_v36 = vrot.slane %v6726_v58, 4  ;;  %v15318_v20 = vrot.slane %v6735_v22, 5  ;;  %v6752_v4 = vrot.slane %v6750_v13, 4  ;;  %v6755_v8 = vrot.slane %v6753_v5, 5 }
 0x472   : > { %v6776_v56 = vrot.slane %v6774_v0, 4  ;;  %v6779_v11 = vrot.slane %v6777_v47, 5  ;;  %v6798_v58 = vshrl.u32 %v6623_v37, 16  ;;  %v15328_v5 = vrot.slane %v6708_v7, 4 }
 0x473   : > { %11860 = vmatpush3.bf16.msra.mxu1 %v12832_v15  ;;  %v6711_v15 = vshll.u32 %v15023_v51, 16  ;;  %v6695_v51 = vrot.slane %v6694_v17, 4  ;;  %v6763_v17 = vshrl.u32 %v15034_v39, 16  ;;  %v15326_v39 = vrot.slane %v6721_v61, 5 }
 0x474   : > { %11861 = vmatprep.subr.bf16.mxu1 %v12835_v44  ;;  %v15331_v0 = vrot.slane %v6759_v63, 5  ;;  %v6732_v48 = vor.u32 %v6731_v25, %v6728_v36  ;;  %v6769_v13 = vshll.u32 %v15036_v34, 16  ;;  %v6756_v61 = vor.u32 %v6755_v8, %v6752_v4  ;;  %v6626_v25 = vld [vmem:[#allocation2 + $0x60] sm:$0xf] }
 0x475   : > { %v15314_v28 = vrot.slane %v6711_v15, 5  ;;  %v12828_v15 = vld [vmem:[#allocation2 + $0x78] sm:$0xff]   ;;  %v6800_v7 = vrot.slane %v6798_v58, 4  ;;  %v6811_v63 = vshrl.u32 %v15051_v24, 16  ;;  %v6793_v8 = vshll.u32 %v15044_v26, 16 }
 0x476   : > { %11830 = vmatmul.mubr.bf16.gmra.mrb[32].mxu1 %v12825_v45  ;;  %v15312_v45 = vld [vmem:[%s16193_s4 + $0x140] sm:$0xff]  }
 0x477   : > { %11833 = vmatprep.mubr.bf16.mxu1 %v12827_v38  ;;  %11862 = vmatpush3.bf16.msra.mxu1 %v12835_v44  ;;  %v6717_v44 = vrot.slane %v6715_v27, 4  ;;  %v6741_v38 = vrot.slane %v6739_v42, 4  ;;  %v6700_v27 = vsel %vm13086_vm2, %v6695_v51, %v15286_v32  ;;  %v6801_v42 = vshll.u32 %v6623_v37, 16 }
 0x478   : > { %11863 = vmatprep.subr.bf16.mxu1 %v12838_v21  ;;  %v6745_v32 = vshll.u32 %v15032_v16, 16  ;;  %v6780_v51 = vor.u32 %v6779_v11, %v6776_v56  ;;  %v6785_v37 = vrot.slane %v6783_v50, 5  ;;  %v6714_v16 = vsel %vm13086_vm2, %v15328_v5, %v15314_v28 }
 0x479   : > { %v6718_v47 = vor.u32 %v6717_v44, %v15314_v28  ;;  %v6742_v22 = vor.u32 %v6741_v38, %v15318_v20  ;;  %v6803_v30 = vrot.slane %v6801_v42, 5  ;;  %v6807_v44 = vshll.u32 %v15051_v24, 16  ;;  %v12833_v28 = vld [vmem:[#allocation2 + $0x9c] sm:$0xff]  }
 0x47a   : > { %v6733_v11 = vrot.slane %v6732_v48, 4  ;;  %v6747_v4 = vrot.slane %v6745_v32, 5  ;;  %v6757_v56 = vrot.slane %v6756_v61, 4  ;;  %v6771_v50 = vrot.slane %v6769_v13, 5 }
 0x47b   : > { %11864 = vmatpush3.bf16.msra.mxu1 %v12838_v21  ;;  %v6765_v21 = vrot.slane %v6763_v17, 4  ;;  %v15338_v17 = vcombine.low %v6690_v57, %v6700_v27  ;;  %v6719_v36 = vrot.slane %v6718_v47, 4  ;;  %v6743_v38 = vrot.slane %v6742_v22, 4  ;;  %v12831_v57 = vld [vmem:[#allocation2 + $0x90] sm:$0xff]   ;;  %v6629_v22 = vld [vmem:[#allocation2 + $0x6c] sm:$0xf] }
 0x47c   : > { %11897 = vmatprep.subr.bf16.mxu1 %v15312_v45  ;;  %v6781_v19 = vrot.slane %v6780_v51, 4  ;;  %v6790_v24 = vor.u32 %v6789_v35, %v6785_v37  ;;  %v15346_v27 = vrot.slane %v6807_v44, 5  ;;  %v6813_v58 = vrot.slane %v6811_v63, 4  ;;  %v15371_v44 = vld [vmem:[#allocation2 + $0x1c] sm:$0xf] }
 0x47d   : > { %v6766_v34 = vor.u32 %v6765_v21, %v15331_v0  ;;  %v6822_v42 = vshrl.u32 %v6626_v25, 16  ;;  %v6825_v5 = vshll.u32 %v6626_v25, 16  ;;  %v6831_v47 = vshll.u32 %v15075_v53, 16  ;;  %16431 = vst [vmem:[#allocation25_spill] sm:$0xff] %v15371_v44  ;;  %v15379_v25 = vld [vmem:[#allocation2 + $0x20] sm:$0x1] }
 0x47e   : > { %11834 = vmatmul.mubr.bf16.gmra.mrb[36].mxu1 %v12828_v15  ;;  %v6804_v15 = vor.u32 %v6803_v30, %v6800_v7  ;;  %v6835_v21 = vshrl.u32 %v15075_v53, 16  ;;  %v6724_v26 = vsel %vm13086_vm2, %v6719_v36, %v15326_v39  ;;  %v6738_v30 = vsel %vm13086_vm2, %v6733_v11, %v15318_v20  ;;  %16432 = vst [vmem:[#allocation26_spill] sm:$0xff] %v15379_v25 }
 0x47f   : > { %11837 = vmatprep.mubr.bf16.mxu1 %v12830_v46  ;;  %v6767_v46 = vrot.slane %v6766_v34, 4  ;;  %v6748_v35 = vsel %vm13086_vm2, %v6743_v38, %v6747_v4  ;;  %v6795_v48 = vrot.slane %v6793_v8, 5  ;;  %v6762_v32 = vsel %vm13086_vm2, %v6757_v56, %v15331_v0  ;;  %v15389_v4 = vld [vmem:[#allocation2 + $0x28] sm:$0xf]  ;;  %v15391_v8 = vld [vmem:[#allocation2 + $0x2c] sm:$0x1] }
 0x480   : > { %v6786_v39 = vsel %vm13086_vm2, %v6781_v19, %v6785_v37  ;;  %v6817_v13 = vshll.u32 %v15058_v59, 16  ;;  %v6791_v61 = vrot.slane %v6790_v24, 4  ;;  %v15366_v20 = vrot.slane %v6804_v15, 4  ;;  %16433 = vst [vmem:[#allocation27_spill] sm:$0xff] %v15389_v4  ;;  %16434 = vst [vmem:[#allocation28_spill] sm:$0xff] %v15391_v8 }
 0x481   : > { %v6772_v53 = vsel %vm13086_vm2, %v6767_v46, %v6771_v50  ;;  %v6814_v51 = vor.u32 %v6813_v58, %v15346_v27  ;;  %v15369_v7 = vrot.slane %v6822_v42, 4  ;;  %v15373_v63 = vrot.slane %v6825_v5, 5  ;;  %v8998_v56 = vld [vmem:[#allocation2 + $0x18] sm:$0xe]  ;;  %v12834_v50 = vld [vmem:[#allocation2 + $0xa8] sm:$0xff]  }
 0x482   : > { %v15375_v0 = vrot.slane %v6831_v47, 5  ;;  %v15377_v36 = vrot.slane %v6835_v21, 4  ;;  %v6846_v34 = vshrl.u32 %v6629_v22, 16  ;;  %v15381_v37 = vcombine.low %v6714_v16, %v6724_v26  ;;  %v8999_v15 = vld [vmem:[#allocation2 + $0x24] sm:$0xe]  ;;  %v12836_v58 = vld [vmem:[#allocation2 + $0xb4] sm:$0xff]  }
 0x483   : > { %v15383_v59 = vcombine.low %v6738_v30, %v6748_v35  ;;  %v15385_v11 = vcombine.low %v6762_v32, %v6772_v53  ;;  %v6796_v38 = vsel %vm13086_vm2, %v6791_v61, %v6795_v48  ;;  %v15395_v24 = vrot.slane %v6817_v13, 5  ;;  %v15404_v46 = vld [vmem:[#allocation2 + $0x34] sm:$0xf]  ;;  %v15415_v48 = vld [vmem:[#allocation2 + $0x38] sm:$0x1] }
 0x484   : > { %v15393_v19 = vcombine.low %v6786_v39, %v6796_v38  ;;  %v6855_v16 = vshll.u32 %v15086_v3, 16  ;;  %16435 = vst [vmem:[#allocation29_spill] sm:$0xff] %v15404_v46  ;;  %v9064_v5 = vrot.slane %v15371_v44, 5  ;;  %v9067_v47 = vrot.slane %v15379_v25, 5  ;;  %16436 = vst [vmem:[#allocation30_spill] sm:$0xff] %v15415_v48 }
 0x485   : > { %v15413_v35 = vrot.slane %v6846_v34, 4  ;;  %v8255_v32 = vld [vmem:[#allocation2 + $0x44] sm:$0x1]  ;;  %v15419_v53 = vld [vmem:[#allocation2 + $0x78] sm:$0xf]  ;;  %v10641_v39 = vrot.slane %v8998_v56, 9 }
 0x486   : > { %11838 = vmatmul.mubr.bf16.gmra.mrb[40].mxu1 %v12831_v57  ;;  %v6849_v57 = vshll.u32 %v6629_v22, 16  ;;  %v15417_v22 = vld [vmem:[#allocation2 + $0x40] sm:$0xf]  ;;  %v9066_v13 = vrot.slane %v9064_v5, 4  ;;  %v10642_v61 = vrot.slane %v8999_v15, 9  ;;  %v15424_v42 = vrot.slane %v6855_v16, 5 }
 0x487   : > { %11841 = vmatprep.mubr.bf16.mxu1 %v12833_v28  ;;  %v15402_v28 = vrot.slane %v6814_v51, 4  ;;  %16437 = vst [vmem:[#allocation31_spill] sm:$0xff] %v15417_v22  ;;  %v9071_v51 = vrot.slane %v15389_v4, 5  ;;  %v9000_v38 = vld [vmem:[#allocation2 + $0x30] sm:$0xe]  ;;  %v9074_v30 = vrot.slane %v15391_v8, 5  ;;  %v15432_v56 = vsel %vm13451_vm5, %v10641_v39, %v9064_v5 }
 0x488   : > { %v15422_v26 = vrot.slane %v6849_v57, 5  ;;  %v9001_v21 = vld [vmem:[#allocation2 + $0x3c] sm:$0xe]  ;;  %v15428_v25 = vld [vmem:[#allocation2 + $0x4c] sm:$0xf]  ;;  %16439 = vst [vmem:[#allocation34_spill] sm:$0xff] %v15432_v56  ;;  %v15436_v15 = vsel %vm13451_vm5, %v9066_v13, %v9067_v47 }
 0x489   : > { %16438 = vst [vmem:[#allocation32_spill] sm:$0xff] %v15428_v25  ;;  %16440 = vst [vmem:[#allocation35_spill] sm:$0xff] %v15436_v15  ;;  %v15440_v57 = vsel %vm13451_vm5, %v10642_v61, %v9071_v51  ;;  %v9073_v16 = vrot.slane %v9071_v51, 4  ;;  %v8261_v34 = vld [vmem:[#allocation2 + $0x5c] sm:$0x1]  ;;  %v10643_v4 = vrot.slane %v9000_v38, 9 }
 0x48a   : > { %16441 = vst [vmem:[#allocation36_spill] sm:$0xff] %v15440_v57  ;;  %v9078_v44 = vrot.slane %v15404_v46, 5  ;;  %v9081_v5 = vrot.slane %v15415_v48, 5  ;;  %v10644_v39 = vrot.slane %v9001_v21, 9  ;;  %v9085_v13 = vrot.slane %v15417_v22, 5 }
 0x48b   : > { %v15450_v47 = vsel %vm13451_vm5, %v9073_v16, %v9074_v30  ;;  %v9088_v61 = vrot.slane %v8255_v32, 5  ;;  %v9002_v51 = vld [vmem:[#allocation2 + $0x48] sm:$0xe]  ;;  %v15455_v8 = vld [vmem:[#allocation2 + $0x64] sm:$0xf] }
 0x48c   : > { %16443 = vst [vmem:[#allocation38_spill] sm:$0xff] %v15450_v47  ;;  %v9080_v15 = vrot.slane %v9078_v44, 4  ;;  %v8264_v30 = vld [vmem:[#allocation2 + $0x68] sm:$0x1]  ;;  %v8266_v16 = vld [vmem:[#allocation2 + $0x70] sm:$0xf]  ;;  %v15462_v21 = vsel %vm13451_vm5, %v10643_v4, %v9078_v44  ;;  %v15466_v32 = vsel %vm13451_vm5, %v10644_v39, %v9085_v13 }
 0x48d   : > { %16444 = vst [vmem:[#allocation39_spill] sm:$0xff] %v15462_v21  ;;  %16445 = vst [vmem:[#allocation40_spill] sm:$0xff] %v15466_v32  ;;  %v9087_v40 = vrot.slane %v9085_v13, 4  ;;  %v10645_v38 = vrot.slane %v9002_v51, 9  ;;  %v9092_v47 = vrot.slane %v15428_v25, 5  ;;  %v9102_v13 = vrot.slane %v8261_v34, 5 }
 0x48e   : > { %11842 = vmatmul.mubr.bf16.gmra.mrb[44].mxu1 %v12834_v50  ;;  %v8258_v50 = vld [vmem:[#allocation2 + $0x50] sm:$0x1]  ;;  %v15470_v22 = vsel %vm13451_vm5, %v9080_v15, %v9081_v5  ;;  %v9004_v57 = vld [vmem:[#allocation2 + $0x60] sm:$0xe]  ;;  %v8267_v48 = vld [vmem:[#allocation2 + $0x74] sm:$0x1] }
 0x48f   : > { %11845 = vmatprep.mubr.bf16.mxu1 %v12836_v58  ;;  %v15442_v58 = vld [vmem:[#allocation2 + $0x58] sm:$0xf]  ;;  %16446 = vst [vmem:[#allocation41_spill] sm:$0xff] %v15470_v22  ;;  %v9095_v56 = vrot.slane %v8258_v50, 5  ;;  %v15477_v4 = vsel %vm13451_vm5, %v9087_v40, %v9088_v61  ;;  %v9005_v46 = vld [vmem:[#allocation2 + $0x6c] sm:$0xe] }
 0x490   : > { %16442 = vst [vmem:[#allocation37_spill] sm:$0xff] %v15442_v58  ;;  %16447 = vst [vmem:[#allocation42_spill] sm:$0xff] %v15477_v4  ;;  %v9099_v39 = vrot.slane %v15442_v58, 5  ;;  %v8269_v15 = vld [vmem:[#allocation2 + $0x7c] sm:$0xf]  ;;  %v9094_v5 = vrot.slane %v9092_v47, 4 }
 0x491   : > { %v10646_v51 = vrot.slane %v9003_v2, 9  ;;  %v8270_v44 = vld [vmem:[#allocation2 + $0x80] sm:$0x1]  ;;  %v8272_v22 = vld [vmem:[#allocation2 + $0x88] sm:$0xf]  ;;  %v10647_v61 = vrot.slane %v9004_v57, 9 }
 0x492   : > { %v9101_v40 = vrot.slane %v9099_v39, 4  ;;  %v9106_v21 = vrot.slane %v15455_v8, 5  ;;  %v9109_v34 = vrot.slane %v8264_v30, 5  ;;  %v10648_v58 = vrot.slane %v9005_v46, 9  ;;  %v9006_v4 = vld [vmem:[#allocation2 + $0x78] sm:$0xe] }
 0x493   : > { %v9113_v25 = vrot.slane %v8266_v16, 5  ;;  %v9116_v50 = vrot.slane %v8267_v48, 5  ;;  %v8273_v32 = vld [vmem:[#allocation2 + $0x8c] sm:$0x1]  ;;  %v9120_v46 = vrot.slane %v8269_v15, 5  ;;  %v9123_v2 = vrot.slane %v8270_v44, 5 }
 0x494   : > { %v15500_v57 = vsel %vm13451_vm5, %v9101_v40, %v9102_v13  ;;  %v9108_v30 = vrot.slane %v9106_v21, 4  ;;  %v15506_v48 = vsel %vm13451_vm5, %v10647_v61, %v9106_v21  ;;  %v12840_v13 = vld [vmem:[%s16193_s4 + $0x148] sm:$0xff]   ;;  %v10649_v40 = vrot.slane %v9006_v4, 9  ;;  %v8278_v21 = vld [vmem:[#allocation2 + $0xa0] sm:$0xf] }
 0x495   : > { %16450 = vst [vmem:[#allocation45_spill] sm:$0xff] %v15500_v57  ;;  %v15510_v16 = vsel %vm13451_vm5, %v10648_v58, %v9113_v25  ;;  %v9008_v57 = vld [vmem:[#allocation2 + $0x90] sm:$0xe]  ;;  %v8279_v61 = vld [vmem:[#allocation2 + $0xa4] sm:$0x1]  ;;  %v9122_v4 = vrot.slane %v9120_v46, 4 }
 0x496   : > { %11846 = vmatmul.mubr.bf16.gmra.mrb[48].mxu1 %v12837_v33  ;;  %v15485_v33 = vsel %vm13451_vm5, %v10645_v38, %v9092_v47  ;;  %v8275_v38 = vld [vmem:[#allocation2 + $0x94] sm:$0xf]  ;;  %v15496_v47 = vsel %vm13451_vm5, %v10646_v51, %v9099_v39  ;;  %16451 = vst [vmem:[#allocation46_spill] sm:$0xff] %v15510_v16  ;;  %v9007_v39 = vld [vmem:[#allocation2 + $0x84] sm:$0xe]  ;;  %v15517_v51 = vsel %vm13451_vm5, %v9108_v30, %v9109_v34 }
 0x497   : > { %11865 = vmatprep.mubr.bf16.mxu1 %v15303_v10  ;;  %v15490_v10 = vsel %vm13451_vm5, %v9094_v5, %v9095_v56  ;;  %16449 = vst [vmem:[#allocation44_spill] sm:$0xff] %v15496_v47  ;;  %v8276_v56 = vld [vmem:[#allocation2 + $0x98] sm:$0x1]  ;;  %v9115_v5 = vrot.slane %v9113_v25, 4  ;;  %v9127_v47 = vrot.slane %v8272_v22, 5  ;;  %v15530_v44 = vsel %vm13451_vm5, %v10649_v40, %v9120_v46 }
 0x498   : > { %16448 = vst [vmem:[#allocation43_spill] sm:$0xff] %v15490_v10  ;;  %v9130_v10 = vrot.slane %v8273_v32, 5  ;;  %v10650_v15 = vrot.slane %v9007_v39, 9  ;;  %v9009_v30 = vld [vmem:[#allocation2 + $0x9c] sm:$0xe]  ;;  %v10651_v22 = vrot.slane %v9008_v57, 9  ;;  %v15539_v46 = vsel %vm13451_vm5, %v9122_v4, %v9123_v2 }
 0x499   : > { %v15523_v25 = vsel %vm13451_vm5, %v9115_v5, %v9116_v50  ;;  %v8281_v50 = vld [vmem:[#allocation2 + $0xac] sm:$0xf]  ;;  %v9129_v5 = vrot.slane %v9127_v47, 4  ;;  %v9134_v32 = vrot.slane %v8275_v38, 5  ;;  %v9137_v58 = vrot.slane %v8276_v56, 5  ;;  %16453 = vst [vmem:[#allocation48_spill] sm:$0xff] %v15539_v46 }
 0x49a   : > { %16452 = vst [vmem:[#allocation47_spill] sm:$0xff] %v15523_v25  ;;  %v8282_v34 = vld [vmem:[#allocation2 + $0xb0] sm:$0x1]  ;;  %v9144_v39 = vrot.slane %v8279_v61, 5  ;;  %v8284_v40 = vld [vmem:[#allocation2 + $0xb8] sm:$0xf]  ;;  %v6852_v2 = vor.u32 %v15422_v26, %v15413_v35 }
 0x49b   : > { %v8285_v57 = vld [vmem:[#allocation2 + $0xbc] sm:$0x1]  ;;  %v15549_v56 = vsel %vm13451_vm5, %v9129_v5, %v9130_v10  ;;  %v9136_v25 = vrot.slane %v9134_v32, 4  ;;  %v10652_v16 = vrot.slane %v9009_v30, 9  ;;  %v8287_v4 = vld [vmem:[#allocation2 + $0xc4] sm:$0xf] }
 0x49c   : > { %16455 = vst [vmem:[#allocation50_spill] sm:$0xff] %v15549_v56  ;;  %v8288_v38 = vld [vmem:[#allocation2 + $0xc8] sm:$0x1]  ;;  %v9148_v26 = vrot.slane %v8281_v50, 5  ;;  %v9151_v35 = vrot.slane %v8282_v34, 5 }
 0x49d   : > { %v15561_v10 = vsel %vm13451_vm5, %v9136_v25, %v9137_v58  ;;  %v9011_v5 = vld [vmem:[#allocation2 + $0xb4] sm:$0xe]  ;;  %v9155_v58 = vrot.slane %v8284_v40, 5  ;;  %v9158_v25 = vrot.slane %v8285_v57, 5  ;;  %v6635_v40 = vld [vmem:[#allocation2 + $0x84] sm:$0xf] }
 0x49e   : > { %11866 = vmatmul.mubr.bf16.vlgmr.msra.gmra.mrb[20].mxu1 %v15338_v17  ;;  %v12841_v17 = vld [vmem:[%s16193_s4 + $0x150] sm:$0xff]   ;;  %16456 = vst [vmem:[#allocation51_spill] sm:$0xff] %v15561_v10  ;;  %v9150_v56 = vrot.slane %v9148_v26, 4  ;;  %v9165_v10 = vrot.slane %v8288_v38, 5 }
 0x49f   : > { %11869 = vmatprep.mubr.bf16.mxu1 %v15381_v37  ;;  %11898 = vmatpush3.bf16.msra.mxu1 %v15312_v45  ;;  %v15543_v37 = vsel %vm13451_vm5, %v10650_v15, %v9127_v47  ;;  %v9141_v45 = vrot.slane %v8278_v21, 5  ;;  %v15557_v21 = vsel %vm13451_vm5, %v10651_v22, %v9134_v32  ;;  %v9010_v15 = vld [vmem:[#allocation2 + $0xa8] sm:$0xe]  ;;  %v12842_v22 = vld [vmem:[%s16193_s4 + $0x158] sm:$0xff]   ;;  %v9012_v47 = vld [vmem:[#allocation2 + $0xc0] sm:$0xe] }
 0x4a0   : > { %11899 = vmatprep.subr.bf16.mxu1 %v12840_v13  ;;  %16454 = vst [vmem:[#allocation49_spill] sm:$0xff] %v15543_v37  ;;  %v10654_v37 = vrot.slane %v9011_v5, 9  ;;  %v9157_v46 = vrot.slane %v9155_v58, 4  ;;  %v15589_v57 = vsel %vm13451_vm5, %v9150_v56, %v9151_v35  ;;  %v16458_v56 = vshrl.u32 %v15419_v53, 16  ;;  %v16523_v9 = vld [vmem:[#allocation43_spill] sm:$0xff] }
 0x4a1   : > { %v9143_v61 = vrot.slane %v9141_v45, 4  ;;  %v15565_v30 = vsel %vm13451_vm5, %v10652_v16, %v9141_v45  ;;  %v16457_v16 = vshrl.u32 %v15086_v3, 16  ;;  %v10653_v45 = vrot.slane %v9010_v15, 9 }
 0x4a2   : > { %v15602_v38 = vsel %vm13451_vm5, %v9157_v46, %v9158_v25  ;;  %v16459_v15 = vshll.u32 %v15419_v53, 16  ;;  %v6883_v35 = vshrl.u32 %v15112_v49, 16  ;;  %v6820_v53 = vsel %vm13086_vm2, %v15402_v28, %v15395_v24 }
 0x4a3   : > { %11900 = vmatpush3.bf16.msra.mxu1 %v12840_v13  ;;  %v15574_v32 = vsel %vm13451_vm5, %v9143_v61, %v9144_v39  ;;  %v6861_v50 = vrot.slane %v16457_v16, 4  ;;  %v9162_v13 = vrot.slane %v8287_v4, 5  ;;  %v6879_v39 = vshll.u32 %v15112_v49, 16 }
 0x4a4   : > { %11901 = vmatprep.subr.bf16.mxu1 %v12841_v17  ;;  %v10684_v34 = vcombine.low %v15565_v30, %v15574_v32  ;;  %v15585_v3 = vsel %vm13451_vm5, %v10653_v45, %v9148_v26  ;;  %v10655_v61 = vrot.slane %v9012_v47, 9  ;;  %v6872_v47 = vrot.slane %v16458_v56, 4  ;;  %v12937_v30 = vld [vmem:[%s13095_s15] sm:$0xf] }
 0x4a5   : > { %v9164_v4 = vrot.slane %v9162_v13, 4  ;;  %v6875_v26 = vrot.slane %v16459_v15, 5  ;;  %v6894_v16 = vshrl.u32 %v6635_v40, 16  ;;  %v6897_v45 = vshll.u32 %v6635_v40, 16 }
 0x4a6   : > { %11870 = vmatmul.mubr.bf16.gmra.mrb[24].mxu1 %v15383_v59  ;;  %v12843_v59 = vld [vmem:[%s16193_s4 + $0x160] sm:$0xff]   ;;  %v16460_v49 = vor.u32 %v15373_v63, %v15369_v7  ;;  %v16461_v25 = vshll.u32 %v15084_v54, 16  ;;  %v6903_v24 = vshll.u32 %v15129_v31, 16  ;;  %v6907_v7 = vshrl.u32 %v15129_v31, 16  ;;  %v6638_v63 = vld [vmem:[#allocation2 + $0x90] sm:$0xf] }
 0x4a7   : > { %11873 = vmatprep.mubr.bf16.mxu1 %v15385_v11  ;;  %11902 = vmatpush3.bf16.msra.mxu1 %v12841_v17  ;;  %v10685_v11 = vcombine.low %v15585_v3, %v15589_v57  ;;  %v15598_v17 = vsel %vm13451_vm5, %v10654_v37, %v9155_v58  ;;  %v15613_v37 = vsel %vm13451_vm5, %v10655_v61, %v9162_v13  ;;  %v12844_v54 = vld [vmem:[%s16193_s4 + $0x168] sm:$0xff]   ;;  %v6853_v56 = vrot.slane %v6852_v2, 4  ;;  %v12939_v57 = vld [vmem:[%s13095_s15 + $0x14] sm:$0xf] }
 0x4a8   : > { %11903 = vmatprep.subr.bf16.mxu1 %v12842_v22  ;;  %v10686_v5 = vcombine.low %v15598_v17, %v15602_v38  ;;  %v15617_v46 = vsel %vm13451_vm5, %v9164_v4, %v9165_v10  ;;  %v6829_v58 = vrot.slane %v16460_v49, 4  ;;  %v6843_v40 = vrot.slane %v16461_v25, 5  ;;  %v6641_v25 = vld [vmem:[#allocation2 + $0x9c] sm:$0xf]  ;;  %v12940_v17 = vld [vmem:[%s13095_s15 + $0x8] sm:$0xf] }
 0x4a9   : > { %v10687_v13 = vcombine.low %v15613_v37, %v15617_v46  ;;  %v16462_v10 = vsel %vm13086_vm2, %v15366_v20, %v15346_v27  ;;  %v6862_v4 = vor.u32 %v6861_v50, %v15424_v42  ;;  %v16463_v28 = vor.u32 %v15377_v36, %v15375_v0 }
 0x4aa   : > { %v10487_v61 = vcombine.low %v16462_v10, %v6820_v53  ;;  %v16464_v27 = vshll.u32 %v15096_v62, 16  ;;  %v6876_v15 = vor.u32 %v6875_v26, %v6872_v47  ;;  %v15647_v50 = vrot.slane %v6879_v39, 5 }
 0x4ab   : > { %11904 = vmatpush3.bf16.msra.mxu1 %v12842_v22  ;;  %v6839_v22 = vrot.slane %v16463_v28, 4  ;;  %v6885_v53 = vrot.slane %v6883_v35, 4  ;;  %v6896_v31 = vrot.slane %v6894_v16, 4  ;;  %v6899_v49 = vrot.slane %v6897_v45, 5  ;;  %v12845_v35 = vld [vmem:[%s16193_s4 + $0x170] sm:$0xff]  }
 0x4ac   : > { %11905 = vmatprep.subr.bf16.mxu1 %v12843_v59  ;;  %v6867_v20 = vrot.slane %v16464_v27, 5  ;;  %v6834_v10 = vsel %vm13086_vm2, %v6829_v58, %v15375_v0  ;;  %v6918_v62 = vshrl.u32 %v6638_v63, 16  ;;  %v6921_v2 = vshll.u32 %v6638_v63, 16  ;;  %v12846_v27 = vld [vmem:[%s16193_s4 + $0x178] sm:$0xff]  }
 0x4ad   : > { %v6844_v36 = vsel %vm13086_vm2, %v6839_v22, %v6843_v40  ;;  %v6863_v47 = vrot.slane %v6862_v4, 4  ;;  %v15655_v39 = vrot.slane %v6903_v24, 5  ;;  %v6909_v26 = vrot.slane %v6907_v7, 4 }
 0x4ae   : > { %11874 = vmatmul.mubr.bf16.gmra.mrb[28].mxu1 %v15393_v19  ;;  %v6889_v19 = vshll.u32 %v15127_v41, 16  ;;  %v6858_v0 = vsel %vm13086_vm2, %v6853_v56, %v15424_v42  ;;  %v6877_v16 = vrot.slane %v6876_v15, 4  ;;  %v6942_v45 = vshrl.u32 %v6641_v25, 16 }
 0x4af   : > { %11877 = vmatprep.mubr.bf16.mxu1 %v10487_v61  ;;  %11906 = vmatpush3.bf16.msra.mxu1 %v12843_v59  ;;  %v6945_v59 = vshll.u32 %v6641_v25, 16  ;;  %v6868_v58 = vsel %vm13086_vm2, %v6863_v47, %v6867_v20  ;;  %v6886_v41 = vor.u32 %v6885_v53, %v15647_v50  ;;  %v6900_v40 = vor.u32 %v6899_v49, %v6896_v31  ;;  %v6644_v31 = vld [vmem:[#allocation2 + $0xa8] sm:$0xf] }
 0x4b0   : > { %11907 = vmatprep.subr.bf16.mxu1 %v12844_v54  ;;  %v6913_v61 = vshll.u32 %v15138_v55, 16  ;;  %v6920_v4 = vrot.slane %v6918_v62, 4  ;;  %v6923_v24 = vrot.slane %v6921_v2, 5  ;;  %v6927_v7 = vshll.u32 %v15146_v18, 16  ;;  %v6647_v2 = vld [vmem:[#allocation2 + $0xb4] sm:$0xf] }
 0x4b1   : > { %v6931_v63 = vshrl.u32 %v15146_v18, 16  ;;  %v10488_v28 = vcombine.low %v6834_v10, %v6844_v36  ;;  %v10489_v42 = vcombine.low %v6858_v0, %v6868_v58  ;;  %v6891_v22 = vrot.slane %v6889_v19, 5  ;;  %v12905_v0 = vld [vmem:[#allocation2 + $0x98] sm:$0x1] }
 0x4b2   : > { %v6910_v56 = vor.u32 %v6909_v26, %v15655_v39  ;;  %v6944_v20 = vrot.slane %v6942_v45, 4  ;;  %v6947_v15 = vrot.slane %v6945_v59, 5  ;;  %v6951_v55 = vshll.u32 %v15158_v60, 16 }
 0x4b3   : > { %11908 = vmatpush3.bf16.msra.mxu1 %v12844_v54  ;;  %v6955_v53 = vshrl.u32 %v15158_v60, 16  ;;  %v6882_v18 = vsel %vm13086_vm2, %v6877_v16, %v15647_v50  ;;  %v6887_v54 = vrot.slane %v6886_v41, 4  ;;  %v6901_v49 = vrot.slane %v6900_v40, 4  ;;  %v15683_v50 = vld [vmem:[%s16193_s4 + $0x180] sm:$0xff]  }
 0x4b4   : > { %11909 = vmatprep.subr.bf16.mxu1 %v12845_v35  ;;  %v6915_v25 = vrot.slane %v6913_v61, 5  ;;  %v6924_v10 = vor.u32 %v6923_v24, %v6920_v4  ;;  %v6929_v36 = vrot.slane %v6927_v7, 5  ;;  %v6933_v62 = vrot.slane %v6931_v63, 4  ;;  %v12906_v63 = vld [vmem:[#allocation2 + $0xa4] sm:$0x1] }
 0x4b5   : > { %v6892_v47 = vsel %vm13086_vm2, %v6887_v54, %v6891_v22  ;;  %v6911_v19 = vrot.slane %v6910_v56, 4  ;;  %v6966_v60 = vshrl.u32 %v6644_v31, 16  ;;  %v6969_v26 = vshll.u32 %v6644_v31, 16  ;;  %v12907_v56 = vld [vmem:[#allocation2 + $0xac] sm:$0xf] }
 0x4b6   : > { %11878 = vmatmul.mubr.bf16.gmra.mrb[32].mxu1 %v10488_v28  ;;  %v6937_v16 = vshll.u32 %v12905_v0, 16  ;;  %v6948_v45 = vor.u32 %v6947_v15, %v6944_v20  ;;  %v6953_v59 = vrot.slane %v6951_v55, 5  ;;  %v6957_v58 = vrot.slane %v6955_v53, 4 }
 0x4b7   : > { %11881 = vmatprep.mubr.bf16.mxu1 %v10489_v42  ;;  %11910 = vmatpush3.bf16.msra.mxu1 %v12845_v35  ;;  %v10490_v41 = vcombine.low %v6882_v18, %v6892_v47  ;;  %v6906_v35 = vsel %vm13086_vm2, %v6901_v49, %v15655_v39  ;;  %v6990_v40 = vshrl.u32 %v6647_v2, 16  ;;  %v6993_v61 = vshll.u32 %v6647_v2, 16  ;;  %v12908_v49 = vld [vmem:[#allocation2 + $0xb8] sm:$0xf] }
 0x4b8   : > { %11911 = vmatprep.subr.bf16.mxu1 %v12846_v27  ;;  %v6916_v4 = vsel %vm13086_vm2, %v6911_v19, %v6915_v25  ;;  %v6925_v24 = vrot.slane %v6924_v10, 4  ;;  %v6934_v7 = vor.u32 %v6933_v62, %v6929_v36  ;;  %v6961_v28 = vshll.u32 %v12906_v63, 16  ;;  %v6650_v62 = vld [vmem:[#allocation2 + $0xc0] sm:$0xf] }
 0x4b9   : > { %v6968_v42 = vrot.slane %v6966_v60, 4  ;;  %v6971_v22 = vrot.slane %v6969_v26, 5  ;;  %v6975_v20 = vshll.u32 %v12907_v56, 16  ;;  %v6979_v15 = vshrl.u32 %v12907_v56, 16 }
 0x4ba   : > { %v10491_v55 = vcombine.low %v6906_v35, %v6916_v4  ;;  %v6939_v53 = vrot.slane %v6937_v16, 5  ;;  %v6949_v39 = vrot.slane %v6948_v45, 4  ;;  %v6958_v31 = vor.u32 %v6957_v58, %v6953_v59 }
 0x4bb   : > { %11912 = vmatpush3.bf16.msra.mxu1 %v12846_v27  ;;  %v6992_v18 = vrot.slane %v6990_v40, 4  ;;  %v6995_v54 = vrot.slane %v6993_v61, 5  ;;  %v6999_v25 = vshll.u32 %v12908_v49, 16  ;;  %v7003_v10 = vshrl.u32 %v12908_v49, 16 }
 0x4bc   : > { %11945 = vmatprep.subr.bf16.mxu1 %v15683_v50  ;;  %v6935_v27 = vrot.slane %v6934_v7, 4  ;;  %v6963_v2 = vrot.slane %v6961_v28, 5  ;;  %v6930_v47 = vsel %vm13086_vm2, %v6925_v24, %v6929_v36  ;;  %v6972_v19 = vor.u32 %v6971_v22, %v6968_v42  ;;  %v12909_v36 = vld [vmem:[#allocation2 + $0xb0] sm:$0x1]  ;;  %v12910_v22 = vld [vmem:[#allocation2 + $0xbc] sm:$0x1] }
 0x4bd   : > { %v6977_v60 = vrot.slane %v6975_v20, 5  ;;  %v6981_v26 = vrot.slane %v6979_v15, 4  ;;  %v6954_v0 = vsel %vm13086_vm2, %v6949_v39, %v6953_v59  ;;  %v6959_v16 = vrot.slane %v6958_v31, 4  ;;  %v12911_v15 = vld [vmem:[#allocation2 + $0xc4] sm:$0xf] }
 0x4be   : > { %11882 = vmatmul.mubr.bf16.gmra.mrb[36].mxu1 %v10490_v41  ;;  %v7014_v45 = vshrl.u32 %v6650_v62, 16  ;;  %v7017_v58 = vshll.u32 %v6650_v62, 16  ;;  %v6940_v41 = vsel %vm13086_vm2, %v6935_v27, %v6939_v53  ;;  %v6996_v35 = vor.u32 %v6995_v54, %v6992_v18 }
 0x4bf   : > { %11885 = vmatprep.mubr.bf16.mxu1 %v10491_v55  ;;  %v7001_v40 = vrot.slane %v6999_v25, 5  ;;  %v7005_v61 = vrot.slane %v7003_v10, 4  ;;  %v10492_v4 = vcombine.low %v6930_v47, %v6940_v41  ;;  %v6964_v7 = vsel %vm13086_vm2, %v6959_v16, %v6963_v2 }
 0x4c0   : > { %v6985_v24 = vshll.u32 %v12909_v36, 16  ;;  %v10493_v63 = vcombine.low %v6954_v0, %v6964_v7  ;;  %v6973_v28 = vrot.slane %v6972_v19, 4  ;;  %v6982_v42 = vor.u32 %v6981_v26, %v6977_v60  ;;  %v12912_v26 = vld [vmem:[#allocation2 + $0xc8] sm:$0x1]  ;;  %v7359_v7 = vld [vmem:[#allocation2 + $0xc] sm:$0xe] }
 0x4c1   : > { %v7009_v59 = vshll.u32 %v12910_v22, 16  ;;  %v7016_v56 = vrot.slane %v7014_v45, 4  ;;  %v7019_v20 = vrot.slane %v7017_v58, 5  ;;  %v7023_v55 = vshll.u32 %v12911_v15, 16  ;;  %v12913_v58 = vld [vmem:[#allocation2 + $0x10] sm:$0xf] }
 0x4c2   : > { %v7027_v39 = vshrl.u32 %v12911_v15, 16  ;;  %v6997_v53 = vrot.slane %v6996_v35, 4  ;;  %v7006_v31 = vor.u32 %v7005_v61, %v7001_v40  ;;  %v6987_v18 = vrot.slane %v6985_v24, 5 }
 0x4c3   : > { %v6978_v54 = vsel %vm13086_vm2, %v6973_v28, %v6977_v60  ;;  %v7011_v49 = vrot.slane %v7009_v59, 5  ;;  %v6983_v25 = vrot.slane %v6982_v42, 4  ;;  %v7020_v10 = vor.u32 %v7019_v20, %v7016_v56  ;;  %v12914_v59 = vld [vmem:[#allocation2 + $0x1c] sm:$0xf] }
 0x4c4   : > { %v7025_v62 = vrot.slane %v7023_v55, 5  ;;  %v7029_v27 = vrot.slane %v7027_v39, 4  ;;  %v7002_v2 = vsel %vm13086_vm2, %v6997_v53, %v7001_v40  ;;  %v7007_v47 = vrot.slane %v7006_v31, 4  ;;  %v7360_v39 = vld [vmem:[#allocation2 + $0x18] sm:$0xe] }
 0x4c5   : > { %v6988_v19 = vsel %vm13086_vm2, %v6983_v25, %v6987_v18  ;;  %v7033_v0 = vshll.u32 %v12912_v26, 16  ;;  %v7425_v60 = vrot.slane %v12913_v58, 5  ;;  %v7021_v35 = vrot.slane %v7020_v10, 4  ;;  %v12848_v25 = vld [vmem:[%s16193_s4 + $0x188] sm:$0xff]   ;;  %v12849_v10 = vld [vmem:[%s16193_s4 + $0x190] sm:$0xff]   ;;  %v16476_v58 = vld [vmem:[#allocation15_spill] sm:$0xff] }
 0x4c6   : > { %11886 = vmatmul.mubr.bf16.gmra.mrb[40].mxu1 %v10492_v4  ;;  %v10494_v16 = vcombine.low %v6978_v54, %v6988_v19  ;;  %v7012_v45 = vsel %vm13086_vm2, %v7007_v47, %v7011_v49  ;;  %v7030_v61 = vor.u32 %v7029_v27, %v7025_v62  ;;  %v7428_v4 = vrot.slane %v15272_v52, 5  ;;  %v16469_v47 = vld [vmem:[#allocation33_spill] sm:$0xff]  ;;  %v16470_v19 = vld [vmem:[#allocation11_spill] sm:$0xff]  ;;  %v16473_v26 = vld [vmem:[#allocation14_spill] sm:$0xff] }
 0x4c7   : > { %11889 = vmatprep.mubr.bf16.mxu1 %v10493_v63  ;;  %v10495_v41 = vcombine.low %v7002_v2, %v7012_v45  ;;  %v7035_v40 = vrot.slane %v7033_v0, 5  ;;  %v7427_v36 = vrot.slane %v7425_v60, 4  ;;  %v7026_v24 = vsel %vm13086_vm2, %v7021_v35, %v7025_v62  ;;  %v12850_v62 = vld [vmem:[%s16193_s4 + $0x198] sm:$0xff]   ;;  %v12852_v2 = vld [vmem:[%s16193_s4 + $0x1a8] sm:$0xff]   ;;  %v12853_v0 = vld [vmem:[%s16193_s4 + $0x1b0] sm:$0xff]  }
 0x4c8   : > { %v7031_v63 = vrot.slane %v7030_v61, 4  ;;  %v10505_v28 = vrot.slane %v7359_v7, 9  ;;  %v7432_v56 = vrot.slane %v12914_v59, 5  ;;  %v7435_v55 = vrot.slane %v15274_v1, 5  ;;  %v16475_v45 = vld [vmem:[#allocation13_spill] sm:$0xff]  ;;  %v16479_v35 = vld [vmem:[#allocation18_spill] sm:$0xff] }
 0x4c9   : > { %v7429_v42 = vsel %vm13451_vm5, %v7427_v36, %v7428_v4  ;;  %v10506_v31 = vrot.slane %v7360_v39, 9  ;;  %v16465_v1 = vcombine.low %v15062_v14, %v15071_v29  ;;  %v16466_v27 = vcombine.low %v15066_v12, %v15081_v23  ;;  %v16467_v14 = vld [vmem:[#allocation10_spill] sm:$0xff]  ;;  %v16472_v23 = vld [vmem:[#allocation12_spill] sm:$0xff]  ;;  %v16482_v7 = vld [vmem:[#allocation19_spill] sm:$0xff] }
 0x4ca   : > { %v7036_v22 = vsel %vm13086_vm2, %v7031_v63, %v7035_v40  ;;  %v7426_v52 = vsel %vm13451_vm5, %v10505_v28, %v7425_v60  ;;  %v7434_v53 = vrot.slane %v7432_v56, 4  ;;  %v16468_v29 = vcombine.low %v15092_v43, %v16467_v14  ;;  %v12857_v4 = vld [vmem:[%s16193_s4 + $0x1c0] sm:$0xff]   ;;  %v16481_v40 = vld [vmem:[#allocation17_spill] sm:$0xff]  ;;  %v12863_v14 = vld [vmem:[%s16193_s4 + $0x1d0] sm:$0xff]  }
 0x4cb   : > { %v10496_v20 = vcombine.low %v7026_v24, %v7036_v22  ;;  %v10537_v15 = vcombine.low %v7426_v52, %v7429_v42  ;;  %v7433_v54 = vsel %vm13451_vm5, %v10506_v31, %v7432_v56  ;;  %v16471_v12 = vcombine.low %v16469_v47, %v16470_v19  ;;  %v16484_v24 = vld [vmem:[#allocation20_spill] sm:$0xff]  ;;  %v16485_v63 = vld [vmem:[#allocation21_spill] sm:$0xff]  ;;  %v16487_v42 = vld [vmem:[#allocation22_spill] sm:$0xff] }
 0x4cc   : > { %v7436_v18 = vsel %vm13451_vm5, %v7434_v53, %v7435_v55  ;;  %v16474_v43 = vcombine.low %v16472_v23, %v16473_v26  ;;  %v16477_v60 = vcombine.low %v16475_v45, %v16476_v58  ;;  %v16483_v36 = vcombine.low %v16481_v40, %v16482_v7  ;;  %v16488_v22 = vld [vmem:[#allocation23_spill] sm:$0xff]  ;;  %v16490_v56 = vld [vmem:[#allocation24_spill] sm:$0xff]  ;;  %v16494_v55 = vld [vmem:[#allocation5_spill] sm:$0xff] }
 0x4cd   : > { %v10538_v49 = vcombine.low %v7433_v54, %v7436_v18  ;;  %v16486_v28 = vcombine.low %v16484_v24, %v16485_v63  ;;  %v16489_v59 = vcombine.low %v16487_v42, %v16488_v22  ;;  %v16496_v53 = vld [vmem:[#allocation6_spill] sm:$0xff]  ;;  %v16497_v31 = vld [vmem:[#allocation7_spill] sm:$0xff]  ;;  %v12869_v47 = vld [vmem:[%s16193_s4 + $0x1e0] sm:$0xff]   ;;  %v9496_v32 = vunpack.c.l.bf16 %v12937_v30 }
 0x4ce   : > { %11890 = vmatmul.mubr.bf16.gmra.mrb[44].mxu1 %v10494_v16  ;;  %v12854_v16 = vld [vmem:[%s16193_s4 + $0x1b8] sm:$0xff]   ;;  %v16498_v18 = vcombine.low %v16496_v53, %v16497_v31  ;;  %v12864_v23 = vld [vmem:[#allocation2 + $0x60] sm:$0xff]   ;;  %v12875_v26 = vld [vmem:[%s16193_s4 + $0x1f0] sm:$0xff]   ;;  %v9498_v38 = vunpack.c.l.bf16 %v12940_v17 }
 0x4cf   : > { %11893 = vmatprep.mubr.bf16.mxu1 %v10495_v41  ;;  %v16478_v41 = vld [vmem:[#allocation16_spill] sm:$0xff]  ;;  %v12855_v54 = vld [vmem:[#allocation2 + $0x18] sm:$0xff]   ;;  %v16502_v40 = vld [vmem:[#allocation25_spill] sm:$0xff]  ;;  %v9593_v46 = vrot.slane %v9496_v32, 1 }
 0x4d0   : > { %v16480_v61 = vcombine.low %v16478_v41, %v16479_v35  ;;  %v12862_v19 = vld [vmem:[#allocation2 + $0x54] sm:$0xff]   ;;  %v15812_v58 = vld [vmem:[%s16193_s4 + $0x200] sm:$0xff]   ;;  %v8302_v7 = vshll.u32 %v16502_v40, 16 }
 0x4d1   : > { %v8244_v45 = vld [vmem:[#allocation2 + $0x18] sm:$0xf]  ;;  %v12868_v35 = vld [vmem:[#allocation2 + $0x84] sm:$0xff]   ;;  %v12950_v30 = vld [vmem:[%s13095_s15 + $0x34] sm:$0xf] }
 0x4d2   : > { %v8296_v41 = vshll.u32 %v8244_v45, 16  ;;  %v16503_v22 = vld [vmem:[#allocation27_spill] sm:$0xff]  ;;  %v9509_v32 = vunpack.c.l.bf16 %v12950_v30 }
 0x4d4   : > { %v8298_v63 = vrot.slane %v8296_v41, 5 }
 0x4d6   : > { %11894 = vmatmul.mubr.bf16.gmra.mrb[48].mxu1 %v10496_v20  ;;  %v16491_v20 = vld [vmem:[#allocation3_spill] sm:$0xff] }
 0x4d7   : > { %11913 = vmatprep.mubr.bf16.mxu1 %v10537_v15  ;;  %v16492_v52 = vcombine.low %v16490_v56, %v16491_v20  ;;  %v16493_v15 = vld [vmem:[#allocation4_spill] sm:$0xff]  ;;  %v8330_v56 = vshrl.u32 %v16503_v22, 16  ;;  %v8304_v20 = vrot.slane %v8302_v7, 5 }
 0x4d8   : > { %v16495_v39 = vcombine.low %v16493_v15, %v16494_v55  ;;  %v12871_v55 = vld [vmem:[#allocation2 + $0x9c] sm:$0xff]  }
 0x4de   : > { %11914 = vmatmul.mubr.bf16.vlgmr.msra.gmra.mrb[20].mxu1 %v10538_v49  ;;  %v16499_v49 = vld [vmem:[#allocation8_spill] sm:$0xff] }
 0x4df   : > { %11917 = vmatprep.mubr.bf16.mxu1 %v16465_v1  ;;  %11946 = vmatpush3.bf16.msra.mxu1 %v15683_v50  ;;  %v12851_v50 = vld [vmem:[%s16193_s4 + $0x1a0] sm:$0xff]  }
 0x4e0   : > { %11947 = vmatprep.subr.bf16.mxu1 %v12848_v25 }
 0x4e3   : > { %11948 = vmatpush3.bf16.msra.mxu1 %v12848_v25  ;;  %v16500_v25 = vld [vmem:[#allocation9_spill] sm:$0xff] }
 0x4e4   : > { %11949 = vmatprep.subr.bf16.mxu1 %v12849_v10  ;;  %v16501_v1 = vcombine.low %v16499_v49, %v16500_v25  ;;  %v12873_v49 = vld [vmem:[#allocation2 + $0xa8] sm:$0xff]  }
 0x4e6   : > { %11918 = vmatmul.mubr.bf16.gmra.mrb[24].mxu1 %v16466_v27  ;;  %v12858_v27 = vld [vmem:[#allocation2 + $0x30] sm:$0xff]  }
 0x4e7   : > { %11921 = vmatprep.mubr.bf16.mxu1 %v16468_v29  ;;  %11950 = vmatpush3.bf16.msra.mxu1 %v12849_v10  ;;  %v12856_v10 = vld [vmem:[#allocation2 + $0x24] sm:$0xff]   ;;  %v12859_v29 = vld [vmem:[#allocation2 + $0x3c] sm:$0xff]  }
 0x4e8   : > { %11951 = vmatprep.subr.bf16.mxu1 %v12850_v62 }
 0x4eb   : > { %11952 = vmatpush3.bf16.msra.mxu1 %v12850_v62  ;;  %v12860_v62 = vld [vmem:[%s16193_s4 + $0x1c8] sm:$0xff]  }
 0x4ec   : > { %11953 = vmatprep.subr.bf16.mxu1 %v12851_v50 }
 0x4ee   : > { %11922 = vmatmul.mubr.bf16.gmra.mrb[28].mxu1 %v16471_v12  ;;  %v12872_v12 = vld [vmem:[%s16193_s4 + $0x1e8] sm:$0xff]  }
 0x4ef   : > { %11925 = vmatprep.mubr.bf16.mxu1 %v16474_v43  ;;  %11954 = vmatpush3.bf16.msra.mxu1 %v12851_v50  ;;  %v12866_v50 = vld [vmem:[%s16193_s4 + $0x1d8] sm:$0xff]   ;;  %v12865_v43 = vld [vmem:[#allocation2 + $0x6c] sm:$0xff]  }
 0x4f0   : > { %11955 = vmatprep.subr.bf16.mxu1 %v12852_v2 }
 0x4f3   : > { %11956 = vmatpush3.bf16.msra.mxu1 %v12852_v2  ;;  %v12861_v2 = vld [vmem:[#allocation2 + $0x48] sm:$0xff]  }
 0x4f4   : > { %11957 = vmatprep.subr.bf16.mxu1 %v12853_v0 }
 0x4f6   : > { %11926 = vmatmul.mubr.bf16.gmra.mrb[32].mxu1 %v16477_v60  ;;  %v8293_v60 = vshrl.u32 %v8244_v45, 16 }
 0x4f7   : > { %11929 = vmatprep.mubr.bf16.mxu1 %v16480_v61  ;;  %11958 = vmatpush3.bf16.msra.mxu1 %v12853_v0  ;;  %v12878_v0 = vld [vmem:[%s16193_s4 + $0x1f8] sm:$0xff]   ;;  %v12870_v61 = vld [vmem:[#allocation2 + $0x90] sm:$0xff]  }
 0x4f8   : > { %11959 = vmatprep.subr.bf16.mxu1 %v12854_v16  ;;  %v8295_v24 = vrot.slane %v8293_v60, 4 }
 0x4fa   : > { %v8299_v15 = vor.u32 %v8298_v63, %v8295_v24  ;;  %v12876_v24 = vld [vmem:[#allocation2 + $0xc0] sm:$0xff]  }
 0x4fb   : > { %11960 = vmatpush3.bf16.msra.mxu1 %v12854_v16  ;;  %v12867_v16 = vld [vmem:[#allocation2 + $0x78] sm:$0xff]  }
 0x4fc   : > { %11993 = vmatprep.subr.bf16.mxu1 %v12857_v4 }
 0x4fe   : > { %11930 = vmatmul.mubr.bf16.gmra.mrb[36].mxu1 %v16483_v36  ;;  %v8306_v36 = vshrl.u32 %v16502_v40, 16 }
 0x4ff   : > { %11933 = vmatprep.mubr.bf16.mxu1 %v16486_v28 }
 0x506   : > { %11934 = vmatmul.mubr.bf16.gmra.mrb[40].mxu1 %v16489_v59  ;;  %v8326_v59 = vshll.u32 %v16503_v22, 16 }
 0x507   : > { %11937 = vmatprep.mubr.bf16.mxu1 %v16492_v52  ;;  %v8308_v52 = vrot.slane %v8306_v36, 4 }
 0x508   : > { %v15820_v25 = vrot.slane %v8326_v59, 5 }
 0x50e   : > { %11938 = vmatmul.mubr.bf16.gmra.mrb[44].mxu1 %v16495_v39  ;;  %v16504_v39 = vld [vmem:[#allocation26_spill] sm:$0xff] }
 0x50f   : > { %11941 = vmatprep.mubr.bf16.mxu1 %v16498_v18  ;;  %v8312_v53 = vshll.u32 %v16504_v39, 16 }
 0x516   : > { %11942 = vmatmul.mubr.bf16.gmra.mrb[48].mxu1 %v16501_v1  ;;  %v8332_v1 = vrot.slane %v8330_v56, 4 }
 0x517   : > { %11961 = vmatprep.mubr.bf16.mxu1 %v12855_v54  ;;  %v8250_v54 = vld [vmem:[#allocation2 + $0x30] sm:$0xf] }
 0x51e   : > { %11962 = vmatmul.mubr.bf16.vlgmr.msra.gmra.mrb[20].mxu1 %v12856_v10  ;;  %v8309_v10 = vor.u32 %v8308_v52, %v8304_v20 }
 0x51f   : > { %11965 = vmatprep.mubr.bf16.mxu1 %v12858_v27  ;;  %11994 = vmatpush3.bf16.msra.mxu1 %v12857_v4  ;;  %v8247_v4 = vld [vmem:[#allocation2 + $0x24] sm:$0xf] }
 0x520   : > { %11995 = vmatprep.subr.bf16.mxu1 %v12860_v62  ;;  %v8317_v28 = vshrl.u32 %v8247_v4, 16  ;;  %v8320_v42 = vshll.u32 %v8247_v4, 16  ;;  %v16505_v27 = vld [vmem:[#allocation28_spill] sm:$0xff] }
 0x522   : > { %v8319_v31 = vrot.slane %v8317_v28, 4  ;;  %v8322_v18 = vrot.slane %v8320_v42, 5  ;;  %v16507_v28 = vld [vmem:[#allocation30_spill] sm:$0xff] }
 0x523   : > { %11996 = vmatpush3.bf16.msra.mxu1 %v12860_v62  ;;  %v8300_v62 = vrot.slane %v8299_v15, 4  ;;  %v8360_v42 = vshll.u32 %v16507_v28, 16  ;;  %v15833_v15 = vld [vmem:[#allocation2 + $0xd0] sm:$0xf] }
 0x524   : > { %11997 = vmatprep.subr.bf16.mxu1 %v12863_v14 }
 0x525   : > { %v8305_v45 = vsel %vm13086_vm2, %v8300_v62, %v8304_v20 }
 0x526   : > { %11966 = vmatmul.mubr.bf16.gmra.mrb[24].mxu1 %v12859_v29  ;;  %v8341_v29 = vshrl.u32 %v8250_v54, 16 }
 0x527   : > { %11969 = vmatprep.mubr.bf16.mxu1 %v12861_v2  ;;  %11998 = vmatpush3.bf16.msra.mxu1 %v12863_v14  ;;  %v8336_v14 = vshll.u32 %v16505_v27, 16  ;;  %v8314_v2 = vrot.slane %v8312_v53, 5  ;;  %v16508_v53 = vld [vmem:[#allocation31_spill] sm:$0xff] }
 0x528   : > { %11999 = vmatprep.subr.bf16.mxu1 %v12866_v50  ;;  %v8343_v41 = vrot.slane %v8341_v29, 4  ;;  %v8378_v62 = vshrl.u32 %v16508_v53, 16 }
 0x529   : > { %v8338_v60 = vrot.slane %v8336_v14, 5 }
 0x52b   : > { %12000 = vmatpush3.bf16.msra.mxu1 %v12866_v50  ;;  %v8344_v50 = vshll.u32 %v8250_v54, 16  ;;  %v9169_v54 = vrot.slane %v15833_v15, 5 }
 0x52c   : > { %12001 = vmatprep.subr.bf16.mxu1 %v12869_v47 }
 0x52e   : > { %11970 = vmatmul.mubr.bf16.gmra.mrb[28].mxu1 %v12862_v19  ;;  %v8333_v19 = vor.u32 %v8332_v1, %v15820_v25 }
 0x52f   : > { %11973 = vmatprep.mubr.bf16.mxu1 %v12864_v23  ;;  %12002 = vmatpush3.bf16.msra.mxu1 %v12869_v47  ;;  %v8323_v47 = vor.u32 %v8322_v18, %v8319_v31  ;;  %v8310_v23 = vrot.slane %v8309_v10, 4  ;;  %v8374_v31 = vshll.u32 %v16508_v53, 16  ;;  %v9013_v18 = vld [vmem:[#allocation2 + $0xcc] sm:$0xe] }
 0x530   : > { %12003 = vmatprep.subr.bf16.mxu1 %v12872_v12  ;;  %v8334_v63 = vrot.slane %v8333_v19, 4  ;;  %v10656_v27 = vrot.slane %v9013_v18, 9 }
 0x531   : > { %v8315_v4 = vsel %vm13086_vm2, %v8310_v23, %v8314_v2  ;;  %v8324_v40 = vrot.slane %v8323_v47, 4  ;;  %v9171_v2 = vrot.slane %v9169_v54, 4  ;;  %v12877_v47 = vld [vmem:[#allocation2 + $0xcc] sm:$0xff]  }
 0x532   : > { %v10617_v56 = vcombine.low %v8305_v45, %v8315_v4  ;;  %v8380_v4 = vrot.slane %v8378_v62, 4 }
 0x533   : > { %12004 = vmatpush3.bf16.msra.mxu1 %v12872_v12  ;;  %v8253_v12 = vld [vmem:[#allocation2 + $0x3c] sm:$0xf]  ;;  %v8329_v14 = vsel %vm13086_vm2, %v8324_v40, %v15820_v25  ;;  %v8362_v25 = vrot.slane %v8360_v42, 5  ;;  %v8262_v40 = vld [vmem:[#allocation2 + $0x60] sm:$0xf] }
 0x534   : > { %12005 = vmatprep.subr.bf16.mxu1 %v12875_v26  ;;  %v8365_v7 = vshrl.u32 %v8253_v12, 16  ;;  %v8368_v36 = vshll.u32 %v8253_v12, 16  ;;  %v16509_v12 = vld [vmem:[#allocation32_spill] sm:$0xff]  ;;  %v8440_v18 = vshll.u32 %v8262_v40, 16 }
 0x535   : > { %v8398_v23 = vshll.u32 %v16509_v12, 16 }
 0x536   : > { %11974 = vmatmul.mubr.bf16.gmra.mrb[32].mxu1 %v12865_v43  ;;  %v8367_v1 = vrot.slane %v8365_v7, 4  ;;  %v8370_v10 = vrot.slane %v8368_v36, 5 }
 0x537   : > { %11977 = vmatprep.mubr.bf16.mxu1 %v12867_v16  ;;  %12006 = vmatpush3.bf16.msra.mxu1 %v12875_v26  ;;  %v16506_v26 = vld [vmem:[#allocation29_spill] sm:$0xff] }
 0x538   : > { %12007 = vmatprep.subr.bf16.mxu1 %v12878_v0  ;;  %v8350_v43 = vshll.u32 %v16506_v26, 16  ;;  %v8256_v16 = vld [vmem:[#allocation2 + $0x48] sm:$0xf] }
 0x539   : > { %v8389_v22 = vshrl.u32 %v8256_v16, 16  ;;  %v8392_v59 = vshll.u32 %v8256_v16, 16  ;;  %v8339_v16 = vsel %vm13086_vm2, %v8334_v63, %v8338_v60  ;;  %v12915_v63 = vld [vmem:[#allocation2 + $0x44] sm:$0x1] }
 0x53a   : > { %v15831_v52 = vrot.slane %v8350_v43, 5  ;;  %v8259_v43 = vld [vmem:[#allocation2 + $0x54] sm:$0xf]  ;;  %v10618_v36 = vcombine.low %v8329_v14, %v8339_v16  ;;  %v8384_v42 = vshll.u32 %v12915_v63, 16 }
 0x53b   : > { %12008 = vmatpush3.bf16.msra.mxu1 %v12878_v0  ;;  %v8354_v0 = vshrl.u32 %v16506_v26, 16  ;;  %v8391_v29 = vrot.slane %v8389_v22, 4  ;;  %v8402_v26 = vshrl.u32 %v16509_v12, 16  ;;  %v8413_v28 = vshrl.u32 %v8259_v43, 16 }
 0x53c   : > { %12041 = vmatprep.subr.bf16.mxu1 %v15812_v58  ;;  %v8416_v22 = vshll.u32 %v8259_v43, 16  ;;  %v8450_v12 = vshrl.u32 %v15455_v8, 16  ;;  %v8442_v43 = vrot.slane %v8440_v18, 5 }
 0x53d   : > { %v8356_v20 = vrot.slane %v8354_v0, 4  ;;  %v15849_v0 = vsel %vm13451_vm5, %v10656_v27, %v9169_v54  ;;  %v8404_v6 = vrot.slane %v8402_v26, 4  ;;  %v12916_v27 = vld [vmem:[#allocation2 + $0x50] sm:$0x1] }
 0x53e   : > { %11978 = vmatmul.mubr.bf16.gmra.mrb[36].mxu1 %v12868_v35  ;;  %v8346_v35 = vrot.slane %v8344_v50, 5  ;;  %v8394_v50 = vrot.slane %v8392_v59, 5  ;;  %v8400_v59 = vrot.slane %v8398_v23, 5  ;;  %v8408_v14 = vshll.u32 %v12916_v27, 16 }
 0x53f   : > { %11981 = vmatprep.mubr.bf16.mxu1 %v12870_v61  ;;  %v12874_v61 = vld [vmem:[#allocation2 + $0xb4] sm:$0xff]   ;;  %v8357_v19 = vor.u32 %v8356_v20, %v15831_v52  ;;  %v16510_v20 = vld [vmem:[#allocation37_spill] sm:$0xff] }
 0x540   : > { %v8347_v39 = vor.u32 %v8346_v35, %v8343_v41  ;;  %v8371_v35 = vor.u32 %v8370_v10, %v8367_v1  ;;  %v8426_v53 = vshrl.u32 %v16510_v20, 16 }
 0x541   : > { %v8358_v60 = vrot.slane %v8357_v19, 4  ;;  %v8446_v19 = vshll.u32 %v15455_v8, 16 }
 0x542   : > { %v8348_v45 = vrot.slane %v8347_v39, 4  ;;  %v8422_v39 = vshll.u32 %v16510_v20, 16  ;;  %v8372_v1 = vrot.slane %v8371_v35, 4  ;;  %v8268_v20 = vld [vmem:[#allocation2 + $0x78] sm:$0xf] }
 0x543   : > { %v8485_v27 = vshrl.u32 %v8268_v20, 16 }
 0x544   : > { %v8353_v54 = vsel %vm13086_vm2, %v8348_v45, %v15831_v52  ;;  %v15871_v23 = vrot.slane %v8422_v39, 5  ;;  %v8428_v52 = vrot.slane %v8426_v53, 4 }
 0x546   : > { %11982 = vmatmul.mubr.bf16.gmra.mrb[40].mxu1 %v12871_v55  ;;  %v15835_v55 = vld [vmem:[#allocation2 + $0xd4] sm:$0x1]  ;;  %v8429_v39 = vor.u32 %v8428_v52, %v15871_v23 }
 0x547   : > { %11985 = vmatprep.mubr.bf16.mxu1 %v12873_v49  ;;  %v9172_v49 = vrot.slane %v15835_v55, 5 }
 0x549   : > { %v15855_v41 = vsel %vm13451_vm5, %v9171_v2, %v9172_v49  ;;  %v8363_v49 = vsel %vm13086_vm2, %v8358_v60, %v8362_v25  ;;  %v8386_v2 = vrot.slane %v8384_v42, 5  ;;  %v12880_v25 = vld [vmem:[%s16193_s4 + $0x208] sm:$0xff]   ;;  %v12917_v60 = vld [vmem:[#allocation2 + $0x5c] sm:$0x1]  ;;  %v15881_v42 = vrot.slane %v8446_v19, 5 }
 0x54a   : > { %v10688_v7 = vcombine.low %v15849_v0, %v15855_v41  ;;  %v10619_v16 = vcombine.low %v8353_v54, %v8363_v49  ;;  %v8432_v63 = vshll.u32 %v12917_v60, 16  ;;  %v12919_v54 = vld [vmem:[#allocation2 + $0x68] sm:$0x1]  ;;  %v16034_v0 = vld [vmem:[%s16195_s6] ss:$0 sm:$0xff] }
 0x54b   : > { %v8456_v49 = vshll.u32 %v12919_v54, 16 }
 0x54e   : > { %11986 = vmatmul.mubr.bf16.gmra.mrb[44].mxu1 %v12874_v61  ;;  %v15857_v61 = vrot.slane %v8374_v31, 5  ;;  %v8437_v31 = vshrl.u32 %v8262_v40, 16 }
 0x54f   : > { %11989 = vmatprep.mubr.bf16.mxu1 %v12876_v24  ;;  %v8395_v24 = vor.u32 %v8394_v50, %v8391_v29  ;;  %v8418_v29 = vrot.slane %v8416_v22, 5  ;;  %v8265_v50 = vld [vmem:[#allocation2 + $0x6c] sm:$0xf] }
 0x550   : > { %v8381_v10 = vor.u32 %v8380_v4, %v15857_v61  ;;  %v8439_v26 = vrot.slane %v8437_v31, 4  ;;  %v8461_v35 = vshrl.u32 %v8265_v50, 16  ;;  %v8464_v4 = vshll.u32 %v8265_v50, 16 }
 0x551   : > { %v8396_v62 = vrot.slane %v8395_v24, 4  ;;  %v8377_v40 = vsel %vm13086_vm2, %v8372_v1, %v15857_v61  ;;  %v8410_v24 = vrot.slane %v8408_v14, 5  ;;  %v12918_v61 = vld [vmem:[#allocation2 + $0x70] sm:$0xf]  ;;  %v8488_v14 = vshll.u32 %v8268_v20, 16 }
 0x552   : > { %v8382_v45 = vrot.slane %v8381_v10, 4  ;;  %v8443_v53 = vor.u32 %v8442_v43, %v8439_v26  ;;  %v8470_v31 = vshll.u32 %v12918_v61, 16  ;;  %v8474_v18 = vshrl.u32 %v12918_v61, 16  ;;  %v8271_v26 = vld [vmem:[#allocation2 + $0x84] sm:$0xf] }
 0x553   : > { %v8401_v8 = vsel %vm13086_vm2, %v8396_v62, %v8400_v59  ;;  %v8463_v1 = vrot.slane %v8461_v35, 4  ;;  %v8466_v10 = vrot.slane %v8464_v4, 5  ;;  %v8434_v50 = vrot.slane %v8432_v63, 5  ;;  %v12920_v35 = vld [vmem:[#allocation2 + $0x7c] sm:$0xf] }
 0x554   : > { %v8444_v19 = vrot.slane %v8443_v53, 4  ;;  %v8476_v52 = vrot.slane %v8474_v18, 4  ;;  %v8458_v43 = vrot.slane %v8456_v49, 5  ;;  %v8494_v4 = vshll.u32 %v12920_v35, 16 }
 0x555   : > { %v8490_v60 = vrot.slane %v8488_v14, 5  ;;  %v8509_v20 = vshrl.u32 %v8271_v26, 16 }
 0x556   : > { %11990 = vmatmul.mubr.bf16.gmra.mrb[48].mxu1 %v12877_v47  ;;  %v8405_v47 = vor.u32 %v8404_v6, %v8400_v59  ;;  %v8452_v6 = vrot.slane %v8450_v12, 4  ;;  %v8387_v59 = vsel %vm13086_vm2, %v8382_v45, %v8386_v2  ;;  %v15893_v12 = vrot.slane %v8470_v31, 5  ;;  %v12882_v45 = vld [vmem:[%s16193_s4 + $0x218] sm:$0xff]  }
 0x557   : > { %12009 = vmatprep.mubr.bf16.mxu1 %v10617_v56  ;;  %v8415_v56 = vrot.slane %v8413_v28, 4  ;;  %v8449_v53 = vsel %vm13086_vm2, %v8444_v19, %v15881_v42  ;;  %v15909_v54 = vrot.slane %v8494_v4, 5  ;;  %v8511_v14 = vrot.slane %v8509_v20, 4  ;;  %v8277_v4 = vld [vmem:[#allocation2 + $0x9c] sm:$0xf] }
 0x558   : > { %v8406_v22 = vrot.slane %v8405_v47, 4  ;;  %v8453_v2 = vor.u32 %v8452_v6, %v15881_v42  ;;  %v8430_v47 = vrot.slane %v8429_v39, 4  ;;  %v8512_v39 = vshll.u32 %v8271_v26, 16  ;;  %v12922_v42 = vld [vmem:[#allocation2 + $0x80] sm:$0x1] }
 0x559   : > { %v8419_v28 = vor.u32 %v8418_v29, %v8415_v56  ;;  %v10620_v56 = vcombine.low %v8377_v40, %v8387_v59  ;;  %v8498_v40 = vshrl.u32 %v12920_v35, 16  ;;  %v8477_v61 = vor.u32 %v8476_v52, %v15893_v12 }
 0x55a   : > { %v8435_v63 = vsel %vm13086_vm2, %v8430_v47, %v8434_v50  ;;  %v8454_v6 = vrot.slane %v8453_v2, 4  ;;  %v12924_v50 = vld [vmem:[#allocation2 + $0x94] sm:$0xf] }
 0x55b   : > { %v8420_v62 = vrot.slane %v8419_v28, 4  ;;  %v8500_v49 = vrot.slane %v8498_v40, 4  ;;  %v8542_v2 = vshll.u32 %v12924_v50, 16  ;;  %v8478_v47 = vrot.slane %v8477_v61, 4  ;;  %v12884_v40 = vld [vmem:[%s16193_s4 + $0x228] sm:$0xff]  }
 0x55c   : > { %v8459_v18 = vsel %vm13086_vm2, %v8454_v6, %v8458_v43  ;;  %v8546_v26 = vshrl.u32 %v12924_v50, 16  ;;  %v8280_v6 = vld [vmem:[#allocation2 + $0xa8] sm:$0xf]  ;;  %v8560_v61 = vshll.u32 %v8277_v4, 16 }
 0x55d   : > { %v8501_v35 = vor.u32 %v8500_v49, %v15909_v54  ;;  %v12885_v49 = vld [vmem:[%s16193_s4 + $0x230] sm:$0xff]  }
 0x55e   : > { %12010 = vmatmul.mubr.bf16.vlgmr.msra.gmra.mrb[20].mxu1 %v10618_v36  ;;  %v12881_v36 = vld [vmem:[%s16193_s4 + $0x210] sm:$0xff]  }
 0x55f   : > { %12013 = vmatprep.mubr.bf16.mxu1 %v10619_v16  ;;  %12042 = vmatpush3.bf16.msra.mxu1 %v15812_v58  ;;  %v8411_v58 = vsel %vm13086_vm2, %v8406_v22, %v8410_v24  ;;  %v8467_v16 = vor.u32 %v8466_v10, %v8463_v1  ;;  %v12921_v24 = vld [vmem:[#allocation2 + $0x74] sm:$0x1]  ;;  %v8487_v22 = vrot.slane %v8485_v27, 4  ;;  %v12883_v1 = vld [vmem:[%s16193_s4 + $0x220] sm:$0xff]  }
 0x560   : > { %12043 = vmatprep.subr.bf16.mxu1 %v12880_v25  ;;  %v10621_v29 = vcombine.low %v8401_v8, %v8411_v58  ;;  %v8274_v8 = vld [vmem:[#allocation2 + $0x90] sm:$0xf]  ;;  %v8480_v28 = vshll.u32 %v12921_v24, 16 }
 0x561   : > { %v8536_v31 = vshll.u32 %v8274_v8, 16  ;;  %v8468_v59 = vrot.slane %v8467_v16, 4  ;;  %v8491_v58 = vor.u32 %v8490_v60, %v8487_v22  ;;  %v10623_v16 = vcombine.low %v8449_v53, %v8459_v18 }
 0x562   : > { %v8482_v10 = vrot.slane %v8480_v28, 5  ;;  %v8557_v53 = vshrl.u32 %v8277_v4, 16 }
 0x563   : > { %12044 = vmatpush3.bf16.msra.mxu1 %v12880_v25  ;;  %v8425_v25 = vsel %vm13086_vm2, %v8420_v62, %v15871_v23  ;;  %v8533_v23 = vshrl.u32 %v8274_v8, 16  ;;  %v12923_v62 = vld [vmem:[#allocation2 + $0x88] sm:$0xf]  ;;  %v8538_v52 = vrot.slane %v8536_v31, 5  ;;  %v8473_v8 = vsel %vm13086_vm2, %v8468_v59, %v15893_v12  ;;  %v12925_v31 = vld [vmem:[#allocation2 + $0xa0] sm:$0xf] }
 0x564   : > { %12045 = vmatprep.subr.bf16.mxu1 %v12881_v36  ;;  %v8518_v27 = vshll.u32 %v12923_v62, 16  ;;  %v10622_v43 = vcombine.low %v8425_v25, %v8435_v63  ;;  %v8492_v24 = vrot.slane %v8491_v58, 4  ;;  %v15925_v63 = vrot.slane %v8542_v2, 5  ;;  %v12926_v58 = vld [vmem:[#allocation2 + $0x8c] sm:$0x1] }
 0x565   : > { %v8535_v19 = vrot.slane %v8533_v23, 4  ;;  %v8502_v23 = vrot.slane %v8501_v35, 4  ;;  %v8566_v18 = vshll.u32 %v12925_v31, 16  ;;  %v8570_v59 = vshrl.u32 %v12925_v31, 16  ;;  %v12886_v35 = vld [vmem:[%s16193_s4 + $0x238] sm:$0xff]  }
 0x566   : > { %12014 = vmatmul.mubr.bf16.gmra.mrb[24].mxu1 %v10620_v56  ;;  %v8514_v56 = vrot.slane %v8512_v39, 5  ;;  %v15923_v22 = vrot.slane %v8518_v27, 5  ;;  %v8548_v39 = vrot.slane %v8546_v26, 4  ;;  %v12928_v26 = vld [vmem:[#allocation2 + $0xac] sm:$0xf] }
 0x567   : > { %12017 = vmatprep.mubr.bf16.mxu1 %v10621_v29  ;;  %12046 = vmatpush3.bf16.msra.mxu1 %v12881_v36  ;;  %v8504_v36 = vshll.u32 %v12922_v42, 16  ;;  %v8522_v29 = vshrl.u32 %v12923_v62, 16  ;;  %v8539_v20 = vor.u32 %v8538_v52, %v8535_v19  ;;  %v8528_v42 = vshll.u32 %v12926_v58, 16 }
 0x568   : > { %12047 = vmatprep.subr.bf16.mxu1 %v12882_v45  ;;  %v8515_v25 = vor.u32 %v8514_v56, %v8511_v14  ;;  %v12927_v56 = vld [vmem:[#allocation2 + $0x98] sm:$0x1]  ;;  %v8549_v2 = vor.u32 %v8548_v39, %v15925_v63  ;;  %v8562_v19 = vrot.slane %v8560_v61, 5  ;;  %v15937_v52 = vrot.slane %v8566_v18, 5  ;;  %v12929_v39 = vld [vmem:[#allocation2 + $0xa4] sm:$0x1] }
 0x569   : > { %v8506_v28 = vrot.slane %v8504_v36, 5  ;;  %v8524_v60 = vrot.slane %v8522_v29, 4  ;;  %v8581_v36 = vshrl.u32 %v8280_v6, 16  ;;  %v8552_v29 = vshll.u32 %v12927_v56, 16  ;;  %v8286_v61 = vld [vmem:[#allocation2 + $0xc0] sm:$0xf] }
 0x56a   : > { %v8516_v27 = vrot.slane %v8515_v25, 4  ;;  %v8540_v50 = vrot.slane %v8539_v20, 4  ;;  %v8283_v25 = vld [vmem:[#allocation2 + $0xb4] sm:$0xf] }
 0x56b   : > { %12048 = vmatpush3.bf16.msra.mxu1 %v12882_v45  ;;  %v8483_v45 = vsel %vm13086_vm2, %v8478_v47, %v8482_v10  ;;  %v8497_v10 = vsel %vm13086_vm2, %v8492_v24, %v15909_v54  ;;  %v8507_v62 = vsel %vm13086_vm2, %v8502_v23, %v8506_v28  ;;  %v8525_v14 = vor.u32 %v8524_v60, %v15923_v22 }
 0x56c   : > { %12049 = vmatprep.subr.bf16.mxu1 %v12883_v1  ;;  %v10624_v12 = vcombine.low %v8473_v8, %v8483_v45  ;;  %v8559_v47 = vrot.slane %v8557_v53, 4  ;;  %v8572_v54 = vrot.slane %v8570_v59, 4  ;;  %v10625_v4 = vcombine.low %v8497_v10, %v8507_v62 }
 0x56d   : > { %v8583_v8 = vrot.slane %v8581_v36, 4  ;;  %v8521_v24 = vsel %vm13086_vm2, %v8516_v27, %v15923_v22  ;;  %v8554_v28 = vrot.slane %v8552_v29, 5  ;;  %v8526_v60 = vrot.slane %v8525_v14, 4  ;;  %v12930_v29 = vld [vmem:[#allocation2 + $0xb0] sm:$0x1] }
 0x56e   : > { %12018 = vmatmul.mubr.bf16.gmra.mrb[28].mxu1 %v10622_v43  ;;  %v8590_v43 = vshll.u32 %v12928_v26, 16  ;;  %v8563_v20 = vor.u32 %v8562_v19, %v8559_v47  ;;  %v8576_v53 = vshll.u32 %v12929_v39, 16  ;;  %v8550_v23 = vrot.slane %v8549_v2, 4  ;;  %v12931_v2 = vld [vmem:[#allocation2 + $0xb8] sm:$0xf] }
 0x56f   : > { %12021 = vmatprep.mubr.bf16.mxu1 %v10623_v16  ;;  %12050 = vmatpush3.bf16.msra.mxu1 %v12883_v1  ;;  %v8584_v1 = vshll.u32 %v8280_v6, 16  ;;  %v8594_v16 = vshrl.u32 %v12928_v26, 16  ;;  %v8545_v6 = vsel %vm13086_vm2, %v8540_v50, %v15925_v63  ;;  %v8605_v59 = vshrl.u32 %v8283_v25, 16  ;;  %v8289_v19 = vld [vmem:[#allocation2 + $0xcc] sm:$0xf] }
 0x570   : > { %12051 = vmatprep.subr.bf16.mxu1 %v12884_v40  ;;  %v8592_v31 = vrot.slane %v8590_v43, 5  ;;  %v8608_v10 = vshll.u32 %v8283_v25, 16  ;;  %v8555_v63 = vsel %vm13086_vm2, %v8550_v23, %v8554_v28  ;;  %v8632_v36 = vshll.u32 %v8286_v61, 16 }
 0x571   : > { %v8586_v45 = vrot.slane %v8584_v1, 5  ;;  %v8596_v18 = vrot.slane %v8594_v16, 4  ;;  %v10627_v62 = vcombine.low %v8545_v6, %v8555_v63  ;;  %v8578_v27 = vrot.slane %v8576_v53, 5 }
 0x572   : > { %v8600_v50 = vshll.u32 %v12930_v29, 16  ;;  %v8614_v47 = vshll.u32 %v12931_v2, 16  ;;  %v8607_v26 = vrot.slane %v8605_v59, 4  ;;  %v8610_v43 = vrot.slane %v8608_v10, 5 }
 0x573   : > { %12052 = vmatpush3.bf16.msra.mxu1 %v12884_v40  ;;  %v8530_v40 = vrot.slane %v8528_v42, 5  ;;  %v8587_v22 = vor.u32 %v8586_v45, %v8583_v8  ;;  %v8629_v42 = vshrl.u32 %v8286_v61, 16  ;;  %v8597_v56 = vor.u32 %v8596_v18, %v8592_v31  ;;  %v12932_v45 = vld [vmem:[#allocation2 + $0xc4] sm:$0xf]  ;;  %v12933_v18 = vld [vmem:[#allocation2 + $0xbc] sm:$0x1] }
 0x574   : > { %12053 = vmatprep.subr.bf16.mxu1 %v12885_v49  ;;  %v8618_v16 = vshrl.u32 %v12931_v2, 16  ;;  %v8634_v8 = vrot.slane %v8632_v36, 5  ;;  %v8653_v28 = vshrl.u32 %v8289_v19, 16  ;;  %v8662_v25 = vshll.u32 %v15833_v15, 16 }
 0x575   : > { %v8531_v58 = vsel %vm13086_vm2, %v8526_v60, %v8530_v40  ;;  %v8642_v40 = vshrl.u32 %v12932_v45, 16  ;;  %v8666_v60 = vshrl.u32 %v15833_v15, 16  ;;  %v8602_v39 = vrot.slane %v8600_v50, 5 }
 0x576   : > { %12022 = vmatmul.mubr.bf16.gmra.mrb[32].mxu1 %v10624_v12  ;;  %v8573_v12 = vor.u32 %v8572_v54, %v15937_v52  ;;  %v10626_v1 = vcombine.low %v8521_v24, %v8531_v58  ;;  %v8588_v54 = vrot.slane %v8587_v22, 4  ;;  %v8638_v24 = vshll.u32 %v12932_v45, 16 }
 0x577   : > { %12025 = vmatprep.mubr.bf16.mxu1 %v10625_v4  ;;  %12054 = vmatpush3.bf16.msra.mxu1 %v12885_v49  ;;  %v8564_v49 = vrot.slane %v8563_v20, 4  ;;  %v8631_v4 = vrot.slane %v8629_v42, 4  ;;  %v8616_v53 = vrot.slane %v8614_v47, 5  ;;  %v8598_v61 = vrot.slane %v8597_v56, 4 }
 0x578   : > { %12055 = vmatprep.subr.bf16.mxu1 %v12886_v35  ;;  %v8574_v14 = vrot.slane %v8573_v12, 4  ;;  %v8611_v23 = vor.u32 %v8610_v43, %v8607_v26  ;;  %v8620_v12 = vrot.slane %v8618_v16, 4  ;;  %v8624_v22 = vshll.u32 %v12933_v18, 16 }
 0x579   : > { %v8569_v6 = vsel %vm13086_vm2, %v8564_v49, %v15937_v52  ;;  %v8593_v59 = vsel %vm13086_vm2, %v8588_v54, %v8592_v31  ;;  %v8635_v10 = vor.u32 %v8634_v8, %v8631_v4  ;;  %v8640_v58 = vrot.slane %v8638_v24, 5  ;;  %v12934_v49 = vld [vmem:[#allocation2 + $0xc8] sm:$0x1] }
 0x57a   : > { %v8579_v20 = vsel %vm13086_vm2, %v8574_v14, %v8578_v27  ;;  %v8644_v15 = vrot.slane %v8642_v40, 4  ;;  %v8655_v63 = vrot.slane %v8653_v28, 4  ;;  %v8664_v36 = vrot.slane %v8662_v25, 5 }
 0x57b   : > { %12056 = vmatpush3.bf16.msra.mxu1 %v12886_v35  ;;  %v8656_v35 = vshll.u32 %v8289_v19, 16  ;;  %v8668_v52 = vrot.slane %v8666_v60, 4  ;;  %v8648_v27 = vshll.u32 %v12934_v49, 16  ;;  %v8612_v56 = vrot.slane %v8611_v23, 4  ;;  %v16514_v23 = vld [vmem:[#allocation36_spill] sm:$0xff]  ;;  %v16529_v49 = vld [vmem:[#allocation46_spill] sm:$0xff] }
 0x57c   : > { %v8621_v29 = vor.u32 %v8620_v12, %v8616_v53  ;;  %v8636_v50 = vrot.slane %v8635_v10, 4  ;;  %v8645_v2 = vor.u32 %v8644_v15, %v8640_v58  ;;  %v8626_v31 = vrot.slane %v8624_v22, 5  ;;  %v16515_v12 = vld [vmem:[#allocation38_spill] sm:$0xff]  ;;  %v16517_v22 = vld [vmem:[#allocation39_spill] sm:$0xff] }
 0x57d   : > { %v8658_v42 = vrot.slane %v8656_v35, 5  ;;  %v8669_v19 = vor.u32 %v8668_v52, %v8664_v36  ;;  %v8672_v54 = vshll.u32 %v15835_v55, 16  ;;  %v8650_v26 = vrot.slane %v8648_v27, 5  ;;  %v16521_v15 = vld [vmem:[#allocation42_spill] sm:$0xff]  ;;  %v16526_v52 = vld [vmem:[#allocation45_spill] sm:$0xff]  ;;  %v16530_v27 = vld [vmem:[#allocation47_spill] sm:$0xff] }
 0x57e   : > { %12026 = vmatmul.mubr.bf16.gmra.mrb[36].mxu1 %v10626_v1  ;;  %v10628_v1 = vcombine.low %v8569_v6, %v8579_v20  ;;  %v8617_v43 = vsel %vm13086_vm2, %v8612_v56, %v8616_v53  ;;  %v8622_v16 = vrot.slane %v8621_v29, 4  ;;  %v8641_v4 = vsel %vm13086_vm2, %v8636_v50, %v8640_v58  ;;  %v16512_v53 = vld [vmem:[#allocation35_spill] sm:$0xff]  ;;  %v16520_v58 = vld [vmem:[#allocation40_spill] sm:$0xff]  ;;  %v16535_v50 = vld [vmem:[#allocation50_spill] sm:$0xff] }
 0x57f   : > { %12029 = vmatprep.mubr.bf16.mxu1 %v10627_v62  ;;  %v8603_v62 = vsel %vm13086_vm2, %v8598_v61, %v8602_v39  ;;  %v8659_v47 = vor.u32 %v8658_v42, %v8655_v63  ;;  %v8646_v8 = vrot.slane %v8645_v2, 4  ;;  %v8670_v40 = vrot.slane %v8669_v19, 4  ;;  %v16511_v39 = vld [vmem:[#allocation34_spill] sm:$0xff]  ;;  %v16532_v56 = vld [vmem:[#allocation48_spill] sm:$0xff] }
 0x580   : > { %v10629_v14 = vcombine.low %v8593_v59, %v8603_v62  ;;  %v8627_v45 = vsel %vm13086_vm2, %v8622_v16, %v8626_v31  ;;  %v8674_v28 = vrot.slane %v8672_v54, 5  ;;  %v16513_v61 = vcombine.low %v16511_v39, %v16512_v53  ;;  %v16518_v59 = vld [vmem:[#allocation41_spill] sm:$0xff]  ;;  %v16537_v31 = vld [vmem:[#allocation51_spill] sm:$0xff] }
 0x581   : > { %v8660_v24 = vrot.slane %v8659_v47, 4  ;;  %v10630_v35 = vcombine.low %v8617_v43, %v8627_v45  ;;  %v8651_v25 = vsel %vm13086_vm2, %v8646_v8, %v8650_v26  ;;  %v16516_v18 = vcombine.low %v16514_v23, %v16515_v12  ;;  %v12941_v26 = vld [vmem:[%s13095_s15 + $0x24] sm:$0xf]  ;;  %v12942_v16 = vld [vmem:[%s13095_s15 + $0x28] sm:$0xf] }
 0x582   : > { %v10631_v55 = vcombine.low %v8641_v4, %v8651_v25  ;;  %v8675_v6 = vsel %vm13086_vm2, %v8670_v40, %v8674_v28  ;;  %v16519_v10 = vcombine.low %v16517_v22, %v16518_v59  ;;  %v16522_v63 = vcombine.low %v16520_v58, %v16521_v15  ;;  %v12943_v40 = vld [vmem:[%s13095_s15 + $0x18] sm:$0xf] }
 0x583   : > { %v8665_v60 = vsel %vm13086_vm2, %v8660_v24, %v8664_v36  ;;  %v16524_v42 = vcombine.low %v15485_v33, %v16523_v9  ;;  %v16525_v36 = vld [vmem:[#allocation44_spill] sm:$0xff]  ;;  %v16528_v62 = vcombine.low %v15506_v48, %v15517_v51  ;;  %v16533_v29 = vcombine.low %v15530_v44, %v16532_v56  ;;  %v16534_v33 = vld [vmem:[#allocation49_spill] sm:$0xff]  ;;  %v12936_v44 = vld [vmem:[%s13095_s15 + $0x10] sm:$0xf] }
 0x584   : > { %v10632_v20 = vcombine.low %v8665_v60, %v8675_v6  ;;  %v16536_v2 = vcombine.low %v16534_v33, %v16535_v50  ;;  %v16538_v47 = vcombine.low %v15557_v21, %v16537_v31  ;;  %v12935_v48 = vld [vmem:[%s13095_s15 + $0xc] sm:$0xf]  ;;  %v9500_v21 = vunpack.c.l.bf16 %v12936_v44  ;;  %v12947_v33 = vld [vmem:[%s13095_s15 + $0x3c] sm:$0xf]  ;;  %v12949_v44 = vld [vmem:[%s13095_s15 + $0x30] sm:$0xf] }
 0x585   : > { %v9499_v51 = vunpack.c.l.bf16 %v12935_v48  ;;  %v9505_v43 = vunpack.c.l.bf16 %v12941_v26  ;;  %v9506_v4 = vunpack.c.l.bf16 %v12942_v16  ;;  %v9502_v28 = vunpack.c.l.bf16 %v12943_v40 }
 0x586   : > { %12030 = vmatmul.mubr.bf16.gmra.mrb[40].mxu1 %v10628_v1  ;;  %v16527_v1 = vcombine.low %v16525_v36, %v16526_v52  ;;  %v9599_v37 = vrot.slane %v9500_v21, 1  ;;  %v9511_v50 = vunpack.c.l.bf16 %v12947_v33  ;;  %v9508_v21 = vunpack.c.l.bf16 %v12949_v44 }
 0x587   : > { %12033 = vmatprep.mubr.bf16.mxu1 %v10629_v14  ;;  %v16531_v14 = vcombine.low %v16529_v49, %v16530_v27  ;;  %v9608_v58 = vrot.slane %v9505_v43, 1  ;;  %v9609_v15 = vrot.slane %v9506_v4, 1 }
 0x588   : > { %v9613_v4 = vrot.slane %v9508_v21, 1 }
 0x58e   : > { %12034 = vmatmul.mubr.bf16.gmra.mrb[44].mxu1 %v10630_v35  ;;  %v12944_v35 = vld [vmem:[%s13095_s15 + $0x1c] sm:$0xf] }
 0x58f   : > { %12037 = vmatprep.mubr.bf16.mxu1 %v10631_v55  ;;  %v9503_v25 = vunpack.c.l.bf16 %v12944_v35 }
 0x591   : > { %v9604_v36 = vrot.slane %v9503_v25, 1 }
 0x596   : > { %12038 = vmatmul.mubr.bf16.gmra.mrb[48].mxu1 %v10632_v20  ;;  %v12945_v20 = vld [vmem:[%s13095_s15 + $0x2c] sm:$0xf] }
 0x597   : > { %12057 = vmatprep.mubr.bf16.mxu1 %v16513_v61  ;;  %v9507_v39 = vunpack.c.l.bf16 %v12945_v20 }
 0x59e   : > { %12058 = vmatmul.mubr.bf16.vlgmr.msra.gmra.mrb[20].mxu1 %v16516_v18  ;;  %v12946_v18 = vld [vmem:[%s13095_s15 + $0x20] sm:$0xf] }
 0x59f   : > { %12061 = vmatprep.mubr.bf16.mxu1 %v16519_v10  ;;  %v9504_v22 = vunpack.c.l.bf16 %v12946_v18  ;;  %v12955_v18 = vld [vmem:[%s13095_s15 + $0x48] sm:$0xf] }
 0x5a1   : > { %v9606_v27 = vrot.slane %v9504_v22, 1  ;;  %v9514_v22 = vunpack.c.l.bf16 %v12955_v18 }
 0x5a6   : > { %12062 = vmatmul.mubr.bf16.gmra.mrb[24].mxu1 %v16522_v63 }
 0x5a7   : > { %12065 = vmatprep.mubr.bf16.mxu1 %v16524_v42  ;;  %v9603_v42 = vrot.slane %v9502_v28, 1 }
 0x5ae   : > { %12066 = vmatmul.mubr.bf16.gmra.mrb[28].mxu1 %v16527_v1 }
 0x5af   : > { %12069 = vmatprep.mubr.bf16.mxu1 %v16528_v62  ;;  %v9611_v62 = vrot.slane %v9507_v39, 1  ;;  %v12954_v39 = vld [vmem:[%s13095_s15 + $0x58] sm:$0xf] }
 0x5b6   : > { %12070 = vmatmul.mubr.bf16.gmra.mrb[32].mxu1 %v16531_v14 }
 0x5b7   : > { %12073 = vmatprep.mubr.bf16.mxu1 %v16533_v29  ;;  %v9610_v29 = vsel %vm9592_vm14, %v9608_v58, %v9609_v15 }
 0x5be   : > { %12074 = vmatmul.mubr.bf16.gmra.mrb[36].mxu1 %v16536_v2  ;;  %v12948_v2 = vld [vmem:[%s13095_s15 + $0x40] sm:$0xf] }
 0x5bf   : > { %12077 = vmatprep.mubr.bf16.mxu1 %v16538_v47  ;;  %v9512_v31 = vunpack.c.l.bf16 %v12948_v2 }
 0x5c1   : > { %v9619_v26 = vrot.slane %v9512_v31, 1  ;;  %v9623_v31 = vrot.slane %v9514_v22, 1 }
 0x5c6   : > { %12078 = vmatmul.mubr.bf16.gmra.mrb[40].mxu1 %v10684_v34  ;;  %v12938_v34 = vld [vmem:[%s13095_s15 + $0x4] sm:$0xf] }
 0x5c7   : > { %12081 = vmatprep.mubr.bf16.mxu1 %v10685_v11  ;;  %v9497_v3 = vunpack.c.l.bf16 %v12938_v34  ;;  %v9501_v11 = vunpack.c.l.bf16 %v12939_v57  ;;  %v9612_v57 = vsel %vm9592_vm14, %v9609_v15, %v9611_v62 }
 0x5c9   : > { %v9601_v41 = vrot.slane %v9501_v11, 1  ;;  %v12951_v11 = vld [vmem:[%s13095_s15 + $0x44] sm:$0xf] }
 0x5ca   : > { %v9513_v17 = vunpack.c.l.bf16 %v12951_v11 }
 0x5cb   : > { %v9602_v6 = vsel %vm9592_vm14, %v9599_v37, %v9601_v41 }
 0x5cc   : > { %v9621_v40 = vrot.slane %v9513_v17, 1  ;;  %v12960_v17 = vld [vmem:[%s13095_s15 + $0x70] sm:$0xf] }
 0x5ce   : > { %12082 = vmatmul.mubr.bf16.gmra.mrb[44].mxu1 %v10686_v5  ;;  %v9598_v5 = vrot.slane %v9499_v51, 1  ;;  %v9605_v51 = vsel %vm9592_vm14, %v9603_v42, %v9604_v36 }
 0x5cf   : > { %12085 = vmatprep.mubr.bf16.mxu1 %v10687_v13  ;;  %v9594_v13 = vrot.slane %v9497_v3, 1 }
 0x5d0   : > { %v9600_v54 = vsel %vm9592_vm14, %v9598_v5, %v9599_v37 }
 0x5d1   : > { %v9595_v24 = vsel %vm9592_vm14, %v9593_v46, %v9594_v13  ;;  %v9607_v46 = vsel %vm9592_vm14, %v9604_v36, %v9606_v27 }
 0x5d6   : > { %12086 = vmatmul.mubr.bf16.gmra.mrb[48].mxu1 %v10688_v7  ;;  %v9596_v7 = vrot.slane %v9498_v38, 1 }
 0x5d8   : > { %v9597_v12 = vsel %vm9592_vm14, %v9594_v13, %v9596_v7  ;;  %v12952_v13 = vld [vmem:[%s13095_s15 + $0x38] sm:$0xf] }
 0x5d9   : > { %v9510_v41 = vunpack.c.l.bf16 %v12952_v13  ;;  %v12961_v13 = vld [vmem:[%s13095_s15 + $0x60] sm:$0xf] }
 0x5db   : > { %v9616_v35 = vrot.slane %v9510_v41, 1  ;;  %v9520_v41 = vunpack.c.l.bf16 %v12961_v13 }
 0x671   : > { %v12059_v19 = vpop.f32.mrb[20].mxu1 }
 0x672   : > { %v9714_v8 = vadd.f32 %v12059_v19, %v16034_v0  ;;  %v9337_v45 = vpop.f32.mrb[21].mxu1 }
 0x673   : > { %v9712_v55 = vadd.f32 %v16034_v0, %v9337_v45  ;;  %v12060_v60 = vpop.f32.mrb[22].mxu1 }
 0x674   : > { %v9746_v53 = vadd.f32 %v9714_v8, %v9600_v54  ;;  %v9715_v61 = vadd.f32 %v12060_v60, %v16034_v0  ;;  %v9340_v23 = vpop.f32.mrb[23].mxu1  ;;  %v9618_v54 = vrot.slane %v9511_v50, 1  ;;  %v9614_v8 = vrot.slane %v9509_v32, 1 }
 0x675   : > { %v9744_v59 = vadd.f32 %v9712_v55, %v9595_v24  ;;  %v9713_v10 = vadd.f32 %v16034_v0, %v9340_v23 }
 0x676   : > { %v9778_v63 = vmax.f32 %v9746_v53, 0.0  ;;  %v9747_v9 = vadd.f32 %v9715_v61, %v9602_v6  ;;  %v9620_v60 = vsel %vm9592_vm14, %v9618_v54, %v9619_v26  ;;  %v12953_v6 = vld [vmem:[%s13095_s15 + $0x54] sm:$0xf]  ;;  %v9518_v53 = vunpack.c.l.bf16 %v12954_v39 }
 0x677   : > { %v9776_v52 = vmax.f32 %v9744_v59, 0.0  ;;  %v9745_v1 = vadd.f32 %v9713_v10, %v9597_v12  ;;  %v9517_v20 = vunpack.c.l.bf16 %v12953_v6  ;;  %v9615_v12 = vsel %vm9592_vm14, %v9613_v4, %v9614_v8  ;;  %v12956_v59 = vld [vmem:[%s13095_s15 + $0x4c] sm:$0xf] }
 0x678   : > { %9810 = vst [vmem:[%s16053_s10 + $0x10] sm:$0xff] %v9778_v63  ;;  %v9779_v49 = vmax.f32 %v9747_v9, 0.0  ;;  %v9515_v10 = vunpack.c.l.bf16 %v12956_v59  ;;  %v9622_v63 = vsel %vm9592_vm14, %v9619_v26, %v9621_v40  ;;  %v12957_v9 = vld [vmem:[%s13095_s15 + $0x5c] sm:$0xf]  ;;  %v9617_v62 = vsel %vm9592_vm14, %v9614_v8, %v9616_v35 }
 0x679   : > { %9808 = vst [vmem:[%s16053_s10] sm:$0xff] %v9776_v52  ;;  %v9777_v14 = vmax.f32 %v9745_v1, 0.0  ;;  %v12063_v56 = vpop.f32.mrb[24].mxu1  ;;  %v9519_v42 = vunpack.c.l.bf16 %v12957_v9  ;;  %v9629_v33 = vrot.slane %v9518_v53, 1  ;;  %v9633_v53 = vrot.slane %v9520_v41, 1 }
 0x67a   : > { %9811 = vst [vmem:[%s16053_s10 + $0x18] sm:$0xff] %v9779_v49  ;;  %v9718_v47 = vadd.f32 %v12063_v56, %v16034_v0  ;;  %v9353_v48 = vpop.f32.mrb[25].mxu1  ;;  %v12958_v49 = vld [vmem:[%s13095_s15 + $0x50] sm:$0xf] }
 0x67b   : > { %9809 = vst [vmem:[%s16053_s10 + $0x8] sm:$0xff] %v9777_v14  ;;  %v9716_v34 = vadd.f32 %v16034_v0, %v9353_v48  ;;  %v12064_v3 = vpop.f32.mrb[26].mxu1  ;;  %v9516_v27 = vunpack.c.l.bf16 %v12958_v49  ;;  %v9631_v44 = vrot.slane %v9519_v42, 1  ;;  %v12966_v42 = vld [vmem:[%s13095_s15 + $0x88] sm:$0xf] }
 0x67c   : > { %v9750_v38 = vadd.f32 %v9718_v47, %v9610_v29  ;;  %v9719_v5 = vadd.f32 %v12064_v3, %v16034_v0  ;;  %v9356_v37 = vpop.f32.mrb[27].mxu1  ;;  %v9628_v29 = vrot.slane %v9517_v20, 1  ;;  %v9624_v47 = vrot.slane %v9515_v10, 1  ;;  %v12967_v49 = vld [vmem:[%s13095_s15 + $0x78] sm:$0xf] }
 0x67d   : > { %v9748_v7 = vadd.f32 %v9716_v34, %v9605_v51  ;;  %v9717_v19 = vadd.f32 %v16034_v0, %v9356_v37  ;;  %v9626_v30 = vrot.slane %v9516_v27, 1  ;;  %v9526_v27 = vunpack.c.l.bf16 %v12967_v49 }
 0x67e   : > { %v9782_v43 = vmax.f32 %v9750_v38, 0.0  ;;  %v9751_v16 = vadd.f32 %v9719_v5, %v9612_v57  ;;  %v9630_v3 = vsel %vm9592_vm14, %v9628_v29, %v9629_v33  ;;  %v12959_v57 = vld [vmem:[%s13095_s15 + $0x6c] sm:$0xf]  ;;  %v9524_v38 = vunpack.c.l.bf16 %v12960_v17 }
 0x67f   : > { %v9780_v45 = vmax.f32 %v9748_v7, 0.0  ;;  %v9749_v24 = vadd.f32 %v9717_v19, %v9607_v46  ;;  %v9523_v11 = vunpack.c.l.bf16 %v12959_v57  ;;  %v9625_v46 = vsel %vm9592_vm14, %v9623_v31, %v9624_v47  ;;  %v12962_v7 = vld [vmem:[%s13095_s15 + $0x64] sm:$0xf] }
 0x680   : > { %9814 = vst [vmem:[%s16053_s10 + $0x30] sm:$0xff] %v9782_v43  ;;  %v9783_v28 = vmax.f32 %v9751_v16, 0.0  ;;  %v9521_v19 = vunpack.c.l.bf16 %v12962_v7  ;;  %v9632_v43 = vsel %vm9592_vm14, %v9629_v33, %v9631_v44  ;;  %v12963_v16 = vld [vmem:[%s13095_s15 + $0x74] sm:$0xf]  ;;  %v9627_v40 = vsel %vm9592_vm14, %v9624_v47, %v9626_v30 }
 0x681   : > { %9812 = vst [vmem:[%s16053_s10 + $0x20] sm:$0xff] %v9780_v45  ;;  %v9781_v25 = vmax.f32 %v9749_v24, 0.0  ;;  %v12067_v55 = vpop.f32.mrb[28].mxu1  ;;  %v9525_v4 = vunpack.c.l.bf16 %v12963_v16  ;;  %v9639_v6 = vrot.slane %v9524_v38, 1  ;;  %v9643_v38 = vrot.slane %v9526_v27, 1 }
 0x682   : > { %9815 = vst [vmem:[%s16053_s10 + $0x38] sm:$0xff] %v9783_v28  ;;  %v9722_v61 = vadd.f32 %v12067_v55, %v16034_v0  ;;  %v9369_v23 = vpop.f32.mrb[29].mxu1  ;;  %v12964_v28 = vld [vmem:[%s13095_s15 + $0x68] sm:$0xf] }
 0x683   : > { %9813 = vst [vmem:[%s16053_s10 + $0x28] sm:$0xff] %v9781_v25  ;;  %v9720_v58 = vadd.f32 %v16034_v0, %v9369_v23  ;;  %v12068_v15 = vpop.f32.mrb[30].mxu1  ;;  %v9522_v35 = vunpack.c.l.bf16 %v12964_v28  ;;  %v9641_v18 = vrot.slane %v9525_v4, 1  ;;  %v12972_v4 = vld [vmem:[%s13095_s15 + $0xa0] sm:$0xf] }
 0x684   : > { %v9754_v36 = vadd.f32 %v9722_v61, %v9620_v60  ;;  %v9723_v52 = vadd.f32 %v12068_v15, %v16034_v0  ;;  %v9372_v1 = vpop.f32.mrb[31].mxu1  ;;  %v9638_v60 = vrot.slane %v9523_v11, 1  ;;  %v9634_v61 = vrot.slane %v9521_v19, 1  ;;  %v12973_v28 = vld [vmem:[%s13095_s15 + $0x90] sm:$0xf] }
 0x685   : > { %v9752_v14 = vadd.f32 %v9720_v58, %v9615_v12  ;;  %v9721_v56 = vadd.f32 %v16034_v0, %v9372_v1  ;;  %v9636_v59 = vrot.slane %v9522_v35, 1  ;;  %v9532_v35 = vunpack.c.l.bf16 %v12973_v28 }
 0x686   : > { %v9786_v50 = vmax.f32 %v9754_v36, 0.0  ;;  %v9755_v2 = vadd.f32 %v9723_v52, %v9622_v63  ;;  %v9640_v15 = vsel %vm9592_vm14, %v9638_v60, %v9639_v6  ;;  %v12965_v63 = vld [vmem:[%s13095_s15 + $0x84] sm:$0xf]  ;;  %v9530_v36 = vunpack.c.l.bf16 %v12966_v42 }
 0x687   : > { %v9784_v48 = vmax.f32 %v9752_v14, 0.0  ;;  %v9753_v51 = vadd.f32 %v9721_v56, %v9617_v62  ;;  %v9529_v9 = vunpack.c.l.bf16 %v12965_v63  ;;  %v9635_v62 = vsel %vm9592_vm14, %v9633_v53, %v9634_v61  ;;  %v12968_v14 = vld [vmem:[%s13095_s15 + $0x7c] sm:$0xf] }
 0x688   : > { %9818 = vst [vmem:[%s16053_s10 + $0x50] sm:$0xff] %v9786_v50  ;;  %v9787_v21 = vmax.f32 %v9755_v2, 0.0  ;;  %v9527_v56 = vunpack.c.l.bf16 %v12968_v14  ;;  %v9642_v50 = vsel %vm9592_vm14, %v9639_v6, %v9641_v18  ;;  %v12969_v2 = vld [vmem:[%s13095_s15 + $0x8c] sm:$0xf]  ;;  %v9637_v44 = vsel %vm9592_vm14, %v9634_v61, %v9636_v59 }
 0x689   : > { %9816 = vst [vmem:[%s16053_s10 + $0x40] sm:$0xff] %v9784_v48  ;;  %v9785_v32 = vmax.f32 %v9753_v51, 0.0  ;;  %v12071_v34 = vpop.f32.mrb[32].mxu1  ;;  %v9531_v31 = vunpack.c.l.bf16 %v12969_v2  ;;  %v9649_v57 = vrot.slane %v9530_v36, 1  ;;  %v9653_v36 = vrot.slane %v9532_v35, 1 }
 0x68a   : > { %9819 = vst [vmem:[%s16053_s10 + $0x58] sm:$0xff] %v9787_v21  ;;  %v9726_v5 = vadd.f32 %v12071_v34, %v16034_v0  ;;  %v9385_v37 = vpop.f32.mrb[33].mxu1  ;;  %v12970_v21 = vld [vmem:[%s13095_s15 + $0x80] sm:$0xf] }
 0x68b   : > { %9817 = vst [vmem:[%s16053_s10 + $0x48] sm:$0xff] %v9785_v32  ;;  %v9724_v54 = vadd.f32 %v16034_v0, %v9385_v37  ;;  %v12072_v26 = vpop.f32.mrb[34].mxu1  ;;  %v9528_v30 = vunpack.c.l.bf16 %v12970_v21  ;;  %v9651_v13 = vrot.slane %v9531_v31, 1  ;;  %v12978_v31 = vld [vmem:[%s13095_s15 + $0xb8] sm:$0xf] }
 0x68c   : > { %v9758_v8 = vadd.f32 %v9726_v5, %v9630_v3  ;;  %v9727_v45 = vadd.f32 %v12072_v26, %v16034_v0  ;;  %v9388_v24 = vpop.f32.mrb[35].mxu1  ;;  %v9648_v3 = vrot.slane %v9529_v9, 1  ;;  %v9644_v5 = vrot.slane %v9527_v56, 1  ;;  %v12979_v21 = vld [vmem:[%s13095_s15 + $0xa8] sm:$0xf] }
 0x68d   : > { %v9756_v25 = vadd.f32 %v9724_v54, %v9625_v46  ;;  %v9725_v55 = vadd.f32 %v16034_v0, %v9388_v24  ;;  %v9646_v7 = vrot.slane %v9528_v30, 1  ;;  %v9538_v30 = vunpack.c.l.bf16 %v12979_v21 }
 0x68e   : > { %v9790_v20 = vmax.f32 %v9758_v8, 0.0  ;;  %v9759_v39 = vadd.f32 %v9727_v45, %v9632_v43  ;;  %v9650_v26 = vsel %vm9592_vm14, %v9648_v3, %v9649_v57  ;;  %v12971_v43 = vld [vmem:[%s13095_s15 + $0x9c] sm:$0xf]  ;;  %v9536_v8 = vunpack.c.l.bf16 %v12972_v4 }
 0x68f   : > { %v9788_v23 = vmax.f32 %v9756_v25, 0.0  ;;  %v9757_v12 = vadd.f32 %v9725_v55, %v9627_v40  ;;  %v9535_v16 = vunpack.c.l.bf16 %v12971_v43  ;;  %v9645_v40 = vsel %vm9592_vm14, %v9643_v38, %v9644_v5  ;;  %v12974_v25 = vld [vmem:[%s13095_s15 + $0x94] sm:$0xf] }
 0x690   : > { %9822 = vst [vmem:[%s16053_s10 + $0x70] sm:$0xff] %v9790_v20  ;;  %v9791_v22 = vmax.f32 %v9759_v39, 0.0  ;;  %v9533_v55 = vunpack.c.l.bf16 %v12974_v25  ;;  %v9652_v20 = vsel %vm9592_vm14, %v9649_v57, %v9651_v13  ;;  %v12975_v39 = vld [vmem:[%s13095_s15 + $0xa4] sm:$0xf]  ;;  %v9647_v18 = vsel %vm9592_vm14, %v9644_v5, %v9646_v7 }
 0x691   : > { %9820 = vst [vmem:[%s16053_s10 + $0x60] sm:$0xff] %v9788_v23  ;;  %v9789_v10 = vmax.f32 %v9757_v12, 0.0  ;;  %v12075_v58 = vpop.f32.mrb[36].mxu1  ;;  %v9537_v53 = vunpack.c.l.bf16 %v12975_v39  ;;  %v9659_v63 = vrot.slane %v9536_v8, 1  ;;  %v9663_v8 = vrot.slane %v9538_v30, 1 }
 0x692   : > { %9823 = vst [vmem:[%s16053_s10 + $0x78] sm:$0xff] %v9791_v22  ;;  %v9730_v52 = vadd.f32 %v12075_v58, %v16034_v0  ;;  %v9401_v1 = vpop.f32.mrb[37].mxu1  ;;  %v12976_v22 = vld [vmem:[%s13095_s15 + $0x98] sm:$0xf] }
 0x693   : > { %9821 = vst [vmem:[%s16053_s10 + $0x68] sm:$0xff] %v9789_v10  ;;  %v9728_v29 = vadd.f32 %v16034_v0, %v9401_v1  ;;  %v12076_v33 = vpop.f32.mrb[38].mxu1  ;;  %v9534_v59 = vunpack.c.l.bf16 %v12976_v22  ;;  %v9661_v49 = vrot.slane %v9537_v53, 1 }
 0x694   : > { %v9762_v47 = vadd.f32 %v9730_v52, %v9640_v15  ;;  %v9731_v48 = vadd.f32 %v12076_v33, %v16034_v0  ;;  %v9404_v51 = vpop.f32.mrb[39].mxu1  ;;  %v9658_v15 = vrot.slane %v9535_v16, 1  ;;  %v9654_v52 = vrot.slane %v9533_v55, 1 }
 0x695   : > { %v9760_v32 = vadd.f32 %v9728_v29, %v9635_v62  ;;  %v9729_v34 = vadd.f32 %v16034_v0, %v9404_v51  ;;  %v9656_v14 = vrot.slane %v9534_v59, 1 }
 0x696   : > { %v9794_v11 = vmax.f32 %v9762_v47, 0.0  ;;  %v9763_v17 = vadd.f32 %v9731_v48, %v9642_v50  ;;  %v9660_v33 = vsel %vm9592_vm14, %v9658_v15, %v9659_v63  ;;  %v12977_v50 = vld [vmem:[%s13095_s15 + $0xb4] sm:$0xf]  ;;  %v9542_v47 = vunpack.c.l.bf16 %v12978_v31 }
 0x697   : > { %v9792_v37 = vmax.f32 %v9760_v32, 0.0  ;;  %v9761_v46 = vadd.f32 %v9729_v34, %v9637_v44  ;;  %v9541_v2 = vunpack.c.l.bf16 %v12977_v50  ;;  %v9655_v44 = vsel %vm9592_vm14, %v9653_v36, %v9654_v52  ;;  %v12980_v32 = vld [vmem:[%s13095_s15 + $0xac] sm:$0xf] }
 0x698   : > { %9826 = vst [vmem:[%s16053_s10 + $0x90] sm:$0xff] %v9794_v11  ;;  %v9795_v41 = vmax.f32 %v9763_v17, 0.0  ;;  %v9539_v34 = vunpack.c.l.bf16 %v12980_v32  ;;  %v9662_v11 = vsel %vm9592_vm14, %v9659_v63, %v9661_v49  ;;  %v12981_v17 = vld [vmem:[%s13095_s15 + $0xbc] sm:$0xf]  ;;  %v9657_v13 = vsel %vm9592_vm14, %v9654_v52, %v9656_v14 }
 0x699   : > { %9824 = vst [vmem:[%s16053_s10 + $0x80] sm:$0xff] %v9792_v37  ;;  %v9793_v19 = vmax.f32 %v9761_v46, 0.0  ;;  %v12079_v54 = vpop.f32.mrb[40].mxu1  ;;  %v9543_v38 = vunpack.c.l.bf16 %v12981_v17  ;;  %v9669_v43 = vrot.slane %v9542_v47, 1 }
 0x69a   : > { %9827 = vst [vmem:[%s16053_s10 + $0x98] sm:$0xff] %v9795_v41  ;;  %v9734_v45 = vadd.f32 %v12079_v54, %v16034_v0  ;;  %v9417_v24 = vpop.f32.mrb[41].mxu1  ;;  %v12982_v41 = vld [vmem:[%s13095_s15 + $0xb0] sm:$0xf] }
 0x69b   : > { %9825 = vst [vmem:[%s16053_s10 + $0x88] sm:$0xff] %v9793_v19  ;;  %v9732_v60 = vadd.f32 %v16034_v0, %v9417_v24  ;;  %v12080_v6 = vpop.f32.mrb[42].mxu1  ;;  %v9540_v7 = vunpack.c.l.bf16 %v12982_v41  ;;  %v9671_v28 = vrot.slane %v9543_v38, 1 }
 0x69c   : > { %v9766_v61 = vadd.f32 %v9734_v45, %v9650_v26  ;;  %v9735_v23 = vadd.f32 %v12080_v6, %v16034_v0  ;;  %v9420_v12 = vpop.f32.mrb[43].mxu1  ;;  %v9668_v26 = vrot.slane %v9541_v2, 1  ;;  %v9664_v45 = vrot.slane %v9539_v34, 1 }
 0x69d   : > { %v9764_v10 = vadd.f32 %v9732_v60, %v9645_v40  ;;  %v9733_v58 = vadd.f32 %v16034_v0, %v9420_v12  ;;  %v9666_v25 = vrot.slane %v9540_v7, 1  ;;  %v9672_v12 = vsel %vm9592_vm14, %v9669_v43, %v9671_v28 }
 0x69e   : > { %v9798_v9 = vmax.f32 %v9766_v61, 0.0  ;;  %v9767_v42 = vadd.f32 %v9735_v23, %v9652_v20  ;;  %v9670_v6 = vsel %vm9592_vm14, %v9668_v26, %v9669_v43  ;;  %v9665_v53 = vsel %vm9592_vm14, %v9663_v8, %v9664_v45 }
 0x69f   : > { %v9796_v1 = vmax.f32 %v9764_v10, 0.0  ;;  %v9765_v62 = vadd.f32 %v9733_v58, %v9647_v18  ;;  %v9667_v10 = vsel %vm9592_vm14, %v9664_v45, %v9666_v25 }
 0x6a0   : > { %9830 = vst [vmem:[%s16053_s10 + $0xb0] sm:$0xff] %v9798_v9  ;;  %v9799_v27 = vmax.f32 %v9767_v42, 0.0 }
 0x6a1   : > { %9828 = vst [vmem:[%s16053_s10 + $0xa0] sm:$0xff] %v9796_v1  ;;  %v9797_v56 = vmax.f32 %v9765_v62, 0.0  ;;  %v12083_v29 = vpop.f32.mrb[44].mxu1 }
 0x6a2   : > { %9831 = vst [vmem:[%s16053_s10 + $0xb8] sm:$0xff] %v9799_v27  ;;  %v9738_v48 = vadd.f32 %v12083_v29, %v16034_v0  ;;  %v9433_v51 = vpop.f32.mrb[45].mxu1 }
 0x6a3   : > { %9829 = vst [vmem:[%s16053_s10 + $0xa8] sm:$0xff] %v9797_v56  ;;  %v9736_v3 = vadd.f32 %v16034_v0, %v9433_v51  ;;  %v12084_v57 = vpop.f32.mrb[46].mxu1 }
 0x6a4   : > { %v9770_v5 = vadd.f32 %v9738_v48, %v9660_v33  ;;  %v9739_v37 = vadd.f32 %v12084_v57, %v16034_v0  ;;  %v9436_v46 = vpop.f32.mrb[47].mxu1 }
 0x6a5   : > { %v9768_v19 = vadd.f32 %v9736_v3, %v9655_v44  ;;  %v9737_v54 = vadd.f32 %v16034_v0, %v9436_v46 }
 0x6a6   : > { %v9802_v16 = vmax.f32 %v9770_v5, 0.0  ;;  %v9771_v4 = vadd.f32 %v9739_v37, %v9662_v11 }
 0x6a7   : > { %v9800_v24 = vmax.f32 %v9768_v19, 0.0  ;;  %v9769_v40 = vadd.f32 %v9737_v54, %v9657_v13 }
 0x6a8   : > { %9834 = vst [vmem:[%s16053_s10 + $0xd0] sm:$0xff] %v9802_v16  ;;  %v9803_v35 = vmax.f32 %v9771_v4, 0.0 }
 0x6a9   : > { %9832 = vst [vmem:[%s16053_s10 + $0xc0] sm:$0xff] %v9800_v24  ;;  %v9801_v55 = vmax.f32 %v9769_v40, 0.0  ;;  %v12087_v60 = vpop.f32.mrb[48].mxu1 }
 0x6aa   : > { %9835 = vst [vmem:[%s16053_s10 + $0xd8] sm:$0xff] %v9803_v35  ;;  %v9742_v20 = vadd.f32 %v12087_v60, %v16034_v0  ;;  %v9449_v39 = vpop.f32.mrb[49].mxu1 }
 0x6ab   : > { %9833 = vst [vmem:[%s16053_s10 + $0xc8] sm:$0xff] %v9801_v55  ;;  %v9740_v61 = vadd.f32 %v16034_v0, %v9449_v39  ;;  %v12088_v23 = vpop.f32.mrb[50].mxu1 }
 0x6ac   : > { %v9774_v18 = vadd.f32 %v9742_v20, %v9670_v6  ;;  %v9743_v22 = vadd.f32 %v12088_v23, %v16034_v0  ;;  %v9452_v59 = vpop.f32.mrb[51].mxu1 }
 0x6ad   : > { %v9772_v58 = vadd.f32 %v9740_v61, %v9665_v53  ;;  %v9741_v15 = vadd.f32 %v16034_v0, %v9452_v59 }
 0x6ae   : > { %v9806_v63 = vmax.f32 %v9774_v18, 0.0  ;;  %v9775_v9 = vadd.f32 %v9743_v22, %v9672_v12 }
 0x6af   : > { %v9804_v42 = vmax.f32 %v9772_v58, 0.0  ;;  %v9773_v36 = vadd.f32 %v9741_v15, %v9667_v10 }
 0x6b0   : > { %9838 = vst [vmem:[%s16053_s10 + $0xf0] sm:$0xff] %v9806_v63  ;;  %v9807_v52 = vmax.f32 %v9775_v9, 0.0 }
 0x6b1   : > { %9836 = vst [vmem:[%s16053_s10 + $0xe0] sm:$0xff] %v9804_v42  ;;  %v9805_v1 = vmax.f32 %v9773_v36, 0.0 }
 0x6b2   : > { %9839 = vst [vmem:[%s16053_s10 + $0xf8] sm:$0xff] %v9807_v52 }
 0x6b3   : > { %9837 = vst [vmem:[%s16053_s10 + $0xe8] sm:$0xff] %v9805_v1 }
 0x6b4 PF: > { %s17_s25 = sadd.s32 1, %s13005_s25   ;;  %s16539_s23 = smov %s13001_s24 }
 0x6b5   : > { %p14_p5 = scmp.ge.s32.totalorder %s17_s25, 4   ;;  %s16540_s24 = smov %s16542_s26 }
 0x6b7   :  { %16 = sbr.rel (!%p14_p5) target bundleno = 2 (0x2), region = 107 }

</bundles_post_ra>
